<compile_context>
chip_gen: v5e
topology: v5e:2x2
jax: 0.10.0
libtpu: 0.0.40
codegen_flags: <defaults>
</compile_context>

<pallas_src>
import functools
import numpy as np

import jax
import jax.numpy as jnp
from jax.experimental import pallas as pl
from jax.experimental.pallas import tpu as pltpu


# ----------------------------------------------------------------------------- #
# Fused kernel
# ----------------------------------------------------------------------------- #
def _cti_tov_kernel(x_ref, c_ref, wproj_ref, bproj_ref, wo_ref,
                    w1_ref, w2_ref, shift_ref, vecd_ref, vech_ref, mix_ref,
                    o_ref, *, n_heads, eps=1e-5):
    nb, S, D = c_ref.shape
    E = D // n_heads
    HD = n_heads * D
    scale = 1.0 / (float(E) ** 0.5)

    # ---- weights / packed vectors: loaded once, reused for every batch row ----
    w_proj = wproj_ref[...]            # [D, H*D + 2D]  (masked-Wq stack | Wk | Wv)
    b_proj = bproj_ref[...]            # [1, H*D + 2D]
    wo_st = wo_ref[...]                # [D, H*D]       (row-masked Wo stack)
    w1 = w1_ref[...]                   # [D, Hd]        (ffn_norm affine folded in)
    w2 = w2_ref[...]                   # [Hd, D]
    shift2 = shift_ref[...]            # [off+S, S]     ([Mprev ; pad ; Mnext])
    bo = vecd_ref[0:1, :]              # [1, D]
    b2 = vecd_ref[1:2, :]
    gamma = vecd_ref[2:3, :]
    b1 = vech_ref[0:1, :]              # [1, Hd]
    w_dw0 = vech_ref[1:2, :]
    w_dw1 = vech_ref[2:3, :]
    w_dw2 = vech_ref[3:4, :]
    b_dw = vech_ref[4:5, :]
    mix = mix_ref[...]                 # [Lout, S]

    next_off = shift2.shape[0] - S     # sublane-aligned start of the "next" block

    for b in range(nb):                # static unroll over batch rows in this block
        c = c_ref[b]                   # [S, D]

        # query/keys/value LayerNorms share one mean/var; affines folded into w_proj
        mu = jnp.mean(c, axis=-1, keepdims=True)
        var = jnp.mean((c - mu) ** 2, axis=-1, keepdims=True)   # biased (torch LN)
        xn = (c - mu) * jax.lax.rsqrt(var + eps)

        # single 192-lane projection: [masked-q per head | k | v]
        proj = jnp.dot(xn, w_proj, preferred_element_type=jnp.float32) + b_proj
        k = proj[:, HD:HD + D]                                   # [S, D]
        v = proj[:, HD + D:HD + 2 * D]                           # [S, D]
        # per-head (v_h @ Wo_h), all heads at once, 128 lanes wide
        vo_all = jnp.dot(v, wo_st, preferred_element_type=jnp.float32)   # [S, H*D]

        attn = jnp.zeros((S, D), jnp.float32)
        for h in range(n_heads):                                 # static unroll
            q_h = proj[:, h * D:(h + 1) * D]                     # masked q, head h
            s = jax.lax.dot_general(q_h, k, (((1,), (1,)), ((), ())),
                                    preferred_element_type=jnp.float32) * scale
            s = s - jnp.max(s, axis=-1, keepdims=True)
            e = jnp.exp(s)
            p = e * pl.reciprocal(jnp.sum(e, axis=-1, keepdims=True), approx=True)
            attn = attn + jnp.dot(p, vo_all[:, h * D:(h + 1) * D],
                                  preferred_element_type=jnp.float32)
        c_attn = attn + bo                                        # attention output

        # --- ConvFFN (ffn_norm folded into fc1; depthwise k=3 via ONE shift matmul) ---
        mu2 = jnp.mean(c_attn, axis=-1, keepdims=True)
        var2 = jnp.mean((c_attn - mu2) ** 2, axis=-1, keepdims=True)
        xn2 = (c_attn - mu2) * jax.lax.rsqrt(var2 + eps)
        hid = jnp.dot(xn2, w1, preferred_element_type=jnp.float32) + b1   # [S, Hd]
        h2 = jnp.dot(shift2, hid, preferred_element_type=jnp.float32)     # [off+S, Hd]
        h_prev = h2[0:S, :]
        h_next = h2[next_off:next_off + S, :]
        y = h_prev * w_dw0 + hid * w_dw1 + h_next * w_dw2 + b_dw
        y = 0.5 * y * (1.0 + jax.lax.erf(y * (2.0 ** -0.5)))      # exact GELU
        ffn_out = jnp.dot(y, w2, preferred_element_type=jnp.float32) + b2

        c_new = c_attn + ffn_out                                   # residual (VMEM)

        # interpolate / pad / truncate / segment-sum as one matmul + gamma residual
        mixed = jnp.dot(mix, c_new, preferred_element_type=jnp.float32)   # [Lout, D]
        o_ref[b] = x_ref[b] + gamma * mixed


# ----------------------------------------------------------------------------- #
# Host-side precomputation (done once): folded/stacked weights, mix/shift matrices
# ----------------------------------------------------------------------------- #
def _interp_matrix(lin, lout):
    # F.interpolate(mode='linear', align_corners=False, recompute_scale_factor=True)
    j = np.arange(lout, dtype=np.float64)
    src = np.clip((j + 0.5) * (lin / lout) - 0.5, 0.0, lin - 1)
    i0 = np.floor(src).astype(np.int64)
    i1 = np.minimum(i0 + 1, lin - 1)
    w = src - i0
    m = np.zeros((lout, lin), np.float32)
    m[np.arange(lout), i0] += (1.0 - w).astype(np.float32)
    m[np.arange(lout), i1] += w.astype(np.float32)
    return m


def _pad_trunc_matrix(lin, lout):
    # repeat last row if lout > lin, truncate if lout < lin, identity if equal
    m = np.zeros((lout, lin), np.float32)
    for j in range(lout):
        m[j, min(j, lin - 1)] = 1.0
    return m


def build_mix_matrix(idxs, S):
    L1, L2, L3 = idxs[0], idxs[1] - idxs[0], S - idxs[1]
    L1p = int(np.floor(L1 * (L3 / L1)))     # recompute_scale_factor semantics
    L2p = int(np.floor(L2 * (L3 / L2)))
    m1 = _pad_trunc_matrix(L1p, L2p) @ _interp_matrix(L1, L1p)   # [L2p, L1]
    m2 = _interp_matrix(L2, L2p)                                  # [L2p, L2]
    m3 = _pad_trunc_matrix(L3, L2p)                               # [L2p, L3]
    return jnp.asarray(np.concatenate([m1, m2, m3], axis=1)), L2p  # [L2p, S], Lout


def build_shift_stack(idxs, S):
    # Rows 0:S       -> Mprev : (Mprev @ h)[i] = h[i-1], zero at segment starts
    # Rows off:off+S -> Mnext : (Mnext @ h)[i] = h[i+1], zero at segment ends
    # off is 8-aligned so the in-kernel result slices land on sublane boundaries.
    starts = {0, idxs[0], idxs[1]}
    ends = {idxs[0] - 1, idxs[1] - 1, S - 1}
    off = ((S + 7) // 8) * 8
    m = np.zeros((off + S, S), np.float32)
    for i in range(S):
        if i not in starts:
            m[i, i - 1] = 1.0
        if i not in ends:
            m[off + i, i + 1] = 1.0
    return jnp.asarray(m)


def prepare_inputs(params, idxs, S):
    """Fold LayerNorm affines into adjacent Linears, fold the per-head masks into
    stacked q/out projection weights, pack the tiny bias vectors into two slabs,
    and build the static shift / mix matrices.  Run once; forward = 1 pallas_call."""
    D = params["ln_q_w"].shape[-1]
    nh = params["n_heads"]
    E = D // nh
    a, f = params["attn"], params["ffn"]

    def fold(ln_w, ln_b, w, b):
        # LN_affine(xn) @ W + b  ==  xn @ (diag(ln_w) W) + (ln_b W + b)
        ln_w = np.asarray(ln_w, np.float64).reshape(-1, 1)
        ln_b = np.asarray(ln_b, np.float64).reshape(1, -1)
        w = np.asarray(w, np.float64)
        b = np.asarray(b, np.float64)
        return (ln_w * w).astype(np.float32), (ln_b @ w + b).astype(np.float32)

    wq, bq = fold(params["ln_q_w"], params["ln_q_b"], a["wq"], a["bq"])
    wk, bk = fold(params["ln_k_w"], params["ln_k_b"], a["wk"], a["bk"])
    wv, bv = fold(params["ln_v_w"], params["ln_v_b"], a["wv"], a["bv"])
    w1, b1 = fold(params["ln_f_w"], params["ln_f_b"], f["w1"], f["b1"])

    wo = np.asarray(a["wo"], np.float32)

    # Head masks folded into stacked weights:
    #   wq_st block h keeps only output columns of head h  -> proj slice == q * mask_h
    #   wo_st block h keeps only input rows of head h      -> v @ block == v_h @ Wo_h
    wq_st = np.zeros((D, nh * D), np.float32)
    bq_st = np.zeros((1, nh * D), np.float32)
    wo_st = np.zeros((D, nh * D), np.float32)
    for h in range(nh):
        lo, hi = h * E, (h + 1) * E
        wq_st[:, h * D + lo:h * D + hi] = wq[:, lo:hi]
        bq_st[:, h * D + lo:h * D + hi] = bq[:, lo:hi]
        wo_st[lo:hi, h * D:(h + 1) * D] = wo[lo:hi, :]

    w_proj = np.concatenate([wq_st, wk, wv], axis=1)     # [D, nh*D + 2D] (192 lanes)
    b_proj = np.concatenate([bq_st, bk, bv], axis=1)     # [1, nh*D + 2D]

    Hd = np.asarray(f["w1"]).shape[-1]
    vec_d = np.concatenate([np.asarray(a["bo"], np.float32).reshape(1, D),
                            np.asarray(f["b2"], np.float32).reshape(1, D),
                            np.asarray(params["gamma"], np.float32).reshape(1, D)],
                           axis=0)                        # [3, D]
    vec_h = np.concatenate([b1.reshape(1, Hd),
                            np.asarray(f["dw_w"], np.float32).reshape(3, Hd),
                            np.asarray(f["dw_b"], np.float32).reshape(1, Hd)],
                           axis=0)                        # [5, Hd]

    mix, lout = build_mix_matrix(idxs, S)

    return {
        "w_proj": jnp.asarray(w_proj), "b_proj": jnp.asarray(b_proj),
        "wo_st": jnp.asarray(wo_st),
        "w1": jnp.asarray(w1), "w2": jnp.asarray(np.asarray(f["w2"], np.float32)),
        "shift2": build_shift_stack(idxs, S),
        "vec_d": jnp.asarray(vec_d), "vec_h": jnp.asarray(vec_h),
        "mix": mix, "n_heads": nh, "lout": lout,
    }


# ----------------------------------------------------------------------------- #
# Forward: one fused pallas_call
# ----------------------------------------------------------------------------- #
def _prefer_batch_grid():
    # v7x has 2 TensorCores per chip -> shard the batch rows across them.
    # v5e/v6e are single-TC: a batch grid is just extra grid-step overhead,
    # so collapse to a single step and unroll the batch inside the kernel.
    try:
        kind = jax.devices()[0].device_kind.lower()
    except Exception:
        return False
    return "v7" in kind


def cti_tov_forward(x, c, prep, *, batch_grid=None):
    if batch_grid is None:
        batch_grid = _prefer_batch_grid()
    B, S, D = c.shape
    Lout = prep["lout"]

    xb = 1 if batch_grid else B            # batch rows per block
    grid = (B,) if batch_grid else (1,)

    def const_spec(a):
        nd = a.ndim
        return pl.BlockSpec(a.shape, lambda i, _nd=nd: (0,) * _nd)

    operands = (x, c,
                prep["w_proj"], prep["b_proj"], prep["wo_st"],
                prep["w1"], prep["w2"], prep["shift2"],
                prep["vec_d"], prep["vec_h"], prep["mix"])

    in_specs = [pl.BlockSpec((xb, Lout, D), lambda i: (i, 0, 0)),
                pl.BlockSpec((xb, S, D), lambda i: (i, 0, 0))]
    in_specs += [const_spec(a) for a in operands[2:]]   # weights fetched once

    return pl.pallas_call(
        functools.partial(_cti_tov_kernel, n_heads=prep["n_heads"]),
        out_shape=jax.ShapeDtypeStruct((B, Lout, D), jnp.float32),
        grid=grid,
        in_specs=in_specs,
        out_specs=pl.BlockSpec((xb, Lout, D), lambda i: (i, 0, 0)),
        compiler_params=pltpu.CompilerParams(
            dimension_semantics=("parallel",) if batch_grid else ("arbitrary",)),
    )(*operands)


# ----------------------------------------------------------------------------- #
# Pure-JAX reference (direct translation of the PyTorch forward, same assumptions)
# ----------------------------------------------------------------------------- #
def _reference_forward(x, c, idxs, params):
    def ln(t, w, b, eps=1e-5):
        mu = jnp.mean(t, axis=-1, keepdims=True)
        var = jnp.mean((t - mu) ** 2, axis=-1, keepdims=True)
        return (t - mu) * jax.lax.rsqrt(var + eps) * w + b

    p = params
    a, f = p["attn"], p["ffn"]
    qn = ln(c, p["ln_q_w"], p["ln_q_b"])
    kn = ln(c, p["ln_k_w"], p["ln_k_b"])
    vn = ln(c, p["ln_v_w"], p["ln_v_b"])
    q = qn @ a["wq"] + a["bq"]
    k = kn @ a["wk"] + a["bk"]
    v = vn @ a["wv"] + a["bv"]
    B, S, D = q.shape
    H = p["n_heads"]
    E = D // H
    q = q.reshape(B, S, H, E)
    k = k.reshape(B, S, H, E)
    v = v.reshape(B, S, H, E)
    s = jnp.einsum("bqhe,bkhe->bhqk", q, k) * (1.0 / (float(E) ** 0.5))
    w = jax.nn.softmax(s, axis=-1)
    ctx = jnp.einsum("bhqk,bkhe->bqhe", w, v).reshape(B, S, D)
    c_attn = ctx @ a["wo"] + a["bo"]

    fin = ln(c_attn, p["ln_f_w"], p["ln_f_b"])
    h = fin @ f["w1"] + f["b1"]
    bounds = [0, idxs[0], idxs[1], S]
    segs = []
    for si in range(3):
        seg = h[:, bounds[si]:bounds[si + 1], :]
        zp = jnp.zeros_like(seg[:, :1, :])
        prev = jnp.concatenate([zp, seg[:, :-1, :]], axis=1)
        nxt = jnp.concatenate([seg[:, 1:, :], zp], axis=1)
        segs.append(prev * f["dw_w"][0] + seg * f["dw_w"][1] + nxt * f["dw_w"][2] + f["dw_b"])
    y = jnp.concatenate(segs, axis=1)
    y = 0.5 * y * (1.0 + jax.lax.erf(y * (2.0 ** -0.5)))
    c_new = c_attn + (y @ f["w2"] + f["b2"])

    mix, _ = build_mix_matrix(idxs, S)
    mixed = jnp.einsum("ls,bsd->bld", mix, c_new)
    return x + p["gamma"] * mixed


# ----------------------------------------------------------------------------- #
# Deterministic parameter init + example run
# ----------------------------------------------------------------------------- #
def make_params(key, dim, n_heads, hidden, init_values=0.5):
    ks = iter(jax.random.split(key, 32))

    def nrm(shape, scale=0.1):
        return jax.random.normal(next(ks), shape, jnp.float32) * scale

    return {
        "n_heads": n_heads,
        "ln_q_w": 1.0 + nrm((1, dim)), "ln_q_b": nrm((1, dim)),
        "ln_k_w": 1.0 + nrm((1, dim)), "ln_k_b": nrm((1, dim)),
        "ln_v_w": 1.0 + nrm((1, dim)), "ln_v_b": nrm((1, dim)),
        "ln_f_w": 1.0 + nrm((1, dim)), "ln_f_b": nrm((1, dim)),
        "attn": {
            "wq": nrm((dim, dim)), "bq": nrm((1, dim)),
            "wk": nrm((dim, dim)), "bk": nrm((1, dim)),
            "wv": nrm((dim, dim)), "bv": nrm((1, dim)),
            "wo": nrm((dim, dim)), "bo": nrm((1, dim)),
        },
        "ffn": {
            "w1": nrm((dim, hidden)), "b1": nrm((1, hidden)),
            "dw_w": nrm((3, hidden)), "dw_b": nrm((1, hidden)),   # depthwise k=3 taps
            "w2": nrm((hidden, dim)), "b2": nrm((1, dim)),
        },
        # PyTorch default init_values=0.0 would zero the whole branch; use a nonzero
        # deterministic value so the kernel path is actually exercised.
        "gamma": jnp.full((1, dim), init_values, jnp.float32),
    }


if __name__ == "__main__":
    dim, n_heads, cffn_ratio = 32, 4, 2.0
    hidden = int(dim * cffn_ratio)

    B = 2
    idxs = (16, 24)          # segment boundaries -> segments of length 16, 8, 4
    S = 28                   # total "c" sequence length

    key = jax.random.PRNGKey(0)
    k_x, k_c, k_p = jax.random.split(key, 3)
    params = make_params(k_p, dim, n_heads, hidden, init_values=0.5)

    prep = prepare_inputs(params, idxs, S)        # one-time host-side fold / matrices
    Lout = prep["lout"]                           # = 4 for these idxs

    x = jax.random.normal(k_x, (B, Lout, dim), jnp.float32)
    c = jax.random.normal(k_c, (B, S, dim), jnp.float32)

    out = cti_tov_forward(x, c, prep)
    out = jax.block_until_ready(out)
    assert out.shape == (B, Lout, dim)
    assert bool(jnp.all(jnp.isfinite(out)))

    ref = _reference_forward(x, c, idxs, params)
    max_err = float(jnp.max(jnp.abs(out - ref)))
    assert max_err < 1e-2, f"kernel/reference mismatch: max abs err {max_err}"

    print("KERNEL_OK")
</pallas_src>

<mosaic_0001>
module attributes {stable_mosaic.version = 11 : i64} {
  func.func @_cti_tov_kernel(%arg0: i32, %arg1: memref<2x4x32xf32, #tpu.memory_space<vmem>>, %arg2: memref<2x28x32xf32, #tpu.memory_space<vmem>>, %arg3: memref<32x192xf32, #tpu.memory_space<vmem>>, %arg4: memref<1x192xf32, #tpu.memory_space<vmem>>, %arg5: memref<32x128xf32, #tpu.memory_space<vmem>>, %arg6: memref<32x64xf32, #tpu.memory_space<vmem>>, %arg7: memref<64x32xf32, #tpu.memory_space<vmem>>, %arg8: memref<60x28xf32, #tpu.memory_space<vmem>>, %arg9: memref<3x32xf32, #tpu.memory_space<vmem>>, %arg10: memref<5x64xf32, #tpu.memory_space<vmem>>, %arg11: memref<4x28xf32, #tpu.memory_space<vmem>>, %arg12: memref<2x4x32xf32, #tpu.memory_space<vmem>>) attributes {dimension_semantics = [#tpu.dimension_semantics<arbitrary>], iteration_bounds = array<i64: 1>, scalar_prefetch = 0 : i64, scratch_operands = 0 : i64, tpu.core_type = #tpu.core_type<tc>, window_params = [{transform_indices = @transform_0, window_bounds = array<i64: 2, 4, 32>}, {transform_indices = @transform_1, window_bounds = array<i64: 2, 28, 32>}, {pipeline_mode = #tpu.pipeline_mode<synchronous>, transform_indices = @transform_2, window_bounds = array<i64: 32, 192>}, {pipeline_mode = #tpu.pipeline_mode<synchronous>, transform_indices = @transform_3, window_bounds = array<i64: 1, 192>}, {pipeline_mode = #tpu.pipeline_mode<synchronous>, transform_indices = @transform_4, window_bounds = array<i64: 32, 128>}, {pipeline_mode = #tpu.pipeline_mode<synchronous>, transform_indices = @transform_5, window_bounds = array<i64: 32, 64>}, {pipeline_mode = #tpu.pipeline_mode<synchronous>, transform_indices = @transform_6, window_bounds = array<i64: 64, 32>}, {pipeline_mode = #tpu.pipeline_mode<synchronous>, transform_indices = @transform_7, window_bounds = array<i64: 60, 28>}, {pipeline_mode = #tpu.pipeline_mode<synchronous>, transform_indices = @transform_8, window_bounds = array<i64: 3, 32>}, {pipeline_mode = #tpu.pipeline_mode<synchronous>, transform_indices = @transform_9, window_bounds = array<i64: 5, 64>}, {pipeline_mode = #tpu.pipeline_mode<synchronous>, transform_indices = @transform_10, window_bounds = array<i64: 4, 28>}, {transform_indices = @transform_11, window_bounds = array<i64: 2, 4, 32>}]} {
    %c0 = arith.constant 0 : index
    %c0_0 = arith.constant 0 : index
    %0 = vector.load %arg3[%c0, %c0_0] : memref<32x192xf32, #tpu.memory_space<vmem>>, vector<32x192xf32>
    %c0_1 = arith.constant 0 : index
    %c0_2 = arith.constant 0 : index
    %1 = vector.load %arg4[%c0_1, %c0_2] : memref<1x192xf32, #tpu.memory_space<vmem>>, vector<1x192xf32>
    %c0_3 = arith.constant 0 : index
    %c0_4 = arith.constant 0 : index
    %2 = vector.load %arg5[%c0_3, %c0_4] : memref<32x128xf32, #tpu.memory_space<vmem>>, vector<32x128xf32>
    %c0_5 = arith.constant 0 : index
    %c0_6 = arith.constant 0 : index
    %3 = vector.load %arg6[%c0_5, %c0_6] : memref<32x64xf32, #tpu.memory_space<vmem>>, vector<32x64xf32>
    %c0_7 = arith.constant 0 : index
    %c0_8 = arith.constant 0 : index
    %4 = vector.load %arg7[%c0_7, %c0_8] : memref<64x32xf32, #tpu.memory_space<vmem>>, vector<64x32xf32>
    %c0_9 = arith.constant 0 : index
    %c0_10 = arith.constant 0 : index
    %5 = vector.load %arg8[%c0_9, %c0_10] : memref<60x28xf32, #tpu.memory_space<vmem>>, vector<60x28xf32>
    %c0_11 = arith.constant 0 : index
    %c0_12 = arith.constant 0 : index
    %6 = vector.load %arg9[%c0_11, %c0_12] : memref<3x32xf32, #tpu.memory_space<vmem>>, vector<1x32xf32>
    %c1 = arith.constant 1 : index
    %c0_13 = arith.constant 0 : index
    %7 = vector.load %arg9[%c1, %c0_13] : memref<3x32xf32, #tpu.memory_space<vmem>>, vector<1x32xf32>
    %c2 = arith.constant 2 : index
    %c0_14 = arith.constant 0 : index
    %8 = vector.load %arg9[%c2, %c0_14] : memref<3x32xf32, #tpu.memory_space<vmem>>, vector<1x32xf32>
    %c0_15 = arith.constant 0 : index
    %c0_16 = arith.constant 0 : index
    %9 = vector.load %arg10[%c0_15, %c0_16] : memref<5x64xf32, #tpu.memory_space<vmem>>, vector<1x64xf32>
    %c1_17 = arith.constant 1 : index
    %c0_18 = arith.constant 0 : index
    %10 = vector.load %arg10[%c1_17, %c0_18] : memref<5x64xf32, #tpu.memory_space<vmem>>, vector<1x64xf32>
    %c2_19 = arith.constant 2 : index
    %c0_20 = arith.constant 0 : index
    %11 = vector.load %arg10[%c2_19, %c0_20] : memref<5x64xf32, #tpu.memory_space<vmem>>, vector<1x64xf32>
    %c3 = arith.constant 3 : index
    %c0_21 = arith.constant 0 : index
    %12 = vector.load %arg10[%c3, %c0_21] : memref<5x64xf32, #tpu.memory_space<vmem>>, vector<1x64xf32>
    %c4 = arith.constant 4 : index
    %c0_22 = arith.constant 0 : index
    %13 = vector.load %arg10[%c4, %c0_22] : memref<5x64xf32, #tpu.memory_space<vmem>>, vector<1x64xf32>
    %c0_23 = arith.constant 0 : index
    %c0_24 = arith.constant 0 : index
    %14 = vector.load %arg11[%c0_23, %c0_24] : memref<4x28xf32, #tpu.memory_space<vmem>>, vector<4x28xf32>
    %c0_25 = arith.constant 0 : index
    %c0_26 = arith.constant 0 : index
    %c0_27 = arith.constant 0 : index
    %15 = vector.load %arg2[%c0_25, %c0_26, %c0_27] : memref<2x28x32xf32, #tpu.memory_space<vmem>>, vector<1x28x32xf32>
    %16 = vector.shape_cast %15 : vector<1x28x32xf32> to vector<28x32xf32>
    %cst = arith.constant dense<0.000000e+00> : vector<28xf32>
    %17 = vector.multi_reduction <add>, %16, %cst [1] : vector<28x32xf32> to vector<28xf32>
    %18 = vector.shape_cast %17 : vector<28xf32> to vector<28x1xf32>
    %cst_28 = arith.constant 3.200000e+01 : f32
    %19 = vector.broadcast %cst_28 : f32 to vector<28x1xf32>
    %20 = arith.divf %18, %19 : vector<28x1xf32>
    %21 = vector.broadcast %20 : vector<28x1xf32> to vector<28x32xf32>
    %22 = arith.subf %16, %21 : vector<28x32xf32>
    %23 = arith.mulf %22, %22 : vector<28x32xf32>
    %cst_29 = arith.constant dense<0.000000e+00> : vector<28xf32>
    %24 = vector.multi_reduction <add>, %23, %cst_29 [1] : vector<28x32xf32> to vector<28xf32>
    %25 = vector.shape_cast %24 : vector<28xf32> to vector<28x1xf32>
    %cst_30 = arith.constant 3.200000e+01 : f32
    %26 = vector.broadcast %cst_30 : f32 to vector<28x1xf32>
    %27 = arith.divf %25, %26 : vector<28x1xf32>
    %28 = vector.broadcast %20 : vector<28x1xf32> to vector<28x32xf32>
    %29 = arith.subf %16, %28 : vector<28x32xf32>
    %cst_31 = arith.constant 9.99999974E-6 : f32
    %30 = vector.broadcast %cst_31 : f32 to vector<28x1xf32>
    %31 = arith.addf %27, %30 : vector<28x1xf32>
    %32 = math.rsqrt %31 : vector<28x1xf32>
    %33 = vector.broadcast %32 : vector<28x1xf32> to vector<28x32xf32>
    %34 = arith.mulf %29, %33 : vector<28x32xf32>
    %cst_32 = arith.constant dense<0.000000e+00> : vector<28x192xf32>
    %35 = tpu.matmul %34, %0, %cst_32 {dimension_numbers = #tpu.dot_dimension_numbers<[1], [0], [0], [1], [0, 0, 1, 1], [], []>} : vector<28x32xf32>, vector<32x192xf32>, vector<28x192xf32> -> vector<28x192xf32>
    %36 = vector.broadcast %1 : vector<1x192xf32> to vector<28x192xf32>
    %37 = arith.addf %35, %36 : vector<28x192xf32>
    %38 = vector.extract_strided_slice %37 {offsets = [0, 128], sizes = [28, 32], strides = [1, 1]} : vector<28x192xf32> to vector<28x32xf32>
    %39 = vector.extract_strided_slice %37 {offsets = [0, 160], sizes = [28, 32], strides = [1, 1]} : vector<28x192xf32> to vector<28x32xf32>
    %cst_33 = arith.constant dense<0.000000e+00> : vector<28x128xf32>
    %40 = tpu.matmul %39, %2, %cst_33 {dimension_numbers = #tpu.dot_dimension_numbers<[1], [0], [0], [1], [0, 0, 1, 1], [], []>} : vector<28x32xf32>, vector<32x128xf32>, vector<28x128xf32> -> vector<28x128xf32>
    %cst_34 = arith.constant 0.000000e+00 : f32
    %41 = vector.broadcast %cst_34 : f32 to vector<28x32xf32>
    %42 = vector.extract_strided_slice %37 {offsets = [0, 0], sizes = [28, 32], strides = [1, 1]} : vector<28x192xf32> to vector<28x32xf32>
    %cst_35 = arith.constant dense<0.000000e+00> : vector<28x28xf32>
    %43 = tpu.matmul %42, %38, %cst_35 {dimension_numbers = #tpu.dot_dimension_numbers<[1], [1], [0], [0], [0, 0, 1, 0], [], []>} : vector<28x32xf32>, vector<28x32xf32>, vector<28x28xf32> -> vector<28x28xf32>
    %cst_36 = arith.constant 0.353553385 : f32
    %44 = vector.broadcast %cst_36 : f32 to vector<28x28xf32>
    %45 = arith.mulf %43, %44 : vector<28x28xf32>
    %cst_37 = arith.constant dense<0xFF800000> : vector<28xf32>
    %46 = vector.multi_reduction <maximumf>, %45, %cst_37 [1] : vector<28x28xf32> to vector<28xf32>
    %47 = vector.shape_cast %46 : vector<28xf32> to vector<28x1xf32>
    %48 = vector.broadcast %47 : vector<28x1xf32> to vector<28x28xf32>
    %49 = arith.subf %45, %48 : vector<28x28xf32>
    %50 = math.exp %49 : vector<28x28xf32>
    %cst_38 = arith.constant dense<0.000000e+00> : vector<28xf32>
    %51 = vector.multi_reduction <add>, %50, %cst_38 [1] : vector<28x28xf32> to vector<28xf32>
    %52 = vector.shape_cast %51 : vector<28xf32> to vector<28x1xf32>
    %53 = tpu.reciprocal %52 {approx = true} : vector<28x1xf32> -> vector<28x1xf32>
    %54 = vector.broadcast %53 : vector<28x1xf32> to vector<28x28xf32>
    %55 = arith.mulf %50, %54 : vector<28x28xf32>
    %56 = vector.extract_strided_slice %40 {offsets = [0, 0], sizes = [28, 32], strides = [1, 1]} : vector<28x128xf32> to vector<28x32xf32>
    %cst_39 = arith.constant dense<0.000000e+00> : vector<28x32xf32>
    %57 = tpu.matmul %55, %56, %cst_39 {dimension_numbers = #tpu.dot_dimension_numbers<[1], [0], [0], [1], [0, 0, 1, 1], [], []>} : vector<28x28xf32>, vector<28x32xf32>, vector<28x32xf32> -> vector<28x32xf32>
    %58 = arith.addf %41, %57 : vector<28x32xf32>
    %59 = vector.extract_strided_slice %37 {offsets = [0, 32], sizes = [28, 32], strides = [1, 1]} : vector<28x192xf32> to vector<28x32xf32>
    %cst_40 = arith.constant dense<0.000000e+00> : vector<28x28xf32>
    %60 = tpu.matmul %59, %38, %cst_40 {dimension_numbers = #tpu.dot_dimension_numbers<[1], [1], [0], [0], [0, 0, 1, 0], [], []>} : vector<28x32xf32>, vector<28x32xf32>, vector<28x28xf32> -> vector<28x28xf32>
    %cst_41 = arith.constant 0.353553385 : f32
    %61 = vector.broadcast %cst_41 : f32 to vector<28x28xf32>
    %62 = arith.mulf %60, %61 : vector<28x28xf32>
    %cst_42 = arith.constant dense<0xFF800000> : vector<28xf32>
    %63 = vector.multi_reduction <maximumf>, %62, %cst_42 [1] : vector<28x28xf32> to vector<28xf32>
    %64 = vector.shape_cast %63 : vector<28xf32> to vector<28x1xf32>
    %65 = vector.broadcast %64 : vector<28x1xf32> to vector<28x28xf32>
    %66 = arith.subf %62, %65 : vector<28x28xf32>
    %67 = math.exp %66 : vector<28x28xf32>
    %cst_43 = arith.constant dense<0.000000e+00> : vector<28xf32>
    %68 = vector.multi_reduction <add>, %67, %cst_43 [1] : vector<28x28xf32> to vector<28xf32>
    %69 = vector.shape_cast %68 : vector<28xf32> to vector<28x1xf32>
    %70 = tpu.reciprocal %69 {approx = true} : vector<28x1xf32> -> vector<28x1xf32>
    %71 = vector.broadcast %70 : vector<28x1xf32> to vector<28x28xf32>
    %72 = arith.mulf %67, %71 : vector<28x28xf32>
    %73 = vector.extract_strided_slice %40 {offsets = [0, 32], sizes = [28, 32], strides = [1, 1]} : vector<28x128xf32> to vector<28x32xf32>
    %cst_44 = arith.constant dense<0.000000e+00> : vector<28x32xf32>
    %74 = tpu.matmul %72, %73, %cst_44 {dimension_numbers = #tpu.dot_dimension_numbers<[1], [0], [0], [1], [0, 0, 1, 1], [], []>} : vector<28x28xf32>, vector<28x32xf32>, vector<28x32xf32> -> vector<28x32xf32>
    %75 = arith.addf %58, %74 : vector<28x32xf32>
    %76 = vector.extract_strided_slice %37 {offsets = [0, 64], sizes = [28, 32], strides = [1, 1]} : vector<28x192xf32> to vector<28x32xf32>
    %cst_45 = arith.constant dense<0.000000e+00> : vector<28x28xf32>
    %77 = tpu.matmul %76, %38, %cst_45 {dimension_numbers = #tpu.dot_dimension_numbers<[1], [1], [0], [0], [0, 0, 1, 0], [], []>} : vector<28x32xf32>, vector<28x32xf32>, vector<28x28xf32> -> vector<28x28xf32>
    %cst_46 = arith.constant 0.353553385 : f32
    %78 = vector.broadcast %cst_46 : f32 to vector<28x28xf32>
    %79 = arith.mulf %77, %78 : vector<28x28xf32>
    %cst_47 = arith.constant dense<0xFF800000> : vector<28xf32>
    %80 = vector.multi_reduction <maximumf>, %79, %cst_47 [1] : vector<28x28xf32> to vector<28xf32>
    %81 = vector.shape_cast %80 : vector<28xf32> to vector<28x1xf32>
    %82 = vector.broadcast %81 : vector<28x1xf32> to vector<28x28xf32>
    %83 = arith.subf %79, %82 : vector<28x28xf32>
    %84 = math.exp %83 : vector<28x28xf32>
    %cst_48 = arith.constant dense<0.000000e+00> : vector<28xf32>
    %85 = vector.multi_reduction <add>, %84, %cst_48 [1] : vector<28x28xf32> to vector<28xf32>
    %86 = vector.shape_cast %85 : vector<28xf32> to vector<28x1xf32>
    %87 = tpu.reciprocal %86 {approx = true} : vector<28x1xf32> -> vector<28x1xf32>
    %88 = vector.broadcast %87 : vector<28x1xf32> to vector<28x28xf32>
    %89 = arith.mulf %84, %88 : vector<28x28xf32>
    %90 = vector.extract_strided_slice %40 {offsets = [0, 64], sizes = [28, 32], strides = [1, 1]} : vector<28x128xf32> to vector<28x32xf32>
    %cst_49 = arith.constant dense<0.000000e+00> : vector<28x32xf32>
    %91 = tpu.matmul %89, %90, %cst_49 {dimension_numbers = #tpu.dot_dimension_numbers<[1], [0], [0], [1], [0, 0, 1, 1], [], []>} : vector<28x28xf32>, vector<28x32xf32>, vector<28x32xf32> -> vector<28x32xf32>
    %92 = arith.addf %75, %91 : vector<28x32xf32>
    %93 = vector.extract_strided_slice %37 {offsets = [0, 96], sizes = [28, 32], strides = [1, 1]} : vector<28x192xf32> to vector<28x32xf32>
    %cst_50 = arith.constant dense<0.000000e+00> : vector<28x28xf32>
    %94 = tpu.matmul %93, %38, %cst_50 {dimension_numbers = #tpu.dot_dimension_numbers<[1], [1], [0], [0], [0, 0, 1, 0], [], []>} : vector<28x32xf32>, vector<28x32xf32>, vector<28x28xf32> -> vector<28x28xf32>
    %cst_51 = arith.constant 0.353553385 : f32
    %95 = vector.broadcast %cst_51 : f32 to vector<28x28xf32>
    %96 = arith.mulf %94, %95 : vector<28x28xf32>
    %cst_52 = arith.constant dense<0xFF800000> : vector<28xf32>
    %97 = vector.multi_reduction <maximumf>, %96, %cst_52 [1] : vector<28x28xf32> to vector<28xf32>
    %98 = vector.shape_cast %97 : vector<28xf32> to vector<28x1xf32>
    %99 = vector.broadcast %98 : vector<28x1xf32> to vector<28x28xf32>
    %100 = arith.subf %96, %99 : vector<28x28xf32>
    %101 = math.exp %100 : vector<28x28xf32>
    %cst_53 = arith.constant dense<0.000000e+00> : vector<28xf32>
    %102 = vector.multi_reduction <add>, %101, %cst_53 [1] : vector<28x28xf32> to vector<28xf32>
    %103 = vector.shape_cast %102 : vector<28xf32> to vector<28x1xf32>
    %104 = tpu.reciprocal %103 {approx = true} : vector<28x1xf32> -> vector<28x1xf32>
    %105 = vector.broadcast %104 : vector<28x1xf32> to vector<28x28xf32>
    %106 = arith.mulf %101, %105 : vector<28x28xf32>
    %107 = vector.extract_strided_slice %40 {offsets = [0, 96], sizes = [28, 32], strides = [1, 1]} : vector<28x128xf32> to vector<28x32xf32>
    %cst_54 = arith.constant dense<0.000000e+00> : vector<28x32xf32>
    %108 = tpu.matmul %106, %107, %cst_54 {dimension_numbers = #tpu.dot_dimension_numbers<[1], [0], [0], [1], [0, 0, 1, 1], [], []>} : vector<28x28xf32>, vector<28x32xf32>, vector<28x32xf32> -> vector<28x32xf32>
    %109 = arith.addf %92, %108 : vector<28x32xf32>
    %110 = vector.broadcast %6 : vector<1x32xf32> to vector<28x32xf32>
    %111 = arith.addf %109, %110 : vector<28x32xf32>
    %cst_55 = arith.constant dense<0.000000e+00> : vector<28xf32>
    %112 = vector.multi_reduction <add>, %111, %cst_55 [1] : vector<28x32xf32> to vector<28xf32>
    %113 = vector.shape_cast %112 : vector<28xf32> to vector<28x1xf32>
    %cst_56 = arith.constant 3.200000e+01 : f32
    %114 = vector.broadcast %cst_56 : f32 to vector<28x1xf32>
    %115 = arith.divf %113, %114 : vector<28x1xf32>
    %116 = vector.broadcast %115 : vector<28x1xf32> to vector<28x32xf32>
    %117 = arith.subf %111, %116 : vector<28x32xf32>
    %118 = arith.mulf %117, %117 : vector<28x32xf32>
    %cst_57 = arith.constant dense<0.000000e+00> : vector<28xf32>
    %119 = vector.multi_reduction <add>, %118, %cst_57 [1] : vector<28x32xf32> to vector<28xf32>
    %120 = vector.shape_cast %119 : vector<28xf32> to vector<28x1xf32>
    %cst_58 = arith.constant 3.200000e+01 : f32
    %121 = vector.broadcast %cst_58 : f32 to vector<28x1xf32>
    %122 = arith.divf %120, %121 : vector<28x1xf32>
    %123 = vector.broadcast %115 : vector<28x1xf32> to vector<28x32xf32>
    %124 = arith.subf %111, %123 : vector<28x32xf32>
    %cst_59 = arith.constant 9.99999974E-6 : f32
    %125 = vector.broadcast %cst_59 : f32 to vector<28x1xf32>
    %126 = arith.addf %122, %125 : vector<28x1xf32>
    %127 = math.rsqrt %126 : vector<28x1xf32>
    %128 = vector.broadcast %127 : vector<28x1xf32> to vector<28x32xf32>
    %129 = arith.mulf %124, %128 : vector<28x32xf32>
    %cst_60 = arith.constant dense<0.000000e+00> : vector<28x64xf32>
    %130 = tpu.matmul %129, %3, %cst_60 {dimension_numbers = #tpu.dot_dimension_numbers<[1], [0], [0], [1], [0, 0, 1, 1], [], []>} : vector<28x32xf32>, vector<32x64xf32>, vector<28x64xf32> -> vector<28x64xf32>
    %131 = vector.broadcast %9 : vector<1x64xf32> to vector<28x64xf32>
    %132 = arith.addf %130, %131 : vector<28x64xf32>
    %cst_61 = arith.constant dense<0.000000e+00> : vector<60x64xf32>
    %133 = tpu.matmul %5, %132, %cst_61 {dimension_numbers = #tpu.dot_dimension_numbers<[1], [0], [0], [1], [0, 0, 1, 1], [], []>} : vector<60x28xf32>, vector<28x64xf32>, vector<60x64xf32> -> vector<60x64xf32>
    %134 = vector.extract_strided_slice %133 {offsets = [0, 0], sizes = [28, 64], strides = [1, 1]} : vector<60x64xf32> to vector<28x64xf32>
    %135 = vector.extract_strided_slice %133 {offsets = [32, 0], sizes = [28, 64], strides = [1, 1]} : vector<60x64xf32> to vector<28x64xf32>
    %136 = vector.broadcast %10 : vector<1x64xf32> to vector<28x64xf32>
    %137 = arith.mulf %134, %136 : vector<28x64xf32>
    %138 = vector.broadcast %11 : vector<1x64xf32> to vector<28x64xf32>
    %139 = arith.mulf %132, %138 : vector<28x64xf32>
    %140 = arith.addf %137, %139 : vector<28x64xf32>
    %141 = vector.broadcast %12 : vector<1x64xf32> to vector<28x64xf32>
    %142 = arith.mulf %135, %141 : vector<28x64xf32>
    %143 = arith.addf %140, %142 : vector<28x64xf32>
    %144 = vector.broadcast %13 : vector<1x64xf32> to vector<28x64xf32>
    %145 = arith.addf %143, %144 : vector<28x64xf32>
    %cst_62 = arith.constant 5.000000e-01 : f32
    %146 = vector.broadcast %cst_62 : f32 to vector<28x64xf32>
    %147 = arith.mulf %146, %145 : vector<28x64xf32>
    %cst_63 = arith.constant 0.707106769 : f32
    %148 = vector.broadcast %cst_63 : f32 to vector<28x64xf32>
    %149 = arith.mulf %145, %148 : vector<28x64xf32>
    %150 = math.erf %149 : vector<28x64xf32>
    %cst_64 = arith.constant 1.000000e+00 : f32
    %151 = vector.broadcast %cst_64 : f32 to vector<28x64xf32>
    %152 = arith.addf %151, %150 : vector<28x64xf32>
    %153 = arith.mulf %147, %152 : vector<28x64xf32>
    %cst_65 = arith.constant dense<0.000000e+00> : vector<28x32xf32>
    %154 = tpu.matmul %153, %4, %cst_65 {dimension_numbers = #tpu.dot_dimension_numbers<[1], [0], [0], [1], [0, 0, 1, 1], [], []>} : vector<28x64xf32>, vector<64x32xf32>, vector<28x32xf32> -> vector<28x32xf32>
    %155 = vector.broadcast %7 : vector<1x32xf32> to vector<28x32xf32>
    %156 = arith.addf %154, %155 : vector<28x32xf32>
    %157 = arith.addf %111, %156 : vector<28x32xf32>
    %cst_66 = arith.constant dense<0.000000e+00> : vector<4x32xf32>
    %158 = tpu.matmul %14, %157, %cst_66 {dimension_numbers = #tpu.dot_dimension_numbers<[1], [0], [0], [1], [0, 0, 1, 1], [], []>} : vector<4x28xf32>, vector<28x32xf32>, vector<4x32xf32> -> vector<4x32xf32>
    %c0_67 = arith.constant 0 : index
    %c0_68 = arith.constant 0 : index
    %c0_69 = arith.constant 0 : index
    %159 = vector.load %arg1[%c0_67, %c0_68, %c0_69] : memref<2x4x32xf32, #tpu.memory_space<vmem>>, vector<1x4x32xf32>
    %160 = vector.shape_cast %159 : vector<1x4x32xf32> to vector<4x32xf32>
    %161 = vector.broadcast %8 : vector<1x32xf32> to vector<4x32xf32>
    %162 = arith.mulf %161, %158 : vector<4x32xf32>
    %163 = arith.addf %160, %162 : vector<4x32xf32>
    %c0_70 = arith.constant 0 : index
    %c0_71 = arith.constant 0 : index
    %c0_72 = arith.constant 0 : index
    %164 = vector.load %arg12[%c0_70, %c0_71, %c0_72] : memref<2x4x32xf32, #tpu.memory_space<vmem>>, vector<1x4x32xf32>
    %165 = vector.shape_cast %164 : vector<1x4x32xf32> to vector<4x32xf32>
    %166 = vector.shape_cast %163 : vector<4x32xf32> to vector<1x4x32xf32>
    tpu.vector_store %arg12[%c0_70, %c0_71, %c0_72], %166 {strides = array<i32>} : memref<2x4x32xf32, #tpu.memory_space<vmem>>, vector<1x4x32xf32>,
    %c1_73 = arith.constant 1 : index
    %c0_74 = arith.constant 0 : index
    %c0_75 = arith.constant 0 : index
    %167 = vector.load %arg2[%c1_73, %c0_74, %c0_75] : memref<2x28x32xf32, #tpu.memory_space<vmem>>, vector<1x28x32xf32>
    %168 = vector.shape_cast %167 : vector<1x28x32xf32> to vector<28x32xf32>
    %cst_76 = arith.constant dense<0.000000e+00> : vector<28xf32>
    %169 = vector.multi_reduction <add>, %168, %cst_76 [1] : vector<28x32xf32> to vector<28xf32>
    %170 = vector.shape_cast %169 : vector<28xf32> to vector<28x1xf32>
    %cst_77 = arith.constant 3.200000e+01 : f32
    %171 = vector.broadcast %cst_77 : f32 to vector<28x1xf32>
    %172 = arith.divf %170, %171 : vector<28x1xf32>
    %173 = vector.broadcast %172 : vector<28x1xf32> to vector<28x32xf32>
    %174 = arith.subf %168, %173 : vector<28x32xf32>
    %175 = arith.mulf %174, %174 : vector<28x32xf32>
    %cst_78 = arith.constant dense<0.000000e+00> : vector<28xf32>
    %176 = vector.multi_reduction <add>, %175, %cst_78 [1] : vector<28x32xf32> to vector<28xf32>
    %177 = vector.shape_cast %176 : vector<28xf32> to vector<28x1xf32>
    %cst_79 = arith.constant 3.200000e+01 : f32
    %178 = vector.broadcast %cst_79 : f32 to vector<28x1xf32>
    %179 = arith.divf %177, %178 : vector<28x1xf32>
    %180 = vector.broadcast %172 : vector<28x1xf32> to vector<28x32xf32>
    %181 = arith.subf %168, %180 : vector<28x32xf32>
    %cst_80 = arith.constant 9.99999974E-6 : f32
    %182 = vector.broadcast %cst_80 : f32 to vector<28x1xf32>
    %183 = arith.addf %179, %182 : vector<28x1xf32>
    %184 = math.rsqrt %183 : vector<28x1xf32>
    %185 = vector.broadcast %184 : vector<28x1xf32> to vector<28x32xf32>
    %186 = arith.mulf %181, %185 : vector<28x32xf32>
    %cst_81 = arith.constant dense<0.000000e+00> : vector<28x192xf32>
    %187 = tpu.matmul %186, %0, %cst_81 {dimension_numbers = #tpu.dot_dimension_numbers<[1], [0], [0], [1], [0, 0, 1, 1], [], []>} : vector<28x32xf32>, vector<32x192xf32>, vector<28x192xf32> -> vector<28x192xf32>
    %188 = vector.broadcast %1 : vector<1x192xf32> to vector<28x192xf32>
    %189 = arith.addf %187, %188 : vector<28x192xf32>
    %190 = vector.extract_strided_slice %189 {offsets = [0, 128], sizes = [28, 32], strides = [1, 1]} : vector<28x192xf32> to vector<28x32xf32>
    %191 = vector.extract_strided_slice %189 {offsets = [0, 160], sizes = [28, 32], strides = [1, 1]} : vector<28x192xf32> to vector<28x32xf32>
    %cst_82 = arith.constant dense<0.000000e+00> : vector<28x128xf32>
    %192 = tpu.matmul %191, %2, %cst_82 {dimension_numbers = #tpu.dot_dimension_numbers<[1], [0], [0], [1], [0, 0, 1, 1], [], []>} : vector<28x32xf32>, vector<32x128xf32>, vector<28x128xf32> -> vector<28x128xf32>
    %cst_83 = arith.constant 0.000000e+00 : f32
    %193 = vector.broadcast %cst_83 : f32 to vector<28x32xf32>
    %194 = vector.extract_strided_slice %189 {offsets = [0, 0], sizes = [28, 32], strides = [1, 1]} : vector<28x192xf32> to vector<28x32xf32>
    %cst_84 = arith.constant dense<0.000000e+00> : vector<28x28xf32>
    %195 = tpu.matmul %194, %190, %cst_84 {dimension_numbers = #tpu.dot_dimension_numbers<[1], [1], [0], [0], [0, 0, 1, 0], [], []>} : vector<28x32xf32>, vector<28x32xf32>, vector<28x28xf32> -> vector<28x28xf32>
    %cst_85 = arith.constant 0.353553385 : f32
    %196 = vector.broadcast %cst_85 : f32 to vector<28x28xf32>
    %197 = arith.mulf %195, %196 : vector<28x28xf32>
    %cst_86 = arith.constant dense<0xFF800000> : vector<28xf32>
    %198 = vector.multi_reduction <maximumf>, %197, %cst_86 [1] : vector<28x28xf32> to vector<28xf32>
    %199 = vector.shape_cast %198 : vector<28xf32> to vector<28x1xf32>
    %200 = vector.broadcast %199 : vector<28x1xf32> to vector<28x28xf32>
    %201 = arith.subf %197, %200 : vector<28x28xf32>
    %202 = math.exp %201 : vector<28x28xf32>
    %cst_87 = arith.constant dense<0.000000e+00> : vector<28xf32>
    %203 = vector.multi_reduction <add>, %202, %cst_87 [1] : vector<28x28xf32> to vector<28xf32>
    %204 = vector.shape_cast %203 : vector<28xf32> to vector<28x1xf32>
    %205 = tpu.reciprocal %204 {approx = true} : vector<28x1xf32> -> vector<28x1xf32>
    %206 = vector.broadcast %205 : vector<28x1xf32> to vector<28x28xf32>
    %207 = arith.mulf %202, %206 : vector<28x28xf32>
    %208 = vector.extract_strided_slice %192 {offsets = [0, 0], sizes = [28, 32], strides = [1, 1]} : vector<28x128xf32> to vector<28x32xf32>
    %cst_88 = arith.constant dense<0.000000e+00> : vector<28x32xf32>
    %209 = tpu.matmul %207, %208, %cst_88 {dimension_numbers = #tpu.dot_dimension_numbers<[1], [0], [0], [1], [0, 0, 1, 1], [], []>} : vector<28x28xf32>, vector<28x32xf32>, vector<28x32xf32> -> vector<28x32xf32>
    %210 = arith.addf %193, %209 : vector<28x32xf32>
    %211 = vector.extract_strided_slice %189 {offsets = [0, 32], sizes = [28, 32], strides = [1, 1]} : vector<28x192xf32> to vector<28x32xf32>
    %cst_89 = arith.constant dense<0.000000e+00> : vector<28x28xf32>
    %212 = tpu.matmul %211, %190, %cst_89 {dimension_numbers = #tpu.dot_dimension_numbers<[1], [1], [0], [0], [0, 0, 1, 0], [], []>} : vector<28x32xf32>, vector<28x32xf32>, vector<28x28xf32> -> vector<28x28xf32>
    %cst_90 = arith.constant 0.353553385 : f32
    %213 = vector.broadcast %cst_90 : f32 to vector<28x28xf32>
    %214 = arith.mulf %212, %213 : vector<28x28xf32>
    %cst_91 = arith.constant dense<0xFF800000> : vector<28xf32>
    %215 = vector.multi_reduction <maximumf>, %214, %cst_91 [1] : vector<28x28xf32> to vector<28xf32>
    %216 = vector.shape_cast %215 : vector<28xf32> to vector<28x1xf32>
    %217 = vector.broadcast %216 : vector<28x1xf32> to vector<28x28xf32>
    %218 = arith.subf %214, %217 : vector<28x28xf32>
    %219 = math.exp %218 : vector<28x28xf32>
    %cst_92 = arith.constant dense<0.000000e+00> : vector<28xf32>
    %220 = vector.multi_reduction <add>, %219, %cst_92 [1] : vector<28x28xf32> to vector<28xf32>
    %221 = vector.shape_cast %220 : vector<28xf32> to vector<28x1xf32>
    %222 = tpu.reciprocal %221 {approx = true} : vector<28x1xf32> -> vector<28x1xf32>
    %223 = vector.broadcast %222 : vector<28x1xf32> to vector<28x28xf32>
    %224 = arith.mulf %219, %223 : vector<28x28xf32>
    %225 = vector.extract_strided_slice %192 {offsets = [0, 32], sizes = [28, 32], strides = [1, 1]} : vector<28x128xf32> to vector<28x32xf32>
    %cst_93 = arith.constant dense<0.000000e+00> : vector<28x32xf32>
    %226 = tpu.matmul %224, %225, %cst_93 {dimension_numbers = #tpu.dot_dimension_numbers<[1], [0], [0], [1], [0, 0, 1, 1], [], []>} : vector<28x28xf32>, vector<28x32xf32>, vector<28x32xf32> -> vector<28x32xf32>
    %227 = arith.addf %210, %226 : vector<28x32xf32>
    %228 = vector.extract_strided_slice %189 {offsets = [0, 64], sizes = [28, 32], strides = [1, 1]} : vector<28x192xf32> to vector<28x32xf32>
    %cst_94 = arith.constant dense<0.000000e+00> : vector<28x28xf32>
    %229 = tpu.matmul %228, %190, %cst_94 {dimension_numbers = #tpu.dot_dimension_numbers<[1], [1], [0], [0], [0, 0, 1, 0], [], []>} : vector<28x32xf32>, vector<28x32xf32>, vector<28x28xf32> -> vector<28x28xf32>
    %cst_95 = arith.constant 0.353553385 : f32
    %230 = vector.broadcast %cst_95 : f32 to vector<28x28xf32>
    %231 = arith.mulf %229, %230 : vector<28x28xf32>
    %cst_96 = arith.constant dense<0xFF800000> : vector<28xf32>
    %232 = vector.multi_reduction <maximumf>, %231, %cst_96 [1] : vector<28x28xf32> to vector<28xf32>
    %233 = vector.shape_cast %232 : vector<28xf32> to vector<28x1xf32>
    %234 = vector.broadcast %233 : vector<28x1xf32> to vector<28x28xf32>
    %235 = arith.subf %231, %234 : vector<28x28xf32>
    %236 = math.exp %235 : vector<28x28xf32>
    %cst_97 = arith.constant dense<0.000000e+00> : vector<28xf32>
    %237 = vector.multi_reduction <add>, %236, %cst_97 [1] : vector<28x28xf32> to vector<28xf32>
    %238 = vector.shape_cast %237 : vector<28xf32> to vector<28x1xf32>
    %239 = tpu.reciprocal %238 {approx = true} : vector<28x1xf32> -> vector<28x1xf32>
    %240 = vector.broadcast %239 : vector<28x1xf32> to vector<28x28xf32>
    %241 = arith.mulf %236, %240 : vector<28x28xf32>
    %242 = vector.extract_strided_slice %192 {offsets = [0, 64], sizes = [28, 32], strides = [1, 1]} : vector<28x128xf32> to vector<28x32xf32>
    %cst_98 = arith.constant dense<0.000000e+00> : vector<28x32xf32>
    %243 = tpu.matmul %241, %242, %cst_98 {dimension_numbers = #tpu.dot_dimension_numbers<[1], [0], [0], [1], [0, 0, 1, 1], [], []>} : vector<28x28xf32>, vector<28x32xf32>, vector<28x32xf32> -> vector<28x32xf32>
    %244 = arith.addf %227, %243 : vector<28x32xf32>
    %245 = vector.extract_strided_slice %189 {offsets = [0, 96], sizes = [28, 32], strides = [1, 1]} : vector<28x192xf32> to vector<28x32xf32>
    %cst_99 = arith.constant dense<0.000000e+00> : vector<28x28xf32>
    %246 = tpu.matmul %245, %190, %cst_99 {dimension_numbers = #tpu.dot_dimension_numbers<[1], [1], [0], [0], [0, 0, 1, 0], [], []>} : vector<28x32xf32>, vector<28x32xf32>, vector<28x28xf32> -> vector<28x28xf32>
    %cst_100 = arith.constant 0.353553385 : f32
    %247 = vector.broadcast %cst_100 : f32 to vector<28x28xf32>
    %248 = arith.mulf %246, %247 : vector<28x28xf32>
    %cst_101 = arith.constant dense<0xFF800000> : vector<28xf32>
    %249 = vector.multi_reduction <maximumf>, %248, %cst_101 [1] : vector<28x28xf32> to vector<28xf32>
    %250 = vector.shape_cast %249 : vector<28xf32> to vector<28x1xf32>
    %251 = vector.broadcast %250 : vector<28x1xf32> to vector<28x28xf32>
    %252 = arith.subf %248, %251 : vector<28x28xf32>
    %253 = math.exp %252 : vector<28x28xf32>
    %cst_102 = arith.constant dense<0.000000e+00> : vector<28xf32>
    %254 = vector.multi_reduction <add>, %253, %cst_102 [1] : vector<28x28xf32> to vector<28xf32>
    %255 = vector.shape_cast %254 : vector<28xf32> to vector<28x1xf32>
    %256 = tpu.reciprocal %255 {approx = true} : vector<28x1xf32> -> vector<28x1xf32>
    %257 = vector.broadcast %256 : vector<28x1xf32> to vector<28x28xf32>
    %258 = arith.mulf %253, %257 : vector<28x28xf32>
    %259 = vector.extract_strided_slice %192 {offsets = [0, 96], sizes = [28, 32], strides = [1, 1]} : vector<28x128xf32> to vector<28x32xf32>
    %cst_103 = arith.constant dense<0.000000e+00> : vector<28x32xf32>
    %260 = tpu.matmul %258, %259, %cst_103 {dimension_numbers = #tpu.dot_dimension_numbers<[1], [0], [0], [1], [0, 0, 1, 1], [], []>} : vector<28x28xf32>, vector<28x32xf32>, vector<28x32xf32> -> vector<28x32xf32>
    %261 = arith.addf %244, %260 : vector<28x32xf32>
    %262 = vector.broadcast %6 : vector<1x32xf32> to vector<28x32xf32>
    %263 = arith.addf %261, %262 : vector<28x32xf32>
    %cst_104 = arith.constant dense<0.000000e+00> : vector<28xf32>
    %264 = vector.multi_reduction <add>, %263, %cst_104 [1] : vector<28x32xf32> to vector<28xf32>
    %265 = vector.shape_cast %264 : vector<28xf32> to vector<28x1xf32>
    %cst_105 = arith.constant 3.200000e+01 : f32
    %266 = vector.broadcast %cst_105 : f32 to vector<28x1xf32>
    %267 = arith.divf %265, %266 : vector<28x1xf32>
    %268 = vector.broadcast %267 : vector<28x1xf32> to vector<28x32xf32>
    %269 = arith.subf %263, %268 : vector<28x32xf32>
    %270 = arith.mulf %269, %269 : vector<28x32xf32>
    %cst_106 = arith.constant dense<0.000000e+00> : vector<28xf32>
    %271 = vector.multi_reduction <add>, %270, %cst_106 [1] : vector<28x32xf32> to vector<28xf32>
    %272 = vector.shape_cast %271 : vector<28xf32> to vector<28x1xf32>
    %cst_107 = arith.constant 3.200000e+01 : f32
    %273 = vector.broadcast %cst_107 : f32 to vector<28x1xf32>
    %274 = arith.divf %272, %273 : vector<28x1xf32>
    %275 = vector.broadcast %267 : vector<28x1xf32> to vector<28x32xf32>
    %276 = arith.subf %263, %275 : vector<28x32xf32>
    %cst_108 = arith.constant 9.99999974E-6 : f32
    %277 = vector.broadcast %cst_108 : f32 to vector<28x1xf32>
    %278 = arith.addf %274, %277 : vector<28x1xf32>
    %279 = math.rsqrt %278 : vector<28x1xf32>
    %280 = vector.broadcast %279 : vector<28x1xf32> to vector<28x32xf32>
    %281 = arith.mulf %276, %280 : vector<28x32xf32>
    %cst_109 = arith.constant dense<0.000000e+00> : vector<28x64xf32>
    %282 = tpu.matmul %281, %3, %cst_109 {dimension_numbers = #tpu.dot_dimension_numbers<[1], [0], [0], [1], [0, 0, 1, 1], [], []>} : vector<28x32xf32>, vector<32x64xf32>, vector<28x64xf32> -> vector<28x64xf32>
    %283 = vector.broadcast %9 : vector<1x64xf32> to vector<28x64xf32>
    %284 = arith.addf %282, %283 : vector<28x64xf32>
    %cst_110 = arith.constant dense<0.000000e+00> : vector<60x64xf32>
    %285 = tpu.matmul %5, %284, %cst_110 {dimension_numbers = #tpu.dot_dimension_numbers<[1], [0], [0], [1], [0, 0, 1, 1], [], []>} : vector<60x28xf32>, vector<28x64xf32>, vector<60x64xf32> -> vector<60x64xf32>
    %286 = vector.extract_strided_slice %285 {offsets = [0, 0], sizes = [28, 64], strides = [1, 1]} : vector<60x64xf32> to vector<28x64xf32>
    %287 = vector.extract_strided_slice %285 {offsets = [32, 0], sizes = [28, 64], strides = [1, 1]} : vector<60x64xf32> to vector<28x64xf32>
    %288 = vector.broadcast %10 : vector<1x64xf32> to vector<28x64xf32>
    %289 = arith.mulf %286, %288 : vector<28x64xf32>
    %290 = vector.broadcast %11 : vector<1x64xf32> to vector<28x64xf32>
    %291 = arith.mulf %284, %290 : vector<28x64xf32>
    %292 = arith.addf %289, %291 : vector<28x64xf32>
    %293 = vector.broadcast %12 : vector<1x64xf32> to vector<28x64xf32>
    %294 = arith.mulf %287, %293 : vector<28x64xf32>
    %295 = arith.addf %292, %294 : vector<28x64xf32>
    %296 = vector.broadcast %13 : vector<1x64xf32> to vector<28x64xf32>
    %297 = arith.addf %295, %296 : vector<28x64xf32>
    %cst_111 = arith.constant 5.000000e-01 : f32
    %298 = vector.broadcast %cst_111 : f32 to vector<28x64xf32>
    %299 = arith.mulf %298, %297 : vector<28x64xf32>
    %cst_112 = arith.constant 0.707106769 : f32
    %300 = vector.broadcast %cst_112 : f32 to vector<28x64xf32>
    %301 = arith.mulf %297, %300 : vector<28x64xf32>
    %302 = math.erf %301 : vector<28x64xf32>
    %cst_113 = arith.constant 1.000000e+00 : f32
    %303 = vector.broadcast %cst_113 : f32 to vector<28x64xf32>
    %304 = arith.addf %303, %302 : vector<28x64xf32>
    %305 = arith.mulf %299, %304 : vector<28x64xf32>
    %cst_114 = arith.constant dense<0.000000e+00> : vector<28x32xf32>
    %306 = tpu.matmul %305, %4, %cst_114 {dimension_numbers = #tpu.dot_dimension_numbers<[1], [0], [0], [1], [0, 0, 1, 1], [], []>} : vector<28x64xf32>, vector<64x32xf32>, vector<28x32xf32> -> vector<28x32xf32>
    %307 = vector.broadcast %7 : vector<1x32xf32> to vector<28x32xf32>
    %308 = arith.addf %306, %307 : vector<28x32xf32>
    %309 = arith.addf %263, %308 : vector<28x32xf32>
    %cst_115 = arith.constant dense<0.000000e+00> : vector<4x32xf32>
    %310 = tpu.matmul %14, %309, %cst_115 {dimension_numbers = #tpu.dot_dimension_numbers<[1], [0], [0], [1], [0, 0, 1, 1], [], []>} : vector<4x28xf32>, vector<28x32xf32>, vector<4x32xf32> -> vector<4x32xf32>
    %c1_116 = arith.constant 1 : index
    %c0_117 = arith.constant 0 : index
    %c0_118 = arith.constant 0 : index
    %311 = vector.load %arg1[%c1_116, %c0_117, %c0_118] : memref<2x4x32xf32, #tpu.memory_space<vmem>>, vector<1x4x32xf32>
    %312 = vector.shape_cast %311 : vector<1x4x32xf32> to vector<4x32xf32>
    %313 = vector.broadcast %8 : vector<1x32xf32> to vector<4x32xf32>
    %314 = arith.mulf %313, %310 : vector<4x32xf32>
    %315 = arith.addf %312, %314 : vector<4x32xf32>
    %c1_119 = arith.constant 1 : index
    %c0_120 = arith.constant 0 : index
    %c0_121 = arith.constant 0 : index
    %316 = vector.load %arg12[%c1_119, %c0_120, %c0_121] : memref<2x4x32xf32, #tpu.memory_space<vmem>>, vector<1x4x32xf32>
    %317 = vector.shape_cast %316 : vector<1x4x32xf32> to vector<4x32xf32>
    %318 = vector.shape_cast %315 : vector<4x32xf32> to vector<1x4x32xf32>
    tpu.vector_store %arg12[%c1_119, %c0_120, %c0_121], %318 {strides = array<i32>} : memref<2x4x32xf32, #tpu.memory_space<vmem>>, vector<1x4x32xf32>,
    return
  }
  func.func @transform_0(%arg0: i32) -> (i32, i32, i32) {
    %c0_i32 = arith.constant 0 : i32
    %c0_i32_0 = arith.constant 0 : i32
    %c0_i32_1 = arith.constant 0 : i32
    return %arg0, %c0_i32, %c0_i32_0 : i32, i32, i32
  }
  func.func @transform_1(%arg0: i32) -> (i32, i32, i32) {
    %c0_i32 = arith.constant 0 : i32
    %c0_i32_0 = arith.constant 0 : i32
    %c0_i32_1 = arith.constant 0 : i32
    return %arg0, %c0_i32, %c0_i32_0 : i32, i32, i32
  }
  func.func @transform_2(%arg0: i32) -> (i32, i32) {
    %c0_i32 = arith.constant 0 : i32
    %c0_i32_0 = arith.constant 0 : i32
    %c0_i32_1 = arith.constant 0 : i32
    return %c0_i32, %c0_i32_0 : i32, i32
  }
  func.func @transform_3(%arg0: i32) -> (i32, i32) {
    %c0_i32 = arith.constant 0 : i32
    %c0_i32_0 = arith.constant 0 : i32
    %c0_i32_1 = arith.constant 0 : i32
    return %c0_i32, %c0_i32_0 : i32, i32
  }
  func.func @transform_4(%arg0: i32) -> (i32, i32) {
    %c0_i32 = arith.constant 0 : i32
    %c0_i32_0 = arith.constant 0 : i32
    %c0_i32_1 = arith.constant 0 : i32
    return %c0_i32, %c0_i32_0 : i32, i32
  }
  func.func @transform_5(%arg0: i32) -> (i32, i32) {
    %c0_i32 = arith.constant 0 : i32
    %c0_i32_0 = arith.constant 0 : i32
    %c0_i32_1 = arith.constant 0 : i32
    return %c0_i32, %c0_i32_0 : i32, i32
  }
  func.func @transform_6(%arg0: i32) -> (i32, i32) {
    %c0_i32 = arith.constant 0 : i32
    %c0_i32_0 = arith.constant 0 : i32
    %c0_i32_1 = arith.constant 0 : i32
    return %c0_i32, %c0_i32_0 : i32, i32
  }
  func.func @transform_7(%arg0: i32) -> (i32, i32) {
    %c0_i32 = arith.constant 0 : i32
    %c0_i32_0 = arith.constant 0 : i32
    %c0_i32_1 = arith.constant 0 : i32
    return %c0_i32, %c0_i32_0 : i32, i32
  }
  func.func @transform_8(%arg0: i32) -> (i32, i32) {
    %c0_i32 = arith.constant 0 : i32
    %c0_i32_0 = arith.constant 0 : i32
    %c0_i32_1 = arith.constant 0 : i32
    return %c0_i32, %c0_i32_0 : i32, i32
  }
  func.func @transform_9(%arg0: i32) -> (i32, i32) {
    %c0_i32 = arith.constant 0 : i32
    %c0_i32_0 = arith.constant 0 : i32
    %c0_i32_1 = arith.constant 0 : i32
    return %c0_i32, %c0_i32_0 : i32, i32
  }
  func.func @transform_10(%arg0: i32) -> (i32, i32) {
    %c0_i32 = arith.constant 0 : i32
    %c0_i32_0 = arith.constant 0 : i32
    %c0_i32_1 = arith.constant 0 : i32
    return %c0_i32, %c0_i32_0 : i32, i32
  }
  func.func @transform_11(%arg0: i32) -> (i32, i32, i32) {
    %c0_i32 = arith.constant 0 : i32
    %c0_i32_0 = arith.constant 0 : i32
    %c0_i32_1 = arith.constant 0 : i32
    return %arg0, %c0_i32, %c0_i32_0 : i32, i32, i32
  }
}

</mosaic_0001>

<bundles_post_ra>
// kernel: tpu_custom_call.1
= control target key start
LH: loop header
LB: loop body
LE: loop exit
PB: predicated region body
PF: predicated region fallthrough
CT: control target
= control target key end

     0   :  { %vm85_vm0 = vcmask 261120   ;;  %vm95_vm1 = vcmask 257024   ;;  %s4524_s0 = inlined_call_operand.vmem [shape: f32[2,4,32], index: 0, kind: input, shape index: {}]   ;;  %s4525_s1 = inlined_call_operand.vmem [shape: f32[2,28,32], index: 1, kind: input, shape index: {}]   ;;  %s4526_s2 = inlined_call_operand.vmem [shape: f32[32,192], index: 2, kind: input, shape index: {}]   ;;  %s4527_s3 = inlined_call_operand.vmem [shape: f32[1,192], index: 3, kind: input, shape index: {}]   ;;  %s4528_s4 = inlined_call_operand.vmem [shape: f32[32,128], index: 4, kind: input, shape index: {}]   ;;  %s4529_s5 = inlined_call_operand.vmem [shape: f32[32,64], index: 5, kind: input, shape index: {}]   ;;  %s4530_s6 = inlined_call_operand.vmem [shape: f32[64,32], index: 6, kind: input, shape index: {}]   ;;  %s4531_s7 = inlined_call_operand.vmem [shape: f32[60,28], index: 7, kind: input, shape index: {}]   ;;  %s4532_s8 = inlined_call_operand.vmem [shape: f32[3,32], index: 8, kind: input, shape index: {}]   ;;  %s4533_s9 = inlined_call_operand.vmem [shape: f32[5,64], index: 9, kind: input, shape index: {}]   ;;  %s4534_s10 = inlined_call_operand.vmem [shape: f32[4,28], index: 10, kind: input, shape index: {}]   ;;  %s4535_s11 = inlined_call_operand.hbm [shape: f32[2,4,32], index: 11, kind: output, shape index: {}]  }
   0x1   :  { %v83_v0 = vld [vmem:[%s4525_s1 + $0x10] sm:$0xff]  ;;  %v81_v1 = vld [vmem:[%s4525_s1] sm:$0xff]  ;;  %v84_v4 = vld [vmem:[%s4525_s1 + $0x18] sm:$0xf] }
   0x2   :  { %v92_v2 = vsel %vm85_vm0, %v83_v0, 0.0  ;;  %v86_v3 = vsel %vm85_vm0, %v81_v1, 0.0  ;;  %v82_v5 = vld [vmem:[%s4525_s1 + $0x8] sm:$0xff] }
   0x3   :  { %93 = vadd.xlane.f32.xlu1 %v92_v2  ;;  %87 = vadd.xlane.f32.xlu0 %v86_v3 }
   0x4   :  { %16 = vsyncpa [#allocation3], 0  ;;  %v96_v6 = vsel %vm95_vm1, %v84_v4, 0.0  ;;  %v89_v7 = vsel %vm85_vm0, %v82_v5, 0.0  ;;  %v3125_v8 = vmov 32.0   ;;  %v45_v35 = vld [vmem:[%s4526_s2 + $0x30] sm:$0xff] }
   0x5   :  { %2892 = vrcp.f32 %v3125_v8  ;;  %v46_v36 = vld [vmem:[%s4526_s2 + $0x38] sm:$0xff]  ;;  %211 = vmatpush.msra.mxu0 %v45_v35  ;;  %2840 = vmatpush.msra.mxu2 %v45_v35  ;;  %v43_v37 = vld [vmem:[%s4526_s2 + $0x20] sm:$0xff]  ;;  %v44_v38 = vld [vmem:[%s4526_s2 + $0x28] sm:$0xff]  ;;  %s3126_s24 = smov 96   ;;  %vm359_vm15 = vcmask 228352   ;;  %s3127_s13 = smov 64  }
   0x6   :  { %240 = vmatpush.msra.mxu1 %v46_v36  ;;  %v41_v39 = vld [vmem:[%s4526_s2 + $0x10] sm:$0xff]  ;;  %v42_v40 = vld [vmem:[%s4526_s2 + $0x18] sm:$0xff]  ;;  %v39_v41 = vld [vmem:[%s4526_s2] sm:$0xff]  ;;  %s3128_s14 = smov 32   ;;  %s2649_s18 = sshll.u32 %s4535_s11, 4  ;;  %s2650_s18 = int_to_ptr.hbm [resolvable:$true] %s2649_s18 }
   0x7   :  { %212 = vmatpush.msra.mxu0 %v43_v37  ;;  %2841 = vmatpush.msra.mxu2 %v43_v37  ;;  %v40_v42 = vld [vmem:[%s4526_s2 + $0x8] sm:$0xff] }
   0x8   :  { %241 = vmatpush.msra.mxu1 %v44_v38 }
   0x9   :  { %213 = vmatpush.msra.mxu0 %v41_v39  ;;  %2842 = vmatpush.msra.mxu2 %v41_v39 }
   0xa   :  { %242 = vmatpush.msra.mxu1 %v42_v40 }
   0xb   :  { %97 = vadd.xlane.f32.xlu1 %v96_v6  ;;  %90 = vadd.xlane.f32.xlu0 %v89_v7  ;;  %v2893_v9 = vpop.eup %2892 }
   0xc   :  { %v100_v10 = vmul.f32 32.0, %v2893_v9  ;;  %vm104_vm2 = vweird.f32 %v2893_v9  ;;  %214 = vmatpush.msra.mxu0 %v39_v41  ;;  %2843 = vmatpush.msra.mxu2 %v39_v41 }
   0xd   :  { %243 = vmatpush.msra.mxu1 %v40_v42 }
   0xe   :  { %v101_v11 = vsub.f32 1.0, %v100_v10 }
  0x10   :  { %v102_v12 = vmul.f32 %v2893_v9, %v101_v11 }
  0x12   :  { %v103_v13 = vadd.f32 %v2893_v9, %v102_v12 }
  0x14   :  { %v3207_v14 = vsel %vm104_vm2, %v2893_v9, %v103_v13  ;;  %vm369_vm2 = vcmask 224256  }
  0x76   :  { %v94_v15 = vpop.xlane.xlu1 %93  ;;  %v88_v16 = vpop.xlane.xlu0 %87 }
  0x77   :  { %v108_v17 = vmul.f32 %v3207_v14, %v94_v15  ;;  %v106_v18 = vmul.f32 %v3207_v14, %v88_v16 }
  0x79   :  { %v3211_v19 = vsub.f32 %v83_v0, %v108_v17  ;;  %v3213_v20 = vsub.f32 %v81_v1, %v106_v18 }
  0x7b   :  { %v116_v21 = vmul.f32 %v3211_v19, %v3211_v19  ;;  %v114_v22 = vmul.f32 %v3213_v20, %v3213_v20 }
  0x7d   :  { %v124_v23 = vsel %vm85_vm0, %v116_v21, 0.0  ;;  %v118_v24 = vsel %vm85_vm0, %v114_v22, 0.0 }
  0x7e   :  { %v98_v25 = vpop.xlane.xlu1 %97  ;;  %125 = vadd.xlane.f32.xlu0 %v124_v23  ;;  %119 = vadd.xlane.f32.xlu2 %v118_v24  ;;  %v91_v26 = vpop.xlane.xlu0 %90  ;;  %v47_v24 = vld [vmem:[%s4527_s3] sm:$0x3] }
  0x7f   :  { %v109_v27 = vmul.f32 %v3207_v14, %v98_v25  ;;  %v107_v28 = vmul.f32 %v3207_v14, %v91_v26  ;;  %v3276_v25 = vperm.slane %v47_v24, 0 }
  0x81   :  { %v3223_v29 = vsub.f32 %v84_v4, %v109_v27  ;;  %v3225_v30 = vsub.f32 %v82_v5, %v107_v28 }
  0x83   :  { %v117_v31 = vmul.f32 %v3223_v29, %v3223_v29  ;;  %v115_v32 = vmul.f32 %v3225_v30, %v3225_v30 }
  0x85   :  { %v127_v33 = vsel %vm95_vm1, %v117_v31, 0.0  ;;  %v121_v34 = vsel %vm85_vm0, %v115_v32, 0.0 }
  0x86   :  { %128 = vadd.xlane.f32.xlu1 %v127_v33  ;;  %122 = vadd.xlane.f32.xlu2 %v121_v34  ;;  %v3293_v34 = vperm.slane %v47_v24, 1 }
  0xf1   :  { %v120_v43 = vpop.xlane.xlu2 %119  ;;  %v126_v44 = vpop.xlane.xlu0 %125 }
  0xf2   :  { %v130_v45 = vmul.f32 %v120_v43, %v3207_v14  ;;  %v132_v46 = vmul.f32 %v126_v44, %v3207_v14  ;;  %v51_v44 = vld [vmem:[%s4528_s4 + $0x18] sm:$0xff] }
  0xf3   :  { %289 = vmatpush.msrb.mxu2 %v51_v44 }
  0xf4   :  { %v134_v47 = vadd.f32 1e-05, %v130_v45  ;;  %v136_v48 = vadd.f32 1e-05, %v132_v46  ;;  %v50_v45 = vld [vmem:[%s4528_s4 + $0x10] sm:$0xff]  ;;  %v49_v46 = vld [vmem:[%s4528_s4 + $0x8] sm:$0xff] }
  0xf5   :  { %290 = vmatpush.msrb.mxu2 %v50_v45 }
  0xf6   :  { %2894 = vrsqrt.f32 %v134_v47  ;;  %vm164_vm3 = vweird.f32 %v136_v48  ;;  %vm144_vm6 = vweird.f32 %v134_v47 }
  0xf7   :  { %2896 = vrsqrt.f32 %v136_v48  ;;  %291 = vmatpush.msrb.mxu2 %v49_v46 }
  0xf9   :  { %v129_v49 = vpop.xlane.xlu1 %128  ;;  %v123_v50 = vpop.xlane.xlu2 %122 }
  0xfa   :  { %v133_v51 = vmul.f32 %v129_v49, %v3207_v14  ;;  %v131_v52 = vmul.f32 %v123_v50, %v3207_v14 }
  0xfc   :  { %v2895_v53 = vpop.eup %2894  ;;  %v137_v54 = vadd.f32 1e-05, %v133_v51  ;;  %v135_v55 = vadd.f32 1e-05, %v131_v52 }
  0xfd   :  { %v2897_v56 = vpop.eup %2896  ;;  %v139_v57 = vmul.f32 %v2895_v53, %v134_v47  ;;  %vm145_vm5 = vweird.f32 %v2895_v53  ;;  %v48_v47 = vld [vmem:[%s4528_s4] sm:$0xff] }
  0xfe   :  { %v159_v58 = vmul.f32 %v2897_v56, %v136_v48  ;;  %2898 = vrsqrt.f32 %v137_v54  ;;  %vm165_vm4 = vweird.f32 %v2897_v56  ;;  %vm146_vm8 = vmor %vm144_vm6, %vm145_vm5  ;;  %vm174_vm9 = vweird.f32 %v137_v54  ;;  %292 = vmatpush.msrb.mxu2 %v48_v47 }
  0xff   :  { %v140_v59 = vmul.f32 %v2895_v53, %v139_v57  ;;  %2900 = vrsqrt.f32 %v135_v55  ;;  %vm166_vm7 = vmor %vm164_vm3, %vm165_vm4  ;;  %vm154_vm13 = vweird.f32 %v135_v55  ;;  %vm525_vm3 = vcmask 1043456  }
 0x100   :  { %v160_v60 = vmul.f32 %v2897_v56, %v159_v58 }
 0x101   :  { %v141_v61 = vmul.f32 0.5, %v140_v59 }
 0x102   :  { %v161_v62 = vmul.f32 0.5, %v160_v60 }
 0x103   :  { %v142_v63 = vsub.f32 1.5, %v141_v61 }
 0x104   :  { %v2899_v0 = vpop.eup %2898  ;;  %v162_v1 = vsub.f32 1.5, %v161_v62 }
 0x105   :  { %v2901_v2 = vpop.eup %2900  ;;  %v169_v3 = vmul.f32 %v2899_v0, %v137_v54  ;;  %v143_v4 = vmul.f32 %v2895_v53, %v142_v63  ;;  %vm175_vm10 = vweird.f32 %v2899_v0 }
 0x106   :  { %v149_v5 = vmul.f32 %v2901_v2, %v135_v55  ;;  %v163_v6 = vmul.f32 %v2897_v56, %v162_v1  ;;  %vm176_vm11 = vmor %vm174_vm9, %vm175_vm10  ;;  %vm155_vm12 = vweird.f32 %v2901_v2 }
 0x107   :  { %v170_v7 = vmul.f32 %v2899_v0, %v169_v3  ;;  %v147_v8 = vsel %vm146_vm8, %v2895_v53, %v143_v4  ;;  %vm156_vm14 = vmor %vm154_vm13, %vm155_vm12 }
 0x108   :  { %v150_v9 = vmul.f32 %v2901_v2, %v149_v5  ;;  %v178_v10 = vmul.f32 %v147_v8, %v3213_v20  ;;  %v167_v11 = vsel %vm166_vm7, %v2897_v56, %v163_v6 }
 0x109   :  { %v171_v12 = vmul.f32 0.5, %v170_v7  ;;  %v180_v13 = vmul.f32 %v167_v11, %v3211_v19 }
 0x10a   :  { %v151_v15 = vmul.f32 0.5, %v150_v9  ;;  %2661 = vmatmul.msk.f32.vlgmr.msra.gmra.mxu0 %vm85_vm0, %v178_v10  ;;  %2665 = vmatmul.msk.f32.vlgmr.msra.gmra.mxu1 %vm85_vm0, %v178_v10 }
 0x10b   :  { %v172_v16 = vsub.f32 1.5, %v171_v12  ;;  %2663 = vmatmul.msk.f32.vlgmr.msra.gmra.mxu2 %vm85_vm0, %v180_v13 }
 0x10c   :  { %v152_v17 = vsub.f32 1.5, %v151_v15 }
 0x10d   :  { %v173_v18 = vmul.f32 %v2899_v0, %v172_v16 }
 0x10e   :  { %v153_v20 = vmul.f32 %v2901_v2, %v152_v17 }
 0x10f   :  { %v177_v21 = vsel %vm176_vm11, %v2899_v0, %v173_v18 }
 0x110   :  { %v157_v22 = vsel %vm156_vm14, %v2901_v2, %v153_v20  ;;  %v181_v23 = vmul.f32 %v177_v21, %v3223_v29 }
 0x111   :  { %v179_v19 = vmul.f32 %v157_v22, %v3225_v30 }
 0x113   :  { %2662 = vmatmul.msk.f32.gmra.mxu0 %vm85_vm0, %v179_v19  ;;  %2664 = vmatmul.msk.f32.gmra.mxu2 %vm85_vm0, %v181_v23 }
 0x114   :  { %2666 = vmatmul.msk.f32.gmra.mxu1 %vm85_vm0, %v179_v19 }
 0x11c   :  { %2667 = vmatmul.msk.f32.gmra.mxu1 %vm85_vm0, %v180_v13 }
 0x124   :  { %2668 = vmatmul.msk.f32.gmra.mxu1 %vm85_vm0, %v181_v23 }
 0x187   :  { %v216_v26 = vpop.f32.mrf.mxu0  ;;  %v245_v27 = vpop.f32.mrf.mxu1 }
 0x188   :  { %v3279_v28 = vadd.f32 %v216_v26, %v3276_v25  ;;  %v3299_v37 = vadd.f32 %v245_v27, %v3293_v34 }
 0x18a   :  { %405 = vrot.lane.b32.xlu2 %v3279_v28, %s3126_s24 }
 0x18e   :  { %v222_v29 = vpop.f32.mrf.mxu2 }
 0x18f   :  { %v3284_v30 = vadd.f32 %v222_v29, %v3276_v25 }
 0x190   :  { %v219_v31 = vpop.f32.mrf.mxu0 }
 0x191   :  { %v3287_v32 = vadd.f32 %v219_v31, %v3276_v25  ;;  %v248_v33 = vpop.f32.mrf.mxu1  ;;  %409 = vrot.lane.b32.xlu1 %v3284_v30, %s3126_s24 }
 0x192   :  { %v3311_v40 = vadd.f32 %v248_v33, %v3293_v34 }
 0x193   :  { %407 = vrot.lane.b32.xlu0 %v3287_v32, %s3126_s24 }
 0x196   :  { %v225_v35 = vpop.f32.mrf.mxu2 }
 0x197   :  { %v3296_v36 = vadd.f32 %v225_v35, %v3276_v25 }
 0x199   :  { %v251_v38 = vpop.f32.mrf.mxu1  ;;  %411 = vrot.lane.b32.xlu2 %v3296_v36, %s3126_s24 }
 0x19a   :  { %v3304_v39 = vadd.f32 %v251_v38, %v3293_v34 }
 0x19b   :  { %261 = vrot.lane.b32.xlu0 %v3299_v37, %s3126_s24 }
 0x19c   :  { %265 = vrot.lane.b32.xlu1 %v3304_v39, %s3126_s24 }
 0x1a1   :  { %v254_v41 = vpop.f32.mrf.mxu1  ;;  %263 = vrot.lane.b32.xlu2 %v3311_v40, %s3126_s24 }
 0x1a2   :  { %v3316_v42 = vadd.f32 %v254_v41, %v3293_v34 }
 0x1a4   :  { %2673 = vmatpush.xpose.msk.msrb.mxu1 %vm85_vm0, %v3316_v42  ;;  %2844 = vmatpush.xpose.msk.msra.mxu3 %vm85_vm0, %v3316_v42 }
 0x1a5   :  { %2681 = vmatpush.xpose.msk.msrb.mxu0 %vm85_vm0, %v3316_v42  ;;  %267 = vrot.lane.b32.xlu0 %v3316_v42, %s3126_s24 }
 0x1a8   :  { %2674 = vmatpush.xpose.msk.msrb.mxu1 %vm85_vm0, %v3304_v39  ;;  %2845 = vmatpush.xpose.msk.msra.mxu3 %vm85_vm0, %v3304_v39 }
 0x1a9   :  { %2682 = vmatpush.xpose.msk.msrb.mxu0 %vm85_vm0, %v3304_v39 }
 0x1ac   :  { %2675 = vmatpush.xpose.msk.msrb.mxu1 %vm85_vm0, %v3311_v40  ;;  %2846 = vmatpush.xpose.msk.msra.mxu3 %vm85_vm0, %v3311_v40 }
 0x1ad   :  { %2683 = vmatpush.xpose.msk.msrb.mxu0 %vm85_vm0, %v3311_v40 }
 0x1b0   :  { %2676 = vmatpush.xpose.msk.msrb.mxu1 %vm85_vm0, %v3299_v37  ;;  %2847 = vmatpush.xpose.msk.msra.mxu3 %vm85_vm0, %v3299_v37 }
 0x1b1   :  { %2684 = vmatpush.xpose.msk.msrb.mxu0 %vm85_vm0, %v3299_v37 }
 0x1b3   :  { %2677 = vmatmul.msk.f32.vlgmr.msrb.gmra.mxu1 %vm85_vm0, %v3279_v28  ;;  %2679 = vmatmul.msk.f32.vlgmr.msra.gmra.mxu3 %vm85_vm0, %v3284_v30 }
 0x1b4   :  { %2699 = vmatpush.xpose.msk.msrb.mxu3 %vm85_vm0, %v3316_v42 }
 0x1b8   :  { %2700 = vmatpush.xpose.msk.msrb.mxu3 %vm85_vm0, %v3304_v39 }
 0x1bb   :  { %2678 = vmatmul.msk.f32.gmra.mxu1 %vm85_vm0, %v3287_v32  ;;  %2680 = vmatmul.msk.f32.gmra.mxu3 %vm85_vm0, %v3296_v36 }
 0x1bc   :  { %2701 = vmatpush.xpose.msk.msrb.mxu3 %vm85_vm0, %v3311_v40 }
 0x1c0   :  { %2702 = vmatpush.xpose.msk.msrb.mxu3 %vm85_vm0, %v3299_v37 }
 0x1e4   :  { %v406_v43 = vpop.permute.xlu2 %405 }
 0x1e5   :  { %2685 = vmatmul.msk.f32.vlgmr.msrb.gmra.mxu0 %vm85_vm0, %v406_v43 }
 0x1f3   :  { %v412_v49 = vpop.permute.xlu2 %411 }
 0x1fb   :  { %v264_v52 = vpop.permute.xlu2 %263 }
 0x203   :  { %v410_v50 = vpop.permute.xlu1 %409 }
 0x205   :  { %v408_v48 = vpop.permute.xlu0 %407 }
 0x206   :  { %2686 = vmatmul.msk.f32.gmra.mxu0 %vm85_vm0, %v408_v48 }
 0x20d   :  { %v262_v51 = vpop.permute.xlu0 %261 }
 0x20e   :  { %2669 = vmatmul.msk.f32.vlgmr.msrb.gmra.mxu2 %vm85_vm0, %v262_v51  ;;  %2687 = vmatmul.msk.f32.gmra.mxu0 %vm85_vm0, %v410_v50  ;;  %v266_v53 = vpop.permute.xlu1 %265 }
 0x216   :  { %2670 = vmatmul.msk.f32.gmra.mxu2 %vm85_vm0, %v264_v52  ;;  %2688 = vmatmul.msk.f32.gmra.mxu0 %vm85_vm0, %v412_v49 }
 0x217   :  { %v268_v54 = vpop.permute.xlu0 %267 }
 0x21e   :  { %2671 = vmatmul.msk.f32.gmra.mxu2 %vm85_vm0, %v266_v53 }
 0x226   :  { %2672 = vmatmul.msk.f32.gmra.mxu2 %vm85_vm0, %v268_v54 }
 0x262   :  { %v438_v55 = vpop.f32.mrf.mxu0 }
 0x263   :  { %v450_v56 = vmul.f32 0.35355338, %v438_v55 }
 0x265   :  { %v454_v57 = vsel %vm359_vm15, %v450_v56, -inf }
 0x266   :  { %455 = vmax.xlane.f32.xlu2 %v454_v57 }
 0x283   :  { %v441_v58 = vpop.f32.mrf.mxu0 }
 0x284   :  { %v451_v59 = vmul.f32 0.35355338, %v441_v58 }
 0x286   :  { %v457_v60 = vsel %vm359_vm15, %v451_v59, -inf }
 0x287   :  { %458 = vmax.xlane.f32.xlu1 %v457_v60 }
 0x28b   :  { %v444_v61 = vpop.f32.mrf.mxu0 }
 0x28c   :  { %v452_v62 = vmul.f32 0.35355338, %v444_v61 }
 0x28e   :  { %v460_v63 = vsel %vm359_vm15, %v452_v62, -inf }
 0x28f   :  { %461 = vmax.xlane.f32.xlu0 %v460_v63 }
 0x291   :  { %v3383_v0 = vpop.f32.mrf.mxu2 }
 0x293   :  { %v447_v1 = vpop.f32.mrf.mxu0 }
 0x294   :  { %v453_v2 = vmul.f32 0.35355338, %v447_v1 }
 0x296   :  { %v463_v3 = vsel %vm369_vm2, %v453_v2, -inf }
 0x297   :  { %464 = vmax.xlane.f32.xlu2 %v463_v3 }
 0x299   :  { %v297_v4 = vpop.f32.mrf.mxu2 }
 0x2a0   :  { %502 = vrot.lane.b32.xlu1 %v3383_v0, %s3126_s24 }
 0x2a1   :  { %v300_v5 = vpop.f32.mrf.mxu2 }
 0x2a2   :  { %v3396_v7 = vpack.i.bf16 %v297_v4, %v300_v5 }
 0x2a8   :  { %600 = vrot.lane.b32.xlu1 %v3279_v28, %s3127_s13 }
 0x2a9   :  { %v3390_v6 = vpop.f32.mrf.mxu2 }
 0x2aa   :  { %508 = vrot.lane.b32.xlu0 %v3390_v6, %s3126_s24  ;;  %2694 = vmatpush.msk.msra.mxu2 %vm525_vm3, %v3390_v6 }
 0x2ac   :  { %584 = vmatpush.msra.mxu2 %v300_v5 }
 0x2ae   :  { %585 = vmatpush.msra.mxu2 %v297_v4 }
 0x2af   :  { %2855 = vrot.lane.b32.xlu2 %v3396_v7, %s3126_s24 }
 0x2b0   :  { %751 = vrot.lane.b32.xlu1 %v3279_v28, %s3128_s14  ;;  %586 = vmatpush.msra.mxu2 %v3383_v0 }
 0x2b8   :  { %602 = vrot.lane.b32.xlu1 %v3287_v32, %s3127_s13 }
 0x2d9   :  { %v456_v8 = vpop.xlane.xlu2 %455 }
 0x2da   :  { %v466_v9 = vsub.f32 %v450_v56, %v456_v8 }
 0x2dc   :  { %v470_v10 = vmul.f32 1.442695, %v466_v9 }
 0x2de   :  { %2902 = vpow2.f32 %v470_v10 }
 0x2e4   :  { %v3405_v11 = vpop.eup %2902 }
 0x2e5   :  { %v478_v12 = vsel %vm359_vm15, %v3405_v11, 0.0 }
 0x2e6   :  { %479 = vadd.xlane.f32.xlu1 %v478_v12 }
 0x2fa   :  { %v459_v13 = vpop.xlane.xlu1 %458 }
 0x2fb   :  { %v467_v15 = vsub.f32 %v451_v59, %v459_v13 }
 0x2fd   :  { %v472_v16 = vmul.f32 1.442695, %v467_v15 }
 0x2ff   :  { %2904 = vpow2.f32 %v472_v16 }
 0x302   :  { %v462_v17 = vpop.xlane.xlu0 %461 }
 0x303   :  { %v468_v18 = vsub.f32 %v452_v62, %v462_v17 }
 0x305   :  { %v3409_v20 = vpop.eup %2904  ;;  %v474_v21 = vmul.f32 1.442695, %v468_v18 }
 0x306   :  { %v481_v22 = vsel %vm359_vm15, %v3409_v20, 0.0 }
 0x307   :  { %2906 = vpow2.f32 %v474_v21  ;;  %482 = vadd.xlane.f32.xlu1 %v481_v22 }
 0x30a   :  { %v465_v23 = vpop.xlane.xlu2 %464 }
 0x30b   :  { %v469_v19 = vsub.f32 %v453_v2, %v465_v23 }
 0x30d   :  { %v2907_v24 = vpop.eup %2906  ;;  %v476_v26 = vmul.f32 1.442695, %v469_v19 }
 0x30e   :  { %v484_v27 = vsel %vm359_vm15, %v2907_v24, 0.0 }
 0x30f   :  { %2908 = vpow2.f32 %v476_v26  ;;  %485 = vadd.xlane.f32.xlu0 %v484_v27 }
 0x312   :  { %v503_v28 = vpop.permute.xlu1 %502  ;;  %v2856_v33 = vpop.permute.xlu2 %2855 }
 0x313   :  { %v2857_v41 = vunpack.i.l.bf16 %v2856_v33  ;;  %v2858_v43 = vunpack.i.h.bf16 %v2856_v33 }
 0x315   :  { %v2909_v29 = vpop.eup %2908 }
 0x316   :  { %v487_v31 = vsel %vm369_vm2, %v2909_v29, 0.0 }
 0x317   :  { %488 = vadd.xlane.f32.xlu2 %v487_v31 }
 0x31a   :  { %v601_v35 = vpop.permute.xlu1 %600 }
 0x31b   :  { %2703 = vmatmul.msk.f32.vlgmr.msrb.gmra.mxu3 %vm85_vm0, %v601_v35 }
 0x31c   :  { %v509_v38 = vpop.permute.xlu0 %508 }
 0x31d   :  { %2689 = vmatpush.msk.msra.mxu1 %vm525_vm3, %v509_v38 }
 0x31f   :  { %541 = vmatpush.msra.mxu1 %v2857_v41 }
 0x320   :  { %604 = vrot.lane.b32.xlu1 %v3284_v30, %s3127_s13 }
 0x321   :  { %542 = vmatpush.msra.mxu1 %v2858_v43 }
 0x322   :  { %v752_v44 = vpop.permute.xlu1 %751 }
 0x323   :  { %753 = vrot.lane.b32.xlu0 %v3287_v32, %s3128_s14  ;;  %543 = vmatpush.msra.mxu1 %v503_v28  ;;  %v349_v32 = vpop.f32.mrf.mxu3 }
 0x325   :  { %2712 = vmatpush.xpose.msk.msrb.mxu1 %vm85_vm0, %v3316_v42  ;;  %v343_v42 = vpop.f32.mrf.mxu1 }
 0x326   :  { %v355_v46 = vmul.f32 0.35355338, %v343_v42 }
 0x328   :  { %606 = vrot.lane.b32.xlu1 %v3296_v36, %s3127_s13 }
 0x329   :  { %2713 = vmatpush.xpose.msk.msrb.mxu1 %vm85_vm0, %v3304_v39  ;;  %v360_v39 = vsel %vm359_vm15, %v355_v46, -inf }
 0x32a   :  { %v603_v45 = vpop.permute.xlu1 %602 }
 0x32b   :  { %2704 = vmatmul.msk.f32.gmra.mxu3 %vm85_vm0, %v603_v45  ;;  %v352_v47 = vpop.f32.mrf.mxu3 }
 0x32c   :  { %v3437_v48 = vmul.f32 0.35355338, %v352_v47 }
 0x32d   :  { %2714 = vmatpush.xpose.msk.msrb.mxu1 %vm85_vm0, %v3311_v40  ;;  %v346_v49 = vpop.f32.mrf.mxu1  ;;  %v357_v40 = vmul.f32 0.35355338, %v349_v32 }
 0x32e   :  { %v356_v50 = vmul.f32 0.35355338, %v346_v49 }
 0x32f   :  { %755 = vrot.lane.b32.xlu2 %v3284_v30, %s3128_s14  ;;  %v370_v30 = vsel %vm369_vm2, %v3437_v48, -inf }
 0x330   :  { %757 = vrot.lane.b32.xlu1 %v3296_v36, %s3128_s14  ;;  %v366_v36 = vsel %vm359_vm15, %v357_v40, -inf  ;;  %v363_v51 = vsel %vm359_vm15, %v356_v50, -inf }
 0x331   :  { %2715 = vmatpush.xpose.msk.msrb.mxu1 %vm85_vm0, %v3299_v37 }
 0x34d   :  { %361 = vmax.xlane.f32.xlu0 %v360_v39 }
 0x355   :  { %371 = vmax.xlane.f32.xlu0 %v370_v30 }
 0x358   :  { %367 = vmax.xlane.f32.xlu2 %v366_v36 }
 0x359   :  { %v480_v37 = vpop.xlane.xlu1 %479 }
 0x35a   :  { %2910 = vrcp.f32 %v480_v37  ;;  %364 = vmax.xlane.f32.xlu1 %v363_v51 }
 0x360   :  { %v2911_v52 = vpop.eup %2910 }
 0x361   :  { %v494_v53 = vmul.f32 %v2911_v52, %v3405_v11 }
 0x363   :  { %2690 = vmatmul.msk.f32.vlgmr.msra.gmra.mxu1 %vm359_vm15, %v494_v53 }
 0x37a   :  { %v483_v54 = vpop.xlane.xlu1 %482 }
 0x37b   :  { %2912 = vrcp.f32 %v483_v54 }
 0x381   :  { %v2913_v55 = vpop.eup %2912 }
 0x382   :  { %v486_v56 = vpop.xlane.xlu0 %485  ;;  %v495_v57 = vmul.f32 %v2913_v55, %v3409_v20 }
 0x383   :  { %2914 = vrcp.f32 %v486_v56 }
 0x384   :  { %2691 = vmatmul.msk.f32.gmra.mxu1 %vm359_vm15, %v495_v57 }
 0x389   :  { %v2915_v58 = vpop.eup %2914 }
 0x38a   :  { %v489_v59 = vpop.xlane.xlu2 %488  ;;  %v496_v60 = vmul.f32 %v2915_v58, %v2907_v24 }
 0x38b   :  { %2916 = vrcp.f32 %v489_v59 }
 0x38c   :  { %2692 = vmatmul.msk.f32.gmra.mxu1 %vm359_vm15, %v496_v60 }
 0x391   :  { %v2917_v61 = vpop.eup %2916 }
 0x392   :  { %v605_v62 = vpop.permute.xlu1 %604  ;;  %v497_v63 = vmul.f32 %v2917_v61, %v2909_v29  ;;  %v756_v8 = vpop.permute.xlu2 %755 }
 0x393   :  { %2705 = vmatmul.msk.f32.gmra.mxu3 %vm85_vm0, %v605_v62 }
 0x394   :  { %2693 = vmatmul.msk.f32.gmra.mxu1 %vm359_vm15, %v497_v63 }
 0x395   :  { %v754_v5 = vpop.permute.xlu0 %753 }
 0x39a   :  { %v607_v1 = vpop.permute.xlu1 %606 }
 0x39b   :  { %2706 = vmatmul.msk.f32.gmra.mxu3 %vm85_vm0, %v607_v1 }
 0x39c   :  { %2716 = vmatmul.msk.f32.vlgmr.msrb.gmra.mxu1 %vm85_vm0, %v752_v44 }
 0x39e   :  { %v633_v2 = vpop.f32.mrf.mxu3 }
 0x39f   :  { %v645_v3 = vmul.f32 0.35355338, %v633_v2 }
 0x3a1   :  { %v649_v4 = vsel %vm359_vm15, %v645_v3, -inf }
 0x3a2   :  { %650 = vmax.xlane.f32.xlu0 %v649_v4  ;;  %v758_v12 = vpop.permute.xlu1 %757 }
 0x3a4   :  { %2717 = vmatmul.msk.f32.gmra.mxu1 %vm85_vm0, %v754_v5 }
 0x3ac   :  { %2718 = vmatmul.msk.f32.gmra.mxu1 %vm85_vm0, %v756_v8 }
 0x3ae   :  { %v636_v9 = vpop.f32.mrf.mxu3 }
 0x3af   :  { %v3455_v10 = vmul.f32 0.35355338, %v636_v9 }
 0x3b1   :  { %v652_v11 = vsel %vm359_vm15, %v3455_v10, -inf }
 0x3b2   :  { %653 = vmax.xlane.f32.xlu1 %v652_v11 }
 0x3b4   :  { %2719 = vmatmul.msk.f32.gmra.mxu1 %vm85_vm0, %v758_v12 }
 0x3c0   :  { %v362_v13 = vpop.xlane.xlu0 %361 }
 0x3c1   :  { %v373_v15 = vsub.f32 %v355_v46, %v362_v13 }
 0x3c3   :  { %v377_v16 = vmul.f32 1.442695, %v373_v15 }
 0x3c5   :  { %2918 = vpow2.f32 %v377_v16 }
 0x3c8   :  { %v372_v22 = vpop.xlane.xlu0 %371 }
 0x3c9   :  { %v376_v26 = vsub.f32 %v3437_v48, %v372_v22 }
 0x3cb   :  { %v3460_v17 = vpop.eup %2918  ;;  %v368_v18 = vpop.xlane.xlu2 %367  ;;  %v383_v28 = vmul.f32 1.442695, %v376_v26 }
 0x3cc   :  { %v375_v20 = vsub.f32 %v357_v40, %v368_v18  ;;  %v385_v21 = vsel %vm359_vm15, %v3460_v17, 0.0 }
 0x3cd   :  { %386 = vadd.xlane.f32.xlu2 %v385_v21  ;;  %v365_v23 = vpop.xlane.xlu1 %364 }
 0x3ce   :  { %v381_v19 = vmul.f32 1.442695, %v375_v20  ;;  %v374_v24 = vsub.f32 %v356_v50, %v365_v23 }
 0x3d0   :  { %2920 = vpow2.f32 %v381_v19  ;;  %v379_v27 = vmul.f32 1.442695, %v374_v24 }
 0x3d2   :  { %2922 = vpow2.f32 %v379_v27 }
 0x3d3   :  { %2924 = vpow2.f32 %v383_v28 }
 0x3d6   :  { %v3465_v29 = vpop.eup %2920 }
 0x3d7   :  { %v391_v31 = vsel %vm359_vm15, %v3465_v29, 0.0 }
 0x3d8   :  { %v2923_v33 = vpop.eup %2922  ;;  %392 = vadd.xlane.f32.xlu0 %v391_v31 }
 0x3d9   :  { %v388_v35 = vsel %vm359_vm15, %v2923_v33, 0.0  ;;  %v2925_v38 = vpop.eup %2924 }
 0x3da   :  { %389 = vadd.xlane.f32.xlu2 %v388_v35  ;;  %v394_v41 = vsel %vm369_vm2, %v2925_v38, 0.0 }
 0x3e0   :  { %v3471_v43 = vpop.f32.mrf.mxu1 }
 0x3e2   :  { %395 = vadd.xlane.f32.xlu2 %v394_v41 }
 0x401   :  { %v3473_v44 = vpop.f32.mrf.mxu1 }
 0x409   :  { %v3475_v45 = vpop.f32.mrf.mxu1 }
 0x411   :  { %v3477_v32 = vpop.f32.mrf.mxu1 }
 0x415   :  { %v651_v39 = vpop.xlane.xlu0 %650 }
 0x416   :  { %v639_v42 = vpop.f32.mrf.mxu3  ;;  %v661_v49 = vsub.f32 %v645_v3, %v651_v39 }
 0x417   :  { %v3479_v46 = vmul.f32 0.35355338, %v639_v42 }
 0x418   :  { %v665_v30 = vmul.f32 1.442695, %v661_v49 }
 0x419   :  { %v784_v47 = vpop.f32.mrf.mxu1  ;;  %v655_v48 = vsel %vm359_vm15, %v3479_v46, -inf }
 0x41a   :  { %656 = vmax.xlane.f32.xlu1 %v655_v48  ;;  %2926 = vpow2.f32 %v665_v30  ;;  %v796_v53 = vmul.f32 0.35355338, %v784_v47 }
 0x41c   :  { %v800_v56 = vsel %vm359_vm15, %v796_v53, -inf }
 0x41e   :  { %v642_v40 = vpop.f32.mrf.mxu3 }
 0x41f   :  { %v3483_v50 = vmul.f32 0.35355338, %v642_v40 }
 0x420   :  { %v3488_v54 = vpop.eup %2926 }
 0x421   :  { %v787_v36 = vpop.f32.mrf.mxu1  ;;  %v658_v37 = vsel %vm369_vm2, %v3483_v50, -inf  ;;  %v673_v59 = vsel %vm359_vm15, %v3488_v54, 0.0 }
 0x422   :  { %v797_v51 = vmul.f32 0.35355338, %v787_v36  ;;  %659 = vmax.xlane.f32.xlu1 %v658_v37 }
 0x424   :  { %v803_v52 = vsel %vm359_vm15, %v797_v51, -inf }
 0x425   :  { %804 = vmax.xlane.f32.xlu2 %v803_v52  ;;  %v654_v15 = vpop.xlane.xlu1 %653 }
 0x429   :  { %v790_v55 = vpop.f32.mrf.mxu1 }
 0x42a   :  { %v798_v57 = vmul.f32 0.35355338, %v790_v55  ;;  %801 = vmax.xlane.f32.xlu1 %v800_v56 }
 0x42c   :  { %v806_v58 = vsel %vm359_vm15, %v798_v57, -inf }
 0x42d   :  { %807 = vmax.xlane.f32.xlu0 %v806_v58  ;;  %674 = vadd.xlane.f32.xlu2 %v673_v59  ;;  %v662_v59 = vsub.f32 %v3455_v10, %v654_v15 }
 0x431   :  { %v793_v60 = vpop.f32.mrf.mxu1 }
 0x432   :  { %v799_v61 = vmul.f32 0.35355338, %v793_v60  ;;  %v667_v60 = vmul.f32 1.442695, %v662_v59 }
 0x434   :  { %v809_v62 = vsel %vm369_vm2, %v799_v61, -inf }
 0x435   :  { %810 = vmax.xlane.f32.xlu0 %v809_v62 }
 0x440   :  { %v387_v63 = vpop.xlane.xlu2 %386 }
 0x441   :  { %2928 = vrcp.f32 %v387_v63 }
 0x443   :  { %2860 = vrot.lane.b32.xlu1 %v3396_v7, %s3128_s14 }
 0x445   :  { %699 = vrot.lane.b32.xlu2 %v3390_v6, %s3127_s13 }
 0x447   :  { %v2929_v1 = vpop.eup %2928 }
 0x448   :  { %v401_v2 = vmul.f32 %v2929_v1, %v3460_v17 }
 0x449   :  { %850 = vrot.lane.b32.xlu0 %v3390_v6, %s3128_s14 }
 0x44a   :  { %2695 = vmatmul.msk.f32.vlgmr.msra.gmra.mxu2 %vm359_vm15, %v401_v2 }
 0x44b   :  { %v393_v4 = vpop.xlane.xlu0 %392 }
 0x44d   :  { %844 = vrot.lane.b32.xlu2 %v3383_v0, %s3128_s14  ;;  %v390_v3 = vpop.xlane.xlu2 %389 }
 0x44e   :  { %2930 = vrcp.f32 %v390_v3 }
 0x44f   :  { %2932 = vrcp.f32 %v393_v4 }
 0x454   :  { %v2931_v5 = vpop.eup %2930 }
 0x455   :  { %693 = vrot.lane.b32.xlu2 %v3383_v0, %s3127_s13  ;;  %v402_v8 = vmul.f32 %v2931_v5, %v2923_v33  ;;  %v396_v9 = vpop.xlane.xlu2 %395  ;;  %v2933_v11 = vpop.eup %2932 }
 0x456   :  { %2934 = vrcp.f32 %v396_v9  ;;  %v403_v6 = vmul.f32 %v2933_v11, %v3465_v29 }
 0x457   :  { %2696 = vmatmul.msk.f32.gmra.mxu2 %vm359_vm15, %v402_v8 }
 0x45c   :  { %v2935_v12 = vpop.eup %2934 }
 0x45d   :  { %v404_v13 = vmul.f32 %v2935_v12, %v2925_v38 }
 0x45f   :  { %2697 = vmatmul.msk.f32.gmra.mxu2 %vm359_vm15, %v403_v6 }
 0x467   :  { %2698 = vmatmul.msk.f32.gmra.mxu2 %vm359_vm15, %v404_v13 }
 0x48d   :  { %v657_v16 = vpop.xlane.xlu1 %656 }
 0x48e   :  { %v663_v0 = vsub.f32 %v3479_v46, %v657_v16 }
 0x490   :  { %v669_v19 = vmul.f32 1.442695, %v663_v0 }
 0x495   :  { %v660_v17 = vpop.xlane.xlu1 %659 }
 0x496   :  { %v664_v48 = vsub.f32 %v3483_v50, %v660_v17 }
 0x498   :  { %v805_v18 = vpop.xlane.xlu2 %804  ;;  %v671_v36 = vmul.f32 1.442695, %v664_v48 }
 0x499   :  { %v813_v20 = vsub.f32 %v797_v51, %v805_v18 }
 0x49b   :  { %v818_v21 = vmul.f32 1.442695, %v813_v20 }
 0x49d   :  { %2936 = vpow2.f32 %v818_v21  ;;  %v802_v22 = vpop.xlane.xlu1 %801 }
 0x49e   :  { %v812_v23 = vsub.f32 %v796_v53, %v802_v22 }
 0x4a0   :  { %v816_v24 = vmul.f32 1.442695, %v812_v23  ;;  %v808_v26 = vpop.xlane.xlu0 %807  ;;  %v3512_v27 = vpop.xlane.xlu2 %674 }
 0x4a1   :  { %v814_v28 = vsub.f32 %v798_v57, %v808_v26 }
 0x4a2   :  { %2938 = vpow2.f32 %v816_v24 }
 0x4a3   :  { %v2937_v29 = vpop.eup %2936  ;;  %2940 = vpow2.f32 %v669_v19  ;;  %v820_v31 = vmul.f32 1.442695, %v814_v28 }
 0x4a4   :  { %v827_v33 = vsel %vm359_vm15, %v2937_v29, 0.0 }
 0x4a5   :  { %2942 = vpow2.f32 %v820_v31  ;;  %828 = vadd.xlane.f32.xlu0 %v827_v33 }
 0x4a8   :  { %v2939_v35 = vpop.eup %2938  ;;  %v811_v38 = vpop.xlane.xlu0 %810 }
 0x4a9   :  { %v700_v41 = vpop.permute.xlu2 %699  ;;  %v3515_v42 = vpop.eup %2940  ;;  %v815_v46 = vsub.f32 %v799_v61, %v811_v38  ;;  %v824_v39 = vsel %vm359_vm15, %v2939_v35, 0.0 }
 0x4aa   :  { %2707 = vmatpush.msk.msra.mxu0 %vm525_vm3, %v700_v41  ;;  %825 = vadd.xlane.f32.xlu1 %v824_v39  ;;  %v679_v30 = vsel %vm359_vm15, %v3515_v42, 0.0  ;;  %v2884_v41 = vld [vmem:[%s4532_s8] ss:$0 sm:$0xff] }
 0x4ab   :  { %v2943_v47 = vpop.eup %2942  ;;  %v822_v49 = vmul.f32 1.442695, %v815_v46 }
 0x4ac   :  { %v830_v40 = vsel %vm359_vm15, %v2943_v47, 0.0 }
 0x4ad   :  { %2944 = vpow2.f32 %v822_v49  ;;  %831 = vadd.xlane.f32.xlu2 %v830_v40  ;;  %680 = vadd.xlane.f32.xlu0 %v679_v30 }
 0x4ae   :  { %2946 = vpow2.f32 %v671_v36 }
 0x4af   :  { %2948 = vpow2.f32 %v667_v60 }
 0x4b1   :  { %v845_v58 = vpop.permute.xlu2 %844 }
 0x4b3   :  { %v2945_v37 = vpop.eup %2944 }
 0x4b4   :  { %v833_v51 = vsel %vm369_vm2, %v2945_v37, 0.0  ;;  %v3524_v52 = vpop.eup %2946 }
 0x4b5   :  { %834 = vadd.xlane.f32.xlu0 %v833_v51  ;;  %v2861_v53 = vpop.permute.xlu1 %2860  ;;  %v682_v56 = vsel %vm369_vm2, %v3524_v52, 0.0  ;;  %v2949_v61 = vpop.eup %2948 }
 0x4b6   :  { %v2862_v50 = vunpack.i.l.bf16 %v2861_v53  ;;  %v2863_v57 = vunpack.i.h.bf16 %v2861_v53  ;;  %v676_v62 = vsel %vm359_vm15, %v2949_v61, 0.0 }
 0x4b9   :  { %v694_v2 = vpop.permute.xlu2 %693 }
 0x4bb   :  { %v851_v55 = vpop.permute.xlu0 %850 }
 0x4bc   :  { %2720 = vmatpush.msk.msrb.mxu2 %vm525_vm3, %v851_v55 }
 0x4bd   :  { %683 = vadd.xlane.f32.xlu0 %v682_v56 }
 0x4be   :  { %882 = vmatpush.msrb.mxu2 %v2862_v50 }
 0x4c0   :  { %883 = vmatpush.msrb.mxu2 %v2863_v57 }
 0x4c2   :  { %884 = vmatpush.msrb.mxu2 %v845_v58 }
 0x4c3   :  { %2865 = vrot.lane.b32.xlu1 %v3396_v7, %s3127_s13 }
 0x4ed   :  { %677 = vadd.xlane.f32.xlu1 %v676_v62 }
 0x518   :  { %v829_v63 = vpop.xlane.xlu0 %828 }
 0x51d   :  { %v826_v1 = vpop.xlane.xlu1 %825 }
 0x51e   :  { %2950 = vrcp.f32 %v826_v1 }
 0x51f   :  { %2952 = vrcp.f32 %v829_v63 }
 0x520   :  { %v681_v5 = vpop.xlane.xlu0 %680  ;;  %v832_v8 = vpop.xlane.xlu2 %831 }
 0x521   :  { %2954 = vrcp.f32 %v832_v8 }
 0x522   :  { %2956 = vrcp.f32 %v3512_v27  ;;  %v588_v27 = vpop.f32.mrf.mxu2 }
 0x523   :  { %v589_v33 = vadd.f32 %v588_v27, %v3471_v43 }
 0x524   :  { %v2951_v3 = vpop.eup %2950 }
 0x525   :  { %v840_v4 = vmul.f32 %v2951_v3, %v2939_v35  ;;  %v2953_v7 = vpop.eup %2952 }
 0x526   :  { %v841_v10 = vmul.f32 %v2953_v7, %v2937_v29 }
 0x527   :  { %2721 = vmatmul.msk.f32.vlgmr.msrb.gmra.mxu2 %vm359_vm15, %v840_v4  ;;  %v2955_v11 = vpop.eup %2954 }
 0x528   :  { %v835_v9 = vpop.xlane.xlu0 %834  ;;  %v842_v12 = vmul.f32 %v2955_v11, %v2943_v47  ;;  %v2957_v15 = vpop.eup %2956 }
 0x529   :  { %2958 = vrcp.f32 %v835_v9  ;;  %v689_v18 = vmul.f32 %v2957_v15, %v3488_v54 }
 0x52a   :  { %v591_v28 = vpop.f32.mrf.mxu2 }
 0x52b   :  { %v592_v49 = vadd.f32 %v591_v28, %v3473_v44  ;;  %v3073_v28 = vld [vmem:[%s4526_s2 + $0x8] sm:$0xff] }
 0x52f   :  { %2722 = vmatmul.msk.f32.gmra.mxu2 %vm359_vm15, %v841_v10  ;;  %v2959_v17 = vpop.eup %2958 }
 0x530   :  { %v843_v20 = vmul.f32 %v2959_v17, %v2945_v37  ;;  %v684_v23 = vpop.xlane.xlu0 %683 }
 0x532   :  { %v594_v29 = vpop.f32.mrf.mxu2 }
 0x533   :  { %v595_v37 = vadd.f32 %v594_v29, %v3475_v45 }
 0x535   :  { %v2866_v6 = vpop.permute.xlu1 %2865 }
 0x536   :  { %v2867_v13 = vunpack.i.l.bf16 %v2866_v6  ;;  %v2868_v16 = vunpack.i.h.bf16 %v2866_v6 }
 0x537   :  { %2723 = vmatmul.msk.f32.gmra.mxu2 %vm359_vm15, %v842_v12 }
 0x538   :  { %731 = vmatpush.msra.mxu0 %v2867_v13 }
 0x53a   :  { %732 = vmatpush.msra.mxu0 %v2868_v16  ;;  %v597_v31 = vpop.f32.mrf.mxu2 }
 0x53b   :  { %v598_v57 = vadd.f32 %v597_v31, %v3477_v32 }
 0x53c   :  { %733 = vmatpush.msra.mxu0 %v694_v2 }
 0x53d   :  { %2708 = vmatmul.msk.f32.vlgmr.msra.gmra.mxu0 %vm359_vm15, %v689_v18 }
 0x53f   :  { %2724 = vmatmul.msk.f32.gmra.mxu2 %vm359_vm15, %v843_v20 }
 0x560   :  { %v678_v0 = vpop.xlane.xlu1 %677 }
 0x561   :  { %2960 = vrcp.f32 %v678_v0  ;;  %v3595_v0 = vld [vmem:[%s4529_s5 + $0x18] sm:$0xff] }
 0x562   :  { %2962 = vrcp.f32 %v681_v5  ;;  %1020 = vmatpush.msra.mxu3 %v3595_v0 }
 0x563   :  { %2964 = vrcp.f32 %v684_v23  ;;  %v3612_v23 = vld [vmem:[%s4529_s5] sm:$0xff] }
 0x567   :  { %v2961_v21 = vpop.eup %2960 }
 0x568   :  { %v690_v22 = vmul.f32 %v2961_v21, %v2949_v61  ;;  %v2963_v19 = vpop.eup %2962  ;;  %v3601_v21 = vld [vmem:[%s4529_s5 + $0x10] sm:$0xff] }
 0x569   :  { %v691_v24 = vmul.f32 %v2963_v19, %v3515_v42  ;;  %v2965_v54 = vpop.eup %2964  ;;  %1021 = vmatpush.msra.mxu3 %v3601_v21  ;;  %v3070_v19 = vld [vmem:[%s4526_s2 + $0x38] sm:$0xff] }
 0x56a   :  { %2709 = vmatmul.msk.f32.gmra.mxu0 %vm359_vm15, %v690_v22  ;;  %v692_v26 = vmul.f32 %v2965_v54, %v3524_v52  ;;  %v3607_v22 = vld [vmem:[%s4529_s5 + $0x8] sm:$0xff]  ;;  %v3072_v54 = vld [vmem:[%s4526_s2 + $0x18] sm:$0xff]  ;;  %s3129_s5 = smov [#allocation2]  }
 0x56b   :  { %1022 = vmatpush.msra.mxu3 %v3607_v22  ;;  %s2647_s12 = sshll.u32 %s3129_s5, 4  ;;  %s2648_s12 = int_to_ptr.vmem [resolvable:$true] %s2647_s12 }
 0x56d   :  { %1023 = vmatpush.msra.mxu3 %v3612_v23 }
 0x56f   :  { %1533 = vmatpush.msrb.mxu3 %v3070_v19 }
 0x572   :  { %2710 = vmatmul.msk.f32.gmra.mxu0 %vm359_vm15, %v691_v24  ;;  %v3071_v24 = vld [vmem:[%s4526_s2 + $0x28] sm:$0xff] }
 0x573   :  { %1534 = vmatpush.msrb.mxu3 %v3071_v24  ;;  %v2751_v24 = vld [vmem:[%s4525_s1 + $0x38] sm:$0xf] }
 0x575   :  { %1535 = vmatpush.msrb.mxu3 %v3072_v54  ;;  %v1401_v54 = vsel %vm95_vm1, %v2751_v24, 0.0 }
 0x577   :  { %1536 = vmatpush.msrb.mxu3 %v3073_v28 }
 0x57a   :  { %2711 = vmatmul.msk.f32.gmra.mxu0 %vm359_vm15, %v692_v26 }
 0x5aa   :  { %v886_v42 = vpop.f32.mrf.mxu2 }
 0x5b2   :  { %v889_v48 = vpop.f32.mrf.mxu2 }
 0x5ba   :  { %v735_v35 = vpop.f32.mrf.mxu0  ;;  %v892_v52 = vpop.f32.mrf.mxu2 }
 0x5bb   :  { %v747_v38 = vadd.f32 %v735_v35, %v589_v33 }
 0x5bd   :  { %v898_v46 = vadd.f32 %v886_v42, %v747_v38 }
 0x5bf   :  { %v3549_v39 = vadd.f32 %v2884_v41, %v898_v46 }
 0x5c1   :  { %v907_v47 = vsel %vm85_vm0, %v3549_v39, 0.0 }
 0x5c2   :  { %908 = vadd.xlane.f32.xlu1 %v907_v47  ;;  %v895_v60 = vpop.f32.mrf.mxu2 }
 0x5e7   :  { %v738_v40 = vpop.f32.mrf.mxu0 }
 0x5e8   :  { %v748_v30 = vadd.f32 %v738_v40, %v592_v49 }
 0x5ea   :  { %v899_v43 = vadd.f32 %v889_v48, %v748_v30 }
 0x5ec   :  { %v3554_v36 = vadd.f32 %v2884_v41, %v899_v43 }
 0x5ee   :  { %v910_v51 = vsel %vm85_vm0, %v3554_v36, 0.0 }
 0x5ef   :  { %v741_v53 = vpop.f32.mrf.mxu0  ;;  %911 = vadd.xlane.f32.xlu0 %v910_v51 }
 0x5f0   :  { %v749_v55 = vadd.f32 %v741_v53, %v595_v37 }
 0x5f2   :  { %v900_v50 = vadd.f32 %v892_v52, %v749_v55 }
 0x5f4   :  { %v3559_v56 = vadd.f32 %v2884_v41, %v900_v50 }
 0x5f6   :  { %v913_v44 = vsel %vm85_vm0, %v3559_v56, 0.0 }
 0x5f7   :  { %v744_v58 = vpop.f32.mrf.mxu0  ;;  %914 = vadd.xlane.f32.xlu1 %v913_v44 }
 0x5f8   :  { %v750_v59 = vadd.f32 %v744_v58, %v598_v57 }
 0x5fa   :  { %v901_v45 = vadd.f32 %v895_v60, %v750_v59 }
 0x5fc   :  { %v3564_v61 = vadd.f32 %v2884_v41, %v901_v45 }
 0x5fe   :  { %v916_v62 = vsel %vm95_vm1, %v3564_v61, 0.0 }
 0x5ff   :  { %917 = vadd.xlane.f32.xlu2 %v916_v62 }
 0x635   :  { %v909_v63 = vpop.xlane.xlu1 %908 }
 0x636   :  { %v919_v1 = vmul.f32 %v909_v63, %v3207_v14 }
 0x638   :  { %v923_v2 = vsub.f32 %v3549_v39, %v919_v1 }
 0x63a   :  { %v927_v32 = vmul.f32 %v923_v2, %v923_v2 }
 0x63c   :  { %v931_v3 = vsel %vm85_vm0, %v927_v32, 0.0 }
 0x63d   :  { %932 = vadd.xlane.f32.xlu0 %v931_v3 }
 0x662   :  { %v912_v4 = vpop.xlane.xlu0 %911 }
 0x663   :  { %v920_v5 = vmul.f32 %v912_v4, %v3207_v14 }
 0x665   :  { %v3573_v8 = vsub.f32 %v3554_v36, %v920_v5 }
 0x667   :  { %v928_v7 = vmul.f32 %v3573_v8, %v3573_v8 }
 0x669   :  { %v934_v10 = vsel %vm85_vm0, %v928_v7, 0.0 }
 0x66a   :  { %935 = vadd.xlane.f32.xlu1 %v934_v10  ;;  %v915_v9 = vpop.xlane.xlu1 %914 }
 0x66b   :  { %v921_v11 = vmul.f32 %v915_v9, %v3207_v14 }
 0x66d   :  { %v3580_v6 = vsub.f32 %v3559_v56, %v921_v11 }
 0x66f   :  { %v929_v12 = vmul.f32 %v3580_v6, %v3580_v6 }
 0x671   :  { %v937_v13 = vsel %vm85_vm0, %v929_v12, 0.0 }
 0x672   :  { %938 = vadd.xlane.f32.xlu2 %v937_v13  ;;  %v918_v15 = vpop.xlane.xlu2 %917 }
 0x673   :  { %v922_v16 = vmul.f32 %v918_v15, %v3207_v14 }
 0x675   :  { %v3587_v17 = vsub.f32 %v3564_v61, %v922_v16  ;;  %v2748_v16 = vld [vmem:[%s4525_s1 + $0x20] sm:$0xff] }
 0x677   :  { %v930_v18 = vmul.f32 %v3587_v17, %v3587_v17 }
 0x679   :  { %v940_v20 = vsel %vm95_vm1, %v930_v18, 0.0  ;;  %v2750_v18 = vld [vmem:[%s4525_s1 + $0x30] sm:$0xff] }
 0x67a   :  { %941 = vadd.xlane.f32.xlu0 %v940_v20  ;;  %v1392_v20 = vsel %vm85_vm0, %v2748_v16, 0.0 }
 0x67b   :  { %1393 = vadd.xlane.f32.xlu1 %v1392_v20 }
 0x683   :  { %1402 = vadd.xlane.f32.xlu1 %v1401_v54  ;;  %v3748_v54 = vld [vmem:[%s4533_s9 + $0x4] ss:$0 sm:$0xff] }
 0x6b0   :  { %v933_v26 = vpop.xlane.xlu0 %932 }
 0x6b1   :  { %v943_v27 = vmul.f32 %v933_v26, %v3207_v14 }
 0x6b3   :  { %v947_v29 = vadd.f32 1e-05, %v943_v27 }
 0x6b5   :  { %2966 = vrsqrt.f32 %v947_v29  ;;  %vm957_vm5 = vweird.f32 %v947_v29 }
 0x6bb   :  { %v2967_v31 = vpop.eup %2966 }
 0x6bc   :  { %v952_v33 = vmul.f32 %v2967_v31, %v947_v29  ;;  %vm958_vm4 = vweird.f32 %v2967_v31  ;;  %v2885_v29 = vld [vmem:[%s4533_s9] ss:$0 sm:$0xff] }
 0x6bd   :  { %vm959_vm6 = vmor %vm957_vm5, %vm958_vm4 }
 0x6be   :  { %v953_v35 = vmul.f32 %v2967_v31, %v952_v33 }
 0x6c0   :  { %v954_v38 = vmul.f32 0.5, %v953_v35 }
 0x6c2   :  { %v955_v41 = vsub.f32 1.5, %v954_v38 }
 0x6c4   :  { %v956_v42 = vmul.f32 %v2967_v31, %v955_v41 }
 0x6c6   :  { %v960_v46 = vsel %vm959_vm6, %v2967_v31, %v956_v42  ;;  %v64_v42 = vld [vmem:[%s4531_s7] sm:$0xff] }
 0x6c7   :  { %v991_v47 = vmul.f32 %v960_v46, %v923_v2  ;;  %v65_v46 = vld [vmem:[%s4531_s7 + $0x8] sm:$0xff] }
 0x6c9   :  { %2725 = vmatmul.msk.f32.vlgmr.msra.gmra.mxu3 %vm85_vm0, %v991_v47  ;;  %v66_v47 = vld [vmem:[%s4531_s7 + $0x10] sm:$0xff] }
 0x6dd   :  { %v936_v48 = vpop.xlane.xlu1 %935 }
 0x6de   :  { %v944_v49 = vmul.f32 %v936_v48, %v3207_v14  ;;  %v67_v48 = vld [vmem:[%s4531_s7 + $0x18] sm:$0xff] }
 0x6e0   :  { %v948_v40 = vadd.f32 1e-05, %v944_v49 }
 0x6e2   :  { %2968 = vrsqrt.f32 %v948_v40  ;;  %vm967_vm8 = vweird.f32 %v948_v40 }
 0x6e5   :  { %v939_v30 = vpop.xlane.xlu2 %938 }
 0x6e6   :  { %v945_v43 = vmul.f32 %v939_v30, %v3207_v14 }
 0x6e8   :  { %v2969_v37 = vpop.eup %2968  ;;  %v949_v51 = vadd.f32 1e-05, %v945_v43 }
 0x6e9   :  { %v962_v52 = vmul.f32 %v2969_v37, %v948_v40  ;;  %vm968_vm7 = vweird.f32 %v2969_v37 }
 0x6ea   :  { %2970 = vrsqrt.f32 %v949_v51  ;;  %vm969_vm9 = vmor %vm967_vm8, %vm968_vm7  ;;  %vm977_vm11 = vweird.f32 %v949_v51 }
 0x6eb   :  { %v963_v53 = vmul.f32 %v2969_v37, %v962_v52 }
 0x6ed   :  { %v964_v55 = vmul.f32 0.5, %v963_v53  ;;  %v942_v50 = vpop.xlane.xlu0 %941 }
 0x6ee   :  { %v946_v57 = vmul.f32 %v942_v50, %v3207_v14  ;;  %v1394_v49 = vpop.xlane.xlu1 %1393  ;;  %v68_v50 = vld [vmem:[%s4531_s7 + $0x20] sm:$0xff] }
 0x6ef   :  { %v965_v44 = vsub.f32 1.5, %v964_v55  ;;  %v1404_v30 = vmul.f32 %v1394_v49, %v3207_v14 }
 0x6f0   :  { %v2971_v58 = vpop.eup %2970  ;;  %v950_v59 = vadd.f32 1e-05, %v946_v57 }
 0x6f1   :  { %v972_v60 = vmul.f32 %v2971_v58, %v949_v51  ;;  %v966_v45 = vmul.f32 %v2969_v37, %v965_v44  ;;  %vm978_vm10 = vweird.f32 %v2971_v58  ;;  %v3687_v52 = vsub.f32 %v2748_v16, %v1404_v30 }
 0x6f2   :  { %2972 = vrsqrt.f32 %v950_v59  ;;  %vm979_vm12 = vmor %vm977_vm11, %vm978_vm10  ;;  %vm987_vm14 = vweird.f32 %v950_v59 }
 0x6f3   :  { %v973_v62 = vmul.f32 %v2971_v58, %v972_v60  ;;  %v970_v63 = vsel %vm969_vm9, %v2969_v37, %v966_v45  ;;  %v1412_v57 = vmul.f32 %v3687_v52, %v3687_v52 }
 0x6f4   :  { %v992_v1 = vmul.f32 %v970_v63, %v3573_v8 }
 0x6f5   :  { %v974_v2 = vmul.f32 0.5, %v973_v62 }
 0x6f6   :  { %2726 = vmatmul.msk.f32.gmra.mxu3 %vm85_vm0, %v992_v1  ;;  %v1403_v45 = vpop.xlane.xlu1 %1402 }
 0x6f7   :  { %v975_v32 = vsub.f32 1.5, %v974_v2  ;;  %v1407_v63 = vmul.f32 %v1403_v45, %v3207_v14  ;;  %v69_v2 = vld [vmem:[%s4531_s7 + $0x28] sm:$0xff] }
 0x6f8   :  { %v2973_v3 = vpop.eup %2972 }
 0x6f9   :  { %v982_v4 = vmul.f32 %v2973_v3, %v950_v59  ;;  %v976_v5 = vmul.f32 %v2971_v58, %v975_v32  ;;  %vm988_vm13 = vweird.f32 %v2973_v3  ;;  %v1416_v59 = vsel %vm85_vm0, %v1412_v57, 0.0 }
 0x6fa   :  { %vm989_vm4 = vmor %vm987_vm14, %vm988_vm13  ;;  %v3707_v1 = vsub.f32 %v2751_v24, %v1407_v63 }
 0x6fb   :  { %v983_v7 = vmul.f32 %v2973_v3, %v982_v4  ;;  %v980_v10 = vsel %vm979_vm12, %v2971_v58, %v976_v5  ;;  %v70_v4 = vld [vmem:[%s4531_s7 + $0x30] sm:$0xff]  ;;  %v71_v5 = vld [vmem:[%s4531_s7 + $0x38] sm:$0xf] }
 0x6fc   :  { %v993_v9 = vmul.f32 %v980_v10, %v3580_v6  ;;  %v2749_v6 = vld [vmem:[%s4525_s1 + $0x28] sm:$0xff]  ;;  %v1415_v32 = vmul.f32 %v3707_v1, %v3707_v1 }
 0x6fd   :  { %v984_v11 = vmul.f32 0.5, %v983_v7  ;;  %v1395_v19 = vsel %vm85_vm0, %v2749_v6, 0.0 }
 0x6fe   :  { %2727 = vmatmul.msk.f32.gmra.mxu3 %vm85_vm0, %v993_v9  ;;  %1396 = vadd.xlane.f32.xlu2 %v1395_v19 }
 0x6ff   :  { %v985_v12 = vsub.f32 1.5, %v984_v11 }
 0x701   :  { %v986_v8 = vmul.f32 %v2973_v3, %v985_v12  ;;  %v3729_v12 = vld [vmem:[%s4533_s9 + $0x1] ss:$0 sm:$0xff] }
 0x703   :  { %v990_v13 = vsel %vm989_vm4, %v2973_v3, %v986_v8  ;;  %v1425_v3 = vsel %vm95_vm1, %v1415_v32, 0.0  ;;  %v3734_v8 = vld [vmem:[%s4533_s9 + $0x2] ss:$0 sm:$0xff] }
 0x704   :  { %v994_v15 = vmul.f32 %v990_v13, %v3587_v17  ;;  %v1398_v17 = vsel %vm85_vm0, %v2750_v18, 0.0 }
 0x705   :  { %1399 = vadd.xlane.f32.xlu0 %v1398_v17 }
 0x706   :  { %2728 = vmatmul.msk.f32.gmra.mxu3 %vm85_vm0, %v994_v15  ;;  %1417 = vadd.xlane.f32.xlu2 %v1416_v59 }
 0x70e   :  { %1426 = vadd.xlane.f32.xlu2 %v1425_v3 }
 0x74c   :  { %v1025_v26 = vpop.f32.mrf.mxu3 }
 0x74d   :  { %v1026_v41 = vadd.f32 %v2885_v29, %v1025_v26 }
 0x74f   :  { %v1111_v20 = vmul.f32 %v3734_v8, %v1026_v41 }
 0x771   :  { %v1397_v40 = vpop.xlane.xlu2 %1396 }
 0x772   :  { %v1405_v43 = vmul.f32 %v1397_v40, %v3207_v14 }
 0x774   :  { %v3689_v53 = vsub.f32 %v2749_v6, %v1405_v43  ;;  %v3741_v6 = vld [vmem:[%s4533_s9 + $0x3] ss:$0 sm:$0xff] }
 0x776   :  { %v1413_v44 = vmul.f32 %v3689_v53, %v3689_v53 }
 0x778   :  { %v1400_v37 = vpop.xlane.xlu0 %1399  ;;  %v1419_v60 = vsel %vm85_vm0, %v1413_v44, 0.0 }
 0x779   :  { %v1028_v27 = vpop.f32.mrf.mxu3  ;;  %v1406_v51 = vmul.f32 %v1400_v37, %v3207_v14  ;;  %1420 = vadd.xlane.f32.xlu0 %v1419_v60  ;;  %v1418_v13 = vpop.xlane.xlu2 %1417  ;;  %v3775_v60 = vld [vmem:[%s4530_s6 + $0x38] sm:$0xff] }
 0x77a   :  { %v3664_v38 = vadd.f32 %v2885_v29, %v1028_v27  ;;  %v1428_v15 = vmul.f32 %v1418_v13, %v3207_v14  ;;  %1331 = vmatpush.msra.mxu1 %v3775_v60 }
 0x77b   :  { %v3691_v55 = vsub.f32 %v2750_v18, %v1406_v51 }
 0x77c   :  { %v1432_v18 = vadd.f32 1e-05, %v1428_v15 }
 0x77d   :  { %v1414_v58 = vmul.f32 %v3691_v55, %v3691_v55 }
 0x77e   :  { %2974 = vrsqrt.f32 %v1432_v18  ;;  %vm1442_vm5 = vweird.f32 %v1432_v18 }
 0x77f   :  { %v1422_v62 = vsel %vm85_vm0, %v1414_v58, 0.0 }
 0x780   :  { %1423 = vadd.xlane.f32.xlu1 %v1422_v62 }
 0x781   :  { %v1031_v28 = vpop.f32.mrf.mxu3 }
 0x782   :  { %v3660_v35 = vadd.f32 %v2885_v29, %v1031_v28 }
 0x784   :  { %v1113_v58 = vmul.f32 %v3734_v8, %v3660_v35 }
 0x789   :  { %v1034_v31 = vpop.f32.mrf.mxu3 }
 0x78a   :  { %v3658_v33 = vadd.f32 %v2885_v29, %v1034_v31 }
 0x78c   :  { %2729 = vmatpush.msk.msrb.mxu0 %vm525_vm3, %v3658_v33 }
 0x78e   :  { %1077 = vmatpush.msrb.mxu0 %v3660_v35 }
 0x790   :  { %1078 = vmatpush.msrb.mxu0 %v3664_v38 }
 0x792   :  { %1079 = vmatpush.msrb.mxu0 %v1026_v41  ;;  %v2975_v41 = vpop.eup %2974 }
 0x793   :  { %2730 = vmatmul.msk.f32.vlgmr.msrb.gmra.mxu0 %vm359_vm15, %v64_v42  ;;  %vm1443_vm6 = vweird.f32 %v2975_v41 }
 0x794   :  { %vm1444_vm7 = vmor %vm1442_vm5, %vm1443_vm6 }
 0x79b   :  { %2731 = vmatmul.msk.f32.gmra.mxu0 %vm359_vm15, %v65_v46  ;;  %v1112_v46 = vmul.f32 %v3734_v8, %v3664_v38 }
 0x7a3   :  { %2732 = vmatmul.msk.f32.gmra.mxu0 %vm359_vm15, %v66_v47 }
 0x7ab   :  { %2733 = vmatmul.msk.f32.gmra.mxu0 %vm359_vm15, %v67_v48  ;;  %v1437_v48 = vmul.f32 %v2975_v41, %v1432_v18 }
 0x7ad   :  { %v1438_v37 = vmul.f32 %v2975_v41, %v1437_v48 }
 0x7af   :  { %v1439_v38 = vmul.f32 0.5, %v1438_v37  ;;  %v3828_v37 = vld [vmem:[%s4530_s6 + $0x18] sm:$0xff] }
 0x7b3   :  { %2734 = vmatmul.msk.f32.gmra.mxu0 %vm359_vm15, %v68_v50 }
 0x7bb   :  { %2735 = vmatmul.msk.f32.gmra.mxu0 %vm359_vm15, %v69_v2  ;;  %v1440_v2 = vsub.f32 1.5, %v1439_v38 }
 0x7c3   :  { %2736 = vmatmul.msk.f32.gmra.mxu0 %vm359_vm15, %v70_v4  ;;  %v3790_v4 = vld [vmem:[%s4530_s6 + $0x30] sm:$0xff] }
 0x7c4   :  { %1332 = vmatpush.msra.mxu1 %v3790_v4 }
 0x7cb   :  { %2737 = vmatmul.msk.f32.gmra.mxu0 %vm359_vm15, %v71_v5 }
 0x7ec   :  { %v1421_v27 = vpop.xlane.xlu0 %1420 }
 0x7ed   :  { %v1429_v28 = vmul.f32 %v1421_v27, %v3207_v14  ;;  %v3814_v27 = vld [vmem:[%s4530_s6 + $0x20] sm:$0xff] }
 0x7ef   :  { %v3755_v42 = vadd.f32 1e-05, %v1429_v28 }
 0x7f1   :  { %2976 = vrsqrt.f32 %v3755_v42  ;;  %vm1452_vm8 = vweird.f32 %v3755_v42 }
 0x7f3   :  { %v1424_v44 = vpop.xlane.xlu1 %1423 }
 0x7f4   :  { %v1430_v59 = vmul.f32 %v1424_v44, %v3207_v14 }
 0x7f6   :  { %v3785_v3 = vadd.f32 1e-05, %v1430_v59 }
 0x7f7   :  { %v3783_v32 = vpop.eup %2976 }
 0x7f8   :  { %v1447_v15 = vmul.f32 %v3783_v32, %v3755_v42  ;;  %2978 = vrsqrt.f32 %v3785_v3  ;;  %vm1453_vm9 = vweird.f32 %v3783_v32  ;;  %v3074_v42 = vld [vmem:[%s4528_s4 + $0x18] sm:$0xff]  ;;  %vm1462_vm11 = vweird.f32 %v3785_v3 }
 0x7f9   :  { %vm3888_vm10 = vmor %vm1452_vm8, %vm1453_vm9 }
 0x810   :  { %v1081_v7 = vpop.f32.mrf.mxu0 }
 0x811   :  { %v1106_v16 = vmul.f32 %v3729_v12, %v1081_v7 }
 0x813   :  { %v1115_v17 = vadd.f32 %v1111_v20, %v1106_v16  ;;  %v3802_v16 = vld [vmem:[%s4530_s6 + $0x28] sm:$0xff] }
 0x814   :  { %1333 = vmatpush.msra.mxu1 %v3802_v16 }
 0x816   :  { %1334 = vmatpush.msra.mxu1 %v3814_v27 }
 0x818   :  { %v1084_v10 = vpop.f32.mrf.mxu0  ;;  %1335 = vmatpush.msra.mxu1 %v3828_v37 }
 0x819   :  { %v1107_v29 = vmul.f32 %v3729_v12, %v1084_v10 }
 0x81b   :  { %v1116_v40 = vadd.f32 %v1112_v46, %v1107_v29 }
 0x820   :  { %v1087_v9 = vpop.f32.mrf.mxu0 }
 0x821   :  { %v1108_v51 = vmul.f32 %v3729_v12, %v1087_v9  ;;  %v1441_v9 = vmul.f32 %v2975_v41, %v1440_v2 }
 0x823   :  { %v1117_v35 = vadd.f32 %v1113_v58, %v1108_v51  ;;  %v3848_v58 = vld [vmem:[%s4530_s6 + $0x10] sm:$0xff] }
 0x824   :  { %1336 = vmatpush.msra.mxu1 %v3848_v58 }
 0x828   :  { %v3724_v11 = vpop.f32.mrf.mxu0 }
 0x830   :  { %v1093_v19 = vpop.f32.mrf.mxu0 }
 0x831   :  { %v1120_v24 = vmul.f32 %v3741_v6, %v1093_v19 }
 0x833   :  { %v1124_v26 = vadd.f32 %v1120_v24, %v1115_v17  ;;  %v1445_v24 = vsel %vm1444_vm7, %v2975_v41, %v1441_v9 }
 0x834   :  { %v3822_v41 = vmul.f32 %v1445_v24, %v3687_v52  ;;  %v3837_v52 = vpop.eup %2978 }
 0x835   :  { %v3753_v31 = vadd.f32 %v3748_v54, %v1124_v26  ;;  %v1448_v26 = vmul.f32 %v3783_v32, %v1447_v15  ;;  %vm1463_vm12 = vweird.f32 %v3837_v52 }
 0x836   :  { %2756 = vmatmul.msk.f32.vlgmr.msrb.gmra.mxu3 %vm85_vm0, %v3822_v41  ;;  %vm3942_vm13 = vmor %vm1462_vm11, %vm1463_vm12 }
 0x837   :  { %v3760_v47 = vmul.f32 0.70710677, %v3753_v31 }
 0x838   :  { %v1096_v49 = vpop.f32.mrf.mxu0 }
 0x839   :  { %v1141_v30 = vmul.f32 %v3760_v47, %v3760_v47  ;;  %v1121_v43 = vmul.f32 %v3741_v6, %v1096_v49  ;;  %v1427_v49 = vpop.xlane.xlu2 %1426 }
 0x83b   :  { %v3767_v50 = vmin.f32 %v1141_v30, 16.0  ;;  %v1125_v57 = vadd.f32 %v1121_v43, %v1116_v40  ;;  %v1109_v40 = vmul.f32 %v3729_v12, %v3724_v11  ;;  %v1449_v30 = vmul.f32 0.5, %v1448_v26 }
 0x83c   :  { %v1431_v43 = vmul.f32 %v1427_v49, %v3207_v14  ;;  %v1114_v11 = vmul.f32 %v3734_v8, %v3658_v33 }
 0x83d   :  { %v1143_v45 = vmul.f32 2.1237322e-06, %v3767_v50  ;;  %v1154_v62 = vmul.f32 3.8918573e-05, %v3767_v50  ;;  %v3780_v63 = vadd.f32 %v3748_v54, %v1125_v57  ;;  %v1450_v8 = vsub.f32 1.5, %v1449_v30 }
 0x83e   :  { %v3841_v12 = vadd.f32 1e-05, %v1431_v43  ;;  %v1118_v2 = vadd.f32 %v1114_v11, %v1109_v40  ;;  %v3075_v43 = vld [vmem:[%s4528_s4 + $0x10] sm:$0xff] }
 0x83f   :  { %v1144_v5 = vadd.f32 0.00028619796, %v1143_v45  ;;  %v1155_v7 = vadd.f32 0.001143296, %v1154_v62  ;;  %v3793_v10 = vmul.f32 0.70710677, %v3780_v63 }
 0x840   :  { %v1099_v13 = vpop.f32.mrf.mxu0  ;;  %2980 = vrsqrt.f32 %v3841_v12  ;;  %vm1472_vm14 = vweird.f32 %v3841_v12 }
 0x841   :  { %v1145_v20 = vmul.f32 %v1144_v5, %v3767_v50  ;;  %v1156_v19 = vmul.f32 %v1155_v7, %v3767_v50  ;;  %v1181_v17 = vmul.f32 %v3793_v10, %v3793_v10  ;;  %v1122_v18 = vmul.f32 %v3741_v6, %v1099_v13  ;;  %v3857_v5 = vld [vmem:[%s4530_s6 + $0x8] sm:$0xff] }
 0x842   :  { %v1457_v13 = vmul.f32 %v3837_v52, %v3785_v3  ;;  %1337 = vmatpush.msra.mxu1 %v3857_v5 }
 0x843   :  { %v1146_v28 = vadd.f32 0.0036580483, %v1145_v20  ;;  %v1157_v29 = vadd.f32 0.014752088, %v1156_v19  ;;  %v3816_v46 = vmin.f32 %v1181_v17, 16.0  ;;  %v1126_v48 = vadd.f32 %v1122_v18, %v1117_v35 }
 0x844   :  { %v1458_v40 = vmul.f32 %v3837_v52, %v1457_v13 }
 0x845   :  { %v1147_v51 = vmul.f32 %v1146_v28, %v3767_v50  ;;  %v1158_v57 = vmul.f32 %v1157_v29, %v3767_v50  ;;  %v1183_v38 = vmul.f32 2.1237322e-06, %v3816_v46  ;;  %v3834_v44 = vadd.f32 %v3748_v54, %v1126_v48 }
 0x846   :  { %v1194_v24 = vmul.f32 3.8918573e-05, %v3816_v46  ;;  %v1451_v28 = vmul.f32 %v3783_v32, %v1450_v8 }
 0x847   :  { %v1148_v59 = vadd.f32 0.05243302, %v1147_v51  ;;  %v1159_v45 = vadd.f32 0.112945676, %v1158_v57  ;;  %v1184_v62 = vadd.f32 0.00028619796, %v1183_v38  ;;  %v3896_v51 = vpop.eup %2980 }
 0x848   :  { %v3852_v35 = vmul.f32 0.70710677, %v3834_v44  ;;  %v1102_v33 = vpop.f32.mrf.mxu0  ;;  %v1195_v11 = vadd.f32 0.001143296, %v1194_v24  ;;  %vm1473_vm4 = vweird.f32 %v3896_v51 }
 0x849   :  { %v1160_v7 = vmul.f32 %v1159_v45, %v3767_v50  ;;  %v1123_v9 = vmul.f32 %v3741_v6, %v1102_v33  ;;  %v1149_v15 = vmul.f32 %v1148_v59, %v3767_v50  ;;  %v3873_v6 = vld [vmem:[%s4530_s6] sm:$0xff]  ;;  %v1185_v17 = vmul.f32 %v1184_v62, %v3816_v46  ;;  %v3076_v62 = vld [vmem:[%s4528_s4 + $0x8] sm:$0xff]  ;;  %vm1474_vm9 = vmor %vm1472_vm14, %vm1473_vm4 }
 0x84a   :  { %v1221_v20 = vmul.f32 %v3852_v35, %v3852_v35  ;;  %1338 = vmatpush.msra.mxu1 %v3873_v6  ;;  %v1455_v45 = vsel %vm3888_vm10, %v3783_v32, %v1451_v28  ;;  %v3077_v32 = vld [vmem:[%s4528_s4] sm:$0xff]  ;;  %vm1310_vm10 = vcmask 523264  }
 0x84b   :  { %v1161_v19 = vadd.f32 0.4994258, %v1160_v7  ;;  %v1127_v18 = vadd.f32 %v1123_v9, %v1118_v2  ;;  %v1150_v30 = vadd.f32 0.18741608, %v1149_v15  ;;  %v1186_v38 = vadd.f32 0.0036580483, %v1185_v17 }
 0x84c   :  { %v3878_v26 = vmin.f32 %v1221_v20, 16.0  ;;  %1582 = vmatpush.msrb.mxu1 %v3074_v42  ;;  %v1459_v2 = vmul.f32 0.5, %v1458_v40  ;;  %v1467_v7 = vmul.f32 %v3896_v51, %v3841_v12  ;;  %v3921_v13 = vmul.f32 %v1455_v45, %v3689_v53 }
 0x84d   :  { %v1162_v29 = vmul.f32 %v1161_v19, %v3767_v50  ;;  %v3886_v48 = vadd.f32 %v3748_v54, %v1127_v18  ;;  %v1151_v33 = vmul.f32 %v1150_v30, %v3767_v50  ;;  %v1187_v9 = vmul.f32 %v1186_v38, %v3816_v46 }
 0x84e   :  { %1583 = vmatpush.msrb.mxu1 %v3075_v43  ;;  %v1223_v54 = vmul.f32 2.1237322e-06, %v3878_v26  ;;  %v1196_v15 = vmul.f32 %v1195_v11, %v3816_v46  ;;  %v1460_v19 = vsub.f32 1.5, %v1459_v2  ;;  %2757 = vmatmul.msk.f32.gmra.mxu3 %vm85_vm0, %v3921_v13  ;;  %v1234_v18 = vmul.f32 3.8918573e-05, %v3878_v26 }
 0x84f   :  { %v3898_v57 = vadd.f32 1.0, %v1162_v29  ;;  %v3902_v59 = vmul.f32 0.70710677, %v3886_v48  ;;  %v1152_v24 = vadd.f32 1.1283791, %v1151_v33  ;;  %v1468_v28 = vmul.f32 %v3896_v51, %v1467_v7 }
 0x850   :  { %1584 = vmatpush.msrb.mxu1 %v3076_v62  ;;  %v1224_v20 = vadd.f32 0.00028619796, %v1223_v54  ;;  %v1197_v17 = vadd.f32 0.014752088, %v1196_v15  ;;  %v1188_v29 = vadd.f32 0.05243302, %v1187_v9  ;;  %v1461_v2 = vmul.f32 %v3837_v52, %v1460_v19 }
 0x851   :  { %2982 = vrcp.f32 %v3898_v57  ;;  %v1261_v8 = vmul.f32 %v3902_v59, %v3902_v59  ;;  %v1235_v40 = vadd.f32 0.001143296, %v1234_v18  ;;  %v1173_v38 = vand.u32 2147483647, %v3898_v57 }
 0x852   :  { %1585 = vmatpush.msrb.mxu1 %v3077_v32  ;;  %v1198_v49 = vmul.f32 %v1197_v17, %v3816_v46  ;;  %v1225_v11 = vmul.f32 %v1224_v20, %v3878_v26  ;;  %v1175_v7 = vand.u32 2147483648, %v3898_v57  ;;  %v1469_v32 = vmul.f32 0.5, %v1468_v28 }
 0x853   :  { %v3924_v50 = vmin.f32 %v1261_v8, 16.0  ;;  %v1236_v33 = vmul.f32 %v1235_v40, %v3878_v26  ;;  %v1465_v20 = vsel %vm3942_vm13, %v3837_v52, %v1461_v2  ;;  %vm1169_vm6 = vweird.f32 %v3898_v57 }
 0x854   :  { %v1199_v62 = vadd.f32 0.112945676, %v1198_v49  ;;  %v3957_v19 = vmul.f32 %v1465_v20, %v3691_v55  ;;  %v1153_v49 = vmul.f32 %v1152_v24, %v3760_v47  ;;  %v1226_v28 = vadd.f32 0.0036580483, %v1225_v11 }
 0x855   :  { %v1263_v53 = vmul.f32 2.1237322e-06, %v3924_v50  ;;  %v1274_v30 = vmul.f32 3.8918573e-05, %v3924_v50  ;;  %v1237_v17 = vadd.f32 0.014752088, %v1236_v33  ;;  %v1189_v55 = vmul.f32 %v1188_v29, %v3816_v46 }
 0x856   :  { %v1200_v15 = vmul.f32 %v1199_v62, %v3816_v46  ;;  %2758 = vmatmul.msk.f32.gmra.mxu3 %vm85_vm0, %v3957_v19  ;;  %v1176_v54 = vor.u32 1.1754944e-38, %v1175_v7  ;;  %vm1174_vm8 = vcmp.eq.f32.partialorder %v1173_v38, 8.507059e+37  ;;  %v1470_v24 = vsub.f32 1.5, %v1469_v32 }
 0x857   :  { %v2983_v42 = vpop.eup %2982  ;;  %v1264_v45 = vadd.f32 0.00028619796, %v1263_v53  ;;  %v1275_v9 = vadd.f32 0.001143296, %v1274_v30  ;;  %v1238_v30 = vmul.f32 %v1237_v17, %v3878_v26  ;;  %v1133_v32 = vmul.f32 0.5, %v3753_v31 }
 0x858   :  { %v1165_v43 = vmul.f32 %v2983_v42, %v3898_v57  ;;  %vm1170_vm5 = vweird.f32 %v2983_v42  ;;  %v1201_v40 = vadd.f32 0.4994258, %v1200_v15  ;;  %v1227_v57 = vmul.f32 %v1226_v28, %v3878_v26 }
 0x859   :  { %v1265_v3 = vmul.f32 %v1264_v45, %v3924_v50  ;;  %v1276_v53 = vmul.f32 %v1275_v9, %v3924_v50  ;;  %vm1171_vm7 = vmor %vm1169_vm6, %vm1170_vm5  ;;  %v1239_v2 = vadd.f32 0.112945676, %v1238_v30  ;;  %v1471_v38 = vmul.f32 %v3896_v51, %v1470_v24 }
 0x85a   :  { %v1166_v8 = vsub.f32 1.0, %v1165_v43  ;;  %v1202_v62 = vmul.f32 %v1201_v40, %v3816_v46  ;;  %v1190_v20 = vadd.f32 0.18741608, %v1189_v55  ;;  %v1228_v17 = vadd.f32 0.05243302, %v1227_v57 }
 0x85b   :  { %v1266_v45 = vadd.f32 0.0036580483, %v1265_v3  ;;  %v1277_v52 = vadd.f32 0.014752088, %v1276_v53  ;;  %v1240_v9 = vmul.f32 %v1239_v2, %v3878_v26  ;;  %v1475_v40 = vsel %vm1474_vm9, %v3896_v51, %v1471_v38 }
 0x85c   :  { %v1167_v18 = vmul.f32 %v2983_v42, %v1166_v8  ;;  %v1203_v8 = vadd.f32 1.0, %v1202_v62  ;;  %v3981_v12 = vmul.f32 %v1475_v40, %v3707_v1  ;;  %v1191_v31 = vmul.f32 %v1190_v20, %v3816_v46 }
 0x85d   :  { %v1278_v11 = vmul.f32 %v1277_v52, %v3924_v50  ;;  %v1267_v15 = vmul.f32 %v1266_v45, %v3924_v50  ;;  %v1241_v29 = vadd.f32 0.4994258, %v1240_v9 }
 0x85e   :  { %v1168_v43 = vadd.f32 %v2983_v42, %v1167_v18  ;;  %2984 = vrcp.f32 %v1203_v8  ;;  %2759 = vmatmul.msk.f32.gmra.mxu3 %vm85_vm0, %v3981_v12  ;;  %v1213_v57 = vand.u32 2147483647, %v1203_v8  ;;  %vm1209_vm12 = vweird.f32 %v1203_v8 }
 0x85f   :  { %v1279_v7 = vadd.f32 0.112945676, %v1278_v11  ;;  %v1242_v28 = vmul.f32 %v1241_v29, %v3878_v26  ;;  %v1215_v11 = vand.u32 2147483648, %v1203_v8 }
 0x860   :  { %v1172_v47 = vsel %vm1171_vm7, %v2983_v42, %v1168_v43  ;;  %vm1214_vm14 = vcmp.eq.f32.partialorder %v1213_v57, 8.507059e+37 }
 0x861   :  { %v1177_v33 = vsel %vm1174_vm8, %v1176_v54, %v1172_v47  ;;  %v1280_v18 = vmul.f32 %v1279_v7, %v3924_v50  ;;  %v1243_v45 = vadd.f32 1.0, %v1242_v28  ;;  %v1229_v54 = vmul.f32 %v1228_v17, %v3878_v26 }
 0x862   :  { %v1178_v3 = vmul.f32 %v1177_v33, %v1153_v49  ;;  %v1268_v49 = vadd.f32 0.05243302, %v1267_v15  ;;  %v1192_v47 = vadd.f32 1.1283791, %v1191_v31  ;;  %v1216_v7 = vor.u32 1.1754944e-38, %v1215_v11 }
 0x863   :  { %v1281_v30 = vadd.f32 0.4994258, %v1280_v18  ;;  %2986 = vrcp.f32 %v1243_v45  ;;  %v1230_v24 = vadd.f32 0.18741608, %v1229_v54  ;;  %vm1249_vm5 = vweird.f32 %v1243_v45 }
 0x864   :  { %v2738_v42 = vclamps-f32 %v1178_v3, 1.0  ;;  %v2985_v52 = vpop.eup %2984  ;;  %v1269_v62 = vmul.f32 %v1268_v49, %v3924_v50  ;;  %v1193_v29 = vmul.f32 %v1192_v47, %v3793_v10 }
 0x865   :  { %v1282_v55 = vmul.f32 %v1281_v30, %v3924_v50  ;;  %v1205_v51 = vmul.f32 %v2985_v52, %v1203_v8  ;;  %vm1210_vm11 = vweird.f32 %v2985_v52  ;;  %v1231_v15 = vmul.f32 %v1230_v24, %v3878_v26 }
 0x866   :  { %v1301_v53 = vadd.f32 1.0, %v2738_v42  ;;  %v1270_v46 = vadd.f32 0.18741608, %v1269_v62  ;;  %vm1211_vm13 = vmor %vm1209_vm12, %vm1210_vm11  ;;  %v1253_v8 = vand.u32 2147483647, %v1243_v45 }
 0x867   :  { %v1283_v1 = vadd.f32 1.0, %v1282_v55  ;;  %v1206_v2 = vsub.f32 1.0, %v1205_v51  ;;  %v1232_v40 = vadd.f32 1.1283791, %v1231_v15 }
 0x868   :  { %v1305_v43 = vmul.f32 %v1301_v53, %v1133_v32  ;;  %v1271_v38 = vmul.f32 %v1270_v46, %v3924_v50  ;;  %v1255_v53 = vand.u32 2147483648, %v1243_v45  ;;  %vm1254_vm8 = vcmp.eq.f32.partialorder %v1253_v8, 8.507059e+37  ;;  %v2890_v8 = vld [vmem:[%s4532_s8 + $0x1] ss:$0 sm:$0xff] }
 0x869   :  { %2988 = vrcp.f32 %v1283_v1  ;;  %v1207_v33 = vmul.f32 %v2985_v52, %v1206_v2  ;;  %v2987_v9 = vpop.eup %2986  ;;  %v1293_v51 = vand.u32 2147483647, %v1283_v1  ;;  %v1233_v2 = vmul.f32 %v1232_v40, %v3852_v35 }
 0x86a   :  { %2742 = vmatmul.msk.f32.vlgmr.msra.gmra.mxu1 %vm1310_vm10, %v1305_v43  ;;  %v1245_v42 = vmul.f32 %v2987_v9, %v1243_v45  ;;  %vm1250_vm4 = vweird.f32 %v2987_v9  ;;  %v1272_v26 = vadd.f32 1.1283791, %v1271_v38  ;;  %v1134_v43 = vmul.f32 0.5, %v3780_v63 }
 0x86b   :  { %v1208_v3 = vadd.f32 %v2985_v52, %v1207_v33  ;;  %v1256_v50 = vor.u32 1.1754944e-38, %v1255_v53  ;;  %vm1251_vm6 = vmor %vm1249_vm5, %vm1250_vm4  ;;  %vm1289_vm9 = vweird.f32 %v1283_v1  ;;  %vm1294_vm12 = vcmp.eq.f32.partialorder %v1293_v51, 8.507059e+37 }
 0x86c   :  { %v1246_v18 = vsub.f32 1.0, %v1245_v42  ;;  %v1273_v45 = vmul.f32 %v1272_v26, %v3902_v59  ;;  %v1135_v35 = vmul.f32 0.5, %v3834_v44  ;;  %v1136_v38 = vmul.f32 0.5, %v3886_v48 }
 0x86d   :  { %v1212_v32 = vsel %vm1211_vm13, %v2985_v52, %v1208_v3  ;;  %v1295_v52 = vand.u32 2147483648, %v1283_v1 }
 0x86e   :  { %v1217_v17 = vsel %vm1214_vm14, %v1216_v7, %v1212_v32  ;;  %v1247_v30 = vmul.f32 %v2987_v9, %v1246_v18 }
 0x86f   :  { %v2989_v20 = vpop.eup %2988  ;;  %v1218_v49 = vmul.f32 %v1217_v17, %v1193_v29  ;;  %v1296_v33 = vor.u32 1.1754944e-38, %v1295_v52 }
 0x870   :  { %v1285_v28 = vmul.f32 %v2989_v20, %v1283_v1  ;;  %v1248_v10 = vadd.f32 %v2987_v9, %v1247_v30  ;;  %vm1290_vm7 = vweird.f32 %v2989_v20 }
 0x871   :  { %v2739_v31 = vclamps-f32 %v1218_v49, 1.0  ;;  %vm1291_vm11 = vmor %vm1289_vm9, %vm1290_vm7 }
 0x872   :  { %v1286_v54 = vsub.f32 1.0, %v1285_v28  ;;  %v1252_v47 = vsel %vm1251_vm6, %v2987_v9, %v1248_v10 }
 0x873   :  { %v1302_v55 = vadd.f32 1.0, %v2739_v31  ;;  %v1257_v11 = vsel %vm1254_vm8, %v1256_v50, %v1252_v47 }
 0x874   :  { %v1287_v62 = vmul.f32 %v2989_v20, %v1286_v54  ;;  %v1258_v63 = vmul.f32 %v1257_v11, %v1233_v2 }
 0x875   :  { %v1306_v24 = vmul.f32 %v1302_v55, %v1134_v43 }
 0x876   :  { %v1288_v46 = vadd.f32 %v2989_v20, %v1287_v62  ;;  %v2740_v3 = vclamps-f32 %v1258_v63, 1.0  ;;  %v80_v62 = vld [vmem:[%s4534_s10] sm:$0xf] }
 0x877   :  { %2743 = vmatmul.msk.f32.gmra.mxu1 %vm1310_vm10, %v1306_v24 }
 0x878   :  { %v1292_v57 = vsel %vm1291_vm11, %v2989_v20, %v1288_v46  ;;  %v1303_v9 = vadd.f32 1.0, %v2740_v3 }
 0x879   :  { %v1297_v15 = vsel %vm1294_vm12, %v1296_v33, %v1292_v57 }
 0x87a   :  { %v1298_v7 = vmul.f32 %v1297_v15, %v1273_v45  ;;  %v1307_v29 = vmul.f32 %v1303_v9, %v1135_v35 }
 0x87c   :  { %v2741_v42 = vclamps-f32 %v1298_v7, 1.0 }
 0x87e   :  { %v1304_v1 = vadd.f32 1.0, %v2741_v42 }
 0x87f   :  { %2744 = vmatmul.msk.f32.gmra.mxu1 %vm1310_vm10, %v1307_v29 }
 0x880   :  { %v1308_v32 = vmul.f32 %v1304_v1, %v1136_v38 }
 0x887   :  { %2745 = vmatmul.msk.f32.gmra.mxu1 %vm1310_vm10, %v1308_v32 }
 0x8b9   :  { %v1538_v59 = vpop.f32.mrf.mxu3 }
 0x8ba   :  { %v4015_v48 = vadd.f32 %v1538_v59, %v3293_v34 }
 0x8d1   :  { %v1541_v17 = vpop.f32.mrf.mxu3 }
 0x8d2   :  { %v4010_v28 = vadd.f32 %v1541_v17, %v3293_v34 }
 0x8d9   :  { %v1544_v20 = vpop.f32.mrf.mxu3 }
 0x8da   :  { %v4005_v44 = vadd.f32 %v1544_v20, %v3293_v34 }
 0x8e1   :  { %v1547_v18 = vpop.f32.mrf.mxu3 }
 0x8e2   :  { %v4002_v53 = vadd.f32 %v1547_v18, %v3293_v34 }
 0x8e4   :  { %2772 = vmatpush.xpose.msk.msra.mxu3 %vm85_vm0, %v4002_v53 }
 0x8e7   :  { %v1340_v49 = vpop.f32.mrf.mxu1 }
 0x8e8   :  { %2773 = vmatpush.xpose.msk.msra.mxu3 %vm85_vm0, %v4005_v44  ;;  %v1341_v34 = vadd.f32 %v2890_v8, %v1340_v49 }
 0x8ea   :  { %v1352_v55 = vadd.f32 %v1341_v34, %v3549_v39  ;;  %v3080_v39 = vld [vmem:[%s4526_s2 + $0x10] sm:$0xff] }
 0x8ec   :  { %2774 = vmatpush.xpose.msk.msra.mxu3 %vm85_vm0, %v4010_v28 }
 0x8f0   :  { %2775 = vmatpush.xpose.msk.msra.mxu3 %vm85_vm0, %v4015_v48 }
 0x8f4   :  { %v1343_v40 = vpop.f32.mrf.mxu1 }
 0x8f5   :  { %v1344_v54 = vadd.f32 %v2890_v8, %v1343_v40 }
 0x8f7   :  { %v1353_v52 = vadd.f32 %v1344_v54, %v3554_v36  ;;  %v3079_v36 = vld [vmem:[%s4526_s2 + $0x20] sm:$0xff] }
 0x8fc   :  { %v1346_v30 = vpop.f32.mrf.mxu1 }
 0x8fd   :  { %v1347_v43 = vadd.f32 %v2890_v8, %v1346_v30 }
 0x8ff   :  { %v1354_v50 = vadd.f32 %v1347_v43, %v3559_v56  ;;  %v3081_v56 = vld [vmem:[%s4526_s2] sm:$0xff] }
 0x904   :  { %v1349_v26 = vpop.f32.mrf.mxu1 }
 0x905   :  { %v1350_v31 = vadd.f32 %v2890_v8, %v1349_v26 }
 0x907   :  { %v1355_v10 = vadd.f32 %v1350_v31, %v3564_v61  ;;  %v3078_v61 = vld [vmem:[%s4526_s2 + $0x30] sm:$0xff] }
 0x909   :  { %2746 = vmatpush.msk.msra.mxu2 %vm525_vm3, %v1355_v10 }
 0x90b   :  { %1375 = vmatpush.msra.mxu2 %v1354_v50 }
 0x90d   :  { %1376 = vmatpush.msra.mxu2 %v1353_v52 }
 0x90f   :  { %1377 = vmatpush.msra.mxu2 %v1352_v55 }
 0x910   :  { %2747 = vmatmul.msk.f32.vlgmr.msra.gmra.mxu2 %vm359_vm15, %v80_v62 }
 0x911   :  { %1504 = vmatpush.msrb.mxu2 %v3078_v61 }
 0x913   :  { %1505 = vmatpush.msrb.mxu2 %v3079_v36 }
 0x915   :  { %1506 = vmatpush.msrb.mxu2 %v3080_v39 }
 0x917   :  { %1507 = vmatpush.msrb.mxu2 %v3081_v56 }
 0x918   :  { %2752 = vmatmul.msk.f32.vlgmr.msrb.gmra.mxu2 %vm85_vm0, %v3822_v41  ;;  %v2891_v41 = vld [vmem:[%s4532_s8 + $0x2] ss:$0 sm:$0xff] }
 0x919   :  { %2764 = vmatpush.xpose.msk.msra.mxu2 %vm85_vm0, %v4002_v53 }
 0x91d   :  { %2765 = vmatpush.xpose.msk.msra.mxu2 %vm85_vm0, %v4005_v44 }
 0x920   :  { %2753 = vmatmul.msk.f32.gmra.mxu2 %vm85_vm0, %v3921_v13 }
 0x921   :  { %2766 = vmatpush.xpose.msk.msra.mxu2 %vm85_vm0, %v4010_v28 }
 0x925   :  { %2767 = vmatpush.xpose.msk.msra.mxu2 %vm85_vm0, %v4015_v48 }
 0x928   :  { %2754 = vmatmul.msk.f32.gmra.mxu2 %vm85_vm0, %v3957_v19  ;;  %v1382_v19 = vld [vmem:[%s4524_s0] sm:$0xf] }
 0x929   :  { %2790 = vmatpush.xpose.msk.msrb.mxu2 %vm85_vm0, %v4002_v53 }
 0x92d   :  { %2791 = vmatpush.xpose.msk.msrb.mxu2 %vm85_vm0, %v4005_v44 }
 0x930   :  { %2755 = vmatmul.msk.f32.gmra.mxu2 %vm85_vm0, %v3981_v12 }
 0x931   :  { %2792 = vmatpush.xpose.msk.msrb.mxu2 %vm85_vm0, %v4010_v28 }
 0x935   :  { %2793 = vmatpush.xpose.msk.msrb.mxu2 %vm85_vm0, %v4015_v48 }
 0x993   :  { %v1379_v13 = vpop.f32.mrf.mxu2 }
 0x994   :  { %v1384_v51 = vmul.f32 %v2891_v41, %v1379_v13 }
 0x996   :  { %v1385_v2 = vadd.f32 %v1384_v51, %v1382_v19 }
 0x998   :  { %1386 = vst.msk [vmem:[#allocation2] sm:$0xf] %vm95_vm1, %v1385_v2 }
 0x99b   :  { %v1509_v47 = vpop.f32.mrf.mxu2 }
 0x99c   :  { %v4077_v24 = vadd.f32 %v1509_v47, %v3276_v25 }
 0x99e   :  { %1696 = vrot.lane.b32.xlu0 %v4077_v24, %s3126_s24  ;;  %2768 = vmatmul.msk.f32.vlgmr.msra.gmra.mxu2 %vm85_vm0, %v4077_v24 }
 0x99f   :  { %2308 = vmatpush.msra.mxu2 %v3595_v0 }
 0x9a1   :  { %2309 = vmatpush.msra.mxu2 %v3601_v21 }
 0x9a3   :  { %v1512_v12 = vpop.f32.mrf.mxu2  ;;  %2310 = vmatpush.msra.mxu2 %v3607_v22 }
 0x9a4   :  { %v4087_v11 = vadd.f32 %v1512_v12, %v3276_v25 }
 0x9a5   :  { %2311 = vmatpush.msra.mxu2 %v3612_v23 }
 0x9a6   :  { %1698 = vrot.lane.b32.xlu1 %v4087_v11, %s3126_s24  ;;  %2769 = vmatmul.msk.f32.gmra.mxu2 %vm85_vm0, %v4087_v11 }
 0x9ab   :  { %v1515_v46 = vpop.f32.mrf.mxu2 }
 0x9ac   :  { %v4095_v63 = vadd.f32 %v1515_v46, %v3276_v25 }
 0x9ae   :  { %1700 = vrot.lane.b32.xlu2 %v4095_v63, %s3126_s24  ;;  %1554 = vrot.lane.b32.xlu1 %v4015_v48, %s3126_s24 }
 0x9af   :  { %2770 = vmatmul.msk.f32.gmra.mxu2 %vm85_vm0, %v4095_v63 }
 0x9b3   :  { %v1518_v0 = vpop.f32.mrf.mxu2 }
 0x9b4   :  { %v4104_v21 = vadd.f32 %v1518_v0, %v3276_v25 }
 0x9b6   :  { %1558 = vrot.lane.b32.xlu2 %v4005_v44, %s3126_s24  ;;  %1560 = vrot.lane.b32.xlu1 %v4002_v53, %s3126_s24 }
 0x9b7   :  { %1702 = vrot.lane.b32.xlu0 %v4104_v21, %s3126_s24  ;;  %2771 = vmatmul.msk.f32.gmra.mxu2 %vm85_vm0, %v4104_v21 }
 0x9bf   :  { %1556 = vrot.lane.b32.xlu0 %v4010_v28, %s3126_s24 }
 0xa08   :  { %v1701_v23 = vpop.permute.xlu2 %1700 }
 0xa10   :  { %v1697_v22 = vpop.permute.xlu0 %1696  ;;  %v1559_v3 = vpop.permute.xlu2 %1558 }
 0xa11   :  { %2776 = vmatmul.msk.f32.vlgmr.msra.gmra.mxu3 %vm85_vm0, %v1697_v22 }
 0xa18   :  { %v1699_v25 = vpop.permute.xlu1 %1698 }
 0xa19   :  { %2777 = vmatmul.msk.f32.gmra.mxu3 %vm85_vm0, %v1699_v25 }
 0xa20   :  { %v1555_v33 = vpop.permute.xlu1 %1554 }
 0xa21   :  { %2760 = vmatmul.msk.f32.vlgmr.msrb.gmra.mxu1 %vm85_vm0, %v1555_v33  ;;  %2778 = vmatmul.msk.f32.gmra.mxu3 %vm85_vm0, %v1701_v23 }
 0xa28   :  { %v1561_v15 = vpop.permute.xlu1 %1560 }
 0xa29   :  { %v1703_v45 = vpop.permute.xlu0 %1702 }
 0xa2a   :  { %2779 = vmatmul.msk.f32.gmra.mxu3 %vm85_vm0, %v1703_v45 }
 0xa31   :  { %v1557_v57 = vpop.permute.xlu0 %1556 }
 0xa32   :  { %2761 = vmatmul.msk.f32.gmra.mxu1 %vm85_vm0, %v1557_v57 }
 0xa3a   :  { %2762 = vmatmul.msk.f32.gmra.mxu1 %vm85_vm0, %v1559_v3 }
 0xa42   :  { %2763 = vmatmul.msk.f32.gmra.mxu1 %vm85_vm0, %v1561_v15 }
 0xa94   :  { %v1729_v7 = vpop.f32.mrf.mxu3 }
 0xa95   :  { %v1741_v35 = vmul.f32 0.35355338, %v1729_v7 }
 0xa97   :  { %v1745_v9 = vsel %vm359_vm15, %v1741_v35, -inf }
 0xa98   :  { %1746 = vmax.xlane.f32.xlu0 %v1745_v9 }
 0xa9c   :  { %v1732_v42 = vpop.f32.mrf.mxu3 }
 0xa9d   :  { %v1742_v29 = vmul.f32 0.35355338, %v1732_v42 }
 0xa9e   :  { %v4126_v59 = vpop.f32.mrf.mxu1 }
 0xa9f   :  { %v1748_v1 = vsel %vm359_vm15, %v1742_v29, -inf }
 0xaa0   :  { %1749 = vmax.xlane.f32.xlu2 %v1748_v1 }
 0xaa4   :  { %v1735_v38 = vpop.f32.mrf.mxu3 }
 0xaa5   :  { %v1743_v32 = vmul.f32 0.35355338, %v1735_v38 }
 0xaa7   :  { %v1751_v17 = vsel %vm359_vm15, %v1743_v32, -inf }
 0xaa8   :  { %1752 = vmax.xlane.f32.xlu1 %v1751_v17 }
 0xaac   :  { %1793 = vrot.lane.b32.xlu0 %v4126_v59, %s3126_s24 }
 0xaad   :  { %v1738_v20 = vpop.f32.mrf.mxu3 }
 0xaae   :  { %v1744_v18 = vmul.f32 0.35355338, %v1738_v20 }
 0xaaf   :  { %v1590_v49 = vpop.f32.mrf.mxu1 }
 0xab0   :  { %v1754_v40 = vsel %vm369_vm2, %v1744_v18, -inf }
 0xab1   :  { %1755 = vmax.xlane.f32.xlu2 %v1754_v40 }
 0xab4   :  { %1890 = vrot.lane.b32.xlu0 %v4077_v24, %s3127_s13 }
 0xab7   :  { %v1593_v30 = vpop.f32.mrf.mxu1 }
 0xab8   :  { %v4134_v8 = vpack.i.bf16 %v1590_v49, %v1593_v30 }
 0xabc   :  { %1892 = vrot.lane.b32.xlu0 %v4087_v11, %s3127_s13 }
 0xabf   :  { %v4138_v26 = vpop.f32.mrf.mxu1 }
 0xac0   :  { %2785 = vmatpush.msk.msra.mxu1 %vm525_vm3, %v4138_v26 }
 0xac1   :  { %1799 = vrot.lane.b32.xlu1 %v4138_v26, %s3126_s24 }
 0xac2   :  { %1874 = vmatpush.msra.mxu1 %v1593_v30 }
 0xac4   :  { %1875 = vmatpush.msra.mxu1 %v1590_v49  ;;  %2041 = vrot.lane.b32.xlu0 %v4077_v24, %s3128_s14 }
 0xac6   :  { %1876 = vmatpush.msra.mxu1 %v4126_v59 }
 0xac9   :  { %2870 = vrot.lane.b32.xlu2 %v4134_v8, %s3126_s24 }
 0xacc   :  { %1894 = vrot.lane.b32.xlu0 %v4095_v63, %s3127_s13 }
 0xb0b   :  { %v1747_v43 = vpop.xlane.xlu0 %1746 }
 0xb0c   :  { %v1757_v31 = vsub.f32 %v1741_v35, %v1747_v43 }
 0xb0e   :  { %v1761_v54 = vmul.f32 1.442695, %v1757_v31 }
 0xb10   :  { %2990 = vpow2.f32 %v1761_v54 }
 0xb13   :  { %v1750_v10 = vpop.xlane.xlu2 %1749 }
 0xb14   :  { %v1758_v34 = vsub.f32 %v1742_v29, %v1750_v10 }
 0xb16   :  { %v4151_v50 = vpop.eup %2990  ;;  %v1763_v52 = vmul.f32 1.442695, %v1758_v34 }
 0xb17   :  { %v1769_v55 = vsel %vm359_vm15, %v4151_v50, 0.0 }
 0xb18   :  { %2992 = vpow2.f32 %v1763_v52  ;;  %1770 = vadd.xlane.f32.xlu0 %v1769_v55 }
 0xb1b   :  { %v1753_v62 = vpop.xlane.xlu1 %1752 }
 0xb1c   :  { %v1759_v61 = vsub.f32 %v1743_v32, %v1753_v62 }
 0xb1e   :  { %v4155_v36 = vpop.eup %2992  ;;  %v1765_v39 = vmul.f32 1.442695, %v1759_v61  ;;  %v1794_v56 = vpop.permute.xlu0 %1793 }
 0xb1f   :  { %v1772_v41 = vsel %vm359_vm15, %v4155_v36, 0.0 }
 0xb20   :  { %2994 = vpow2.f32 %v1765_v39  ;;  %1773 = vadd.xlane.f32.xlu0 %v1772_v41 }
 0xb24   :  { %v1756_v13 = vpop.xlane.xlu2 %1755 }
 0xb25   :  { %v1760_v19 = vsub.f32 %v1744_v18, %v1756_v13 }
 0xb26   :  { %v4159_v51 = vpop.eup %2994  ;;  %v1891_v2 = vpop.permute.xlu0 %1890 }
 0xb27   :  { %v1767_v47 = vmul.f32 1.442695, %v1760_v19  ;;  %2794 = vmatmul.msk.f32.vlgmr.msrb.gmra.mxu2 %vm85_vm0, %v1891_v2  ;;  %v1775_v24 = vsel %vm359_vm15, %v4159_v51, 0.0 }
 0xb28   :  { %1776 = vadd.xlane.f32.xlu1 %v1775_v24 }
 0xb29   :  { %2996 = vpow2.f32 %v1767_v47 }
 0xb2c   :  { %v2871_v22 = vpop.permute.xlu2 %2870 }
 0xb2d   :  { %v2872_v23 = vunpack.i.l.bf16 %v2871_v22  ;;  %v2873_v33 = vunpack.i.h.bf16 %v2871_v22 }
 0xb2e   :  { %v1893_v12 = vpop.permute.xlu0 %1892 }
 0xb2f   :  { %v4164_v46 = vpop.eup %2996  ;;  %2795 = vmatmul.msk.f32.gmra.mxu2 %vm85_vm0, %v1893_v12 }
 0xb30   :  { %v1778_v0 = vsel %vm369_vm2, %v4164_v46, 0.0 }
 0xb31   :  { %1779 = vadd.xlane.f32.xlu2 %v1778_v0 }
 0xb33   :  { %v1800_v25 = vpop.permute.xlu1 %1799 }
 0xb34   :  { %2780 = vmatpush.msk.msra.mxu0 %vm525_vm3, %v1800_v25  ;;  %2043 = vrot.lane.b32.xlu0 %v4087_v11, %s3128_s14  ;;  %v1636_v11 = vpop.f32.mrf.mxu2 }
 0xb35   :  { %v4189_v15 = vmul.f32 0.35355338, %v1636_v11 }
 0xb36   :  { %v4172_v45 = vpop.permute.xlu0 %2041  ;;  %1831 = vmatpush.msra.mxu0 %v2872_v23 }
 0xb38   :  { %1832 = vmatpush.msra.mxu0 %v2873_v33 }
 0xb3a   :  { %1833 = vmatpush.msra.mxu0 %v1794_v56 }
 0xb3c   :  { %2803 = vmatpush.xpose.msk.msrb.mxu0 %vm85_vm0, %v4002_v53  ;;  %2047 = vrot.lane.b32.xlu0 %v4104_v21, %s3128_s14  ;;  %v1639_v53 = vpop.f32.mrf.mxu2 }
 0xb3e   :  { %v1895_v57 = vpop.permute.xlu0 %1894 }
 0xb3f   :  { %2796 = vmatmul.msk.f32.gmra.mxu2 %vm85_vm0, %v1895_v57 }
 0xb40   :  { %2804 = vmatpush.xpose.msk.msrb.mxu0 %vm85_vm0, %v4005_v44  ;;  %v1652_v44 = vsel %vm359_vm15, %v4189_v15, -inf }
 0xb41   :  { %2045 = vrot.lane.b32.xlu1 %v4095_v63, %s3128_s14 }
 0xb44   :  { %2805 = vmatpush.xpose.msk.msrb.mxu0 %vm85_vm0, %v4010_v28  ;;  %v1642_v3 = vpop.f32.mrf.mxu2 }
 0xb45   :  { %v4193_v7 = vmul.f32 0.35355338, %v1642_v3 }
 0xb47   :  { %v1658_v28 = vsel %vm359_vm15, %v4193_v7, -inf }
 0xb48   :  { %2806 = vmatpush.xpose.msk.msrb.mxu0 %vm85_vm0, %v4015_v48  ;;  %v4199_v48 = vmul.f32 0.35355338, %v1639_v53 }
 0xb49   :  { %1896 = vrot.lane.b32.xlu2 %v4104_v21, %s3127_s13 }
 0xb4a   :  { %v1655_v9 = vsel %vm359_vm15, %v4199_v48, -inf }
 0xb4c   :  { %v1645_v63 = vpop.f32.mrf.mxu2 }
 0xb4d   :  { %v4195_v35 = vmul.f32 0.35355338, %v1645_v63 }
 0xb4f   :  { %v1661_v21 = vsel %vm369_vm2, %v4195_v35, -inf }
 0xb66   :  { %1653 = vmax.xlane.f32.xlu0 %v1652_v44 }
 0xb6b   :  { %1659 = vmax.xlane.f32.xlu1 %v1658_v28 }
 0xb6e   :  { %1662 = vmax.xlane.f32.xlu0 %v1661_v21 }
 0xb72   :  { %1656 = vmax.xlane.f32.xlu2 %v1655_v9 }
 0xb8b   :  { %v1771_v42 = vpop.xlane.xlu0 %1770 }
 0xb8c   :  { %2998 = vrcp.f32 %v1771_v42 }
 0xb92   :  { %v2999_v29 = vpop.eup %2998 }
 0xb93   :  { %v1785_v1 = vmul.f32 %v2999_v29, %v4151_v50  ;;  %v1774_v38 = vpop.xlane.xlu0 %1773 }
 0xb94   :  { %3000 = vrcp.f32 %v1774_v38 }
 0xb95   :  { %2781 = vmatmul.msk.f32.vlgmr.msra.gmra.mxu0 %vm359_vm15, %v1785_v1 }
 0xb96   :  { %2589 = vmatpush.msra.mxu0 %v3775_v60 }
 0xb98   :  { %2590 = vmatpush.msra.mxu0 %v3790_v4 }
 0xb9a   :  { %v3001_v32 = vpop.eup %3000  ;;  %2591 = vmatpush.msra.mxu0 %v3802_v16 }
 0xb9b   :  { %v1777_v17 = vpop.xlane.xlu1 %1776  ;;  %v1786_v20 = vmul.f32 %v3001_v32, %v4155_v36 }
 0xb9c   :  { %3002 = vrcp.f32 %v1777_v17  ;;  %2592 = vmatpush.msra.mxu0 %v3814_v27 }
 0xb9d   :  { %2782 = vmatmul.msk.f32.gmra.mxu0 %vm359_vm15, %v1786_v20 }
 0xb9e   :  { %2593 = vmatpush.msra.mxu0 %v3828_v37 }
 0xba0   :  { %2594 = vmatpush.msra.mxu0 %v3848_v58 }
 0xba2   :  { %v3003_v18 = vpop.eup %3002  ;;  %2595 = vmatpush.msra.mxu0 %v3857_v5 }
 0xba3   :  { %v1787_v60 = vmul.f32 %v3003_v18, %v4159_v51 }
 0xba4   :  { %v1780_v4 = vpop.xlane.xlu2 %1779  ;;  %2596 = vmatpush.msra.mxu0 %v3873_v6 }
 0xba5   :  { %3004 = vrcp.f32 %v1780_v4  ;;  %2783 = vmatmul.msk.f32.gmra.mxu0 %vm359_vm15, %v1787_v60 }
 0xba6   :  { %v2044_v43 = vpop.permute.xlu0 %2043 }
 0xbaa   :  { %v1923_v16 = vpop.f32.mrf.mxu2 }
 0xbab   :  { %v3005_v49 = vpop.eup %3004  ;;  %v1935_v27 = vmul.f32 0.35355338, %v1923_v16 }
 0xbac   :  { %v1897_v40 = vpop.permute.xlu2 %1896  ;;  %v1788_v30 = vmul.f32 %v3005_v49, %v4164_v46 }
 0xbad   :  { %2797 = vmatmul.msk.f32.gmra.mxu2 %vm85_vm0, %v1897_v40  ;;  %v1939_v37 = vsel %vm359_vm15, %v1935_v27, -inf }
 0xbae   :  { %2784 = vmatmul.msk.f32.gmra.mxu0 %vm359_vm15, %v1788_v30  ;;  %1940 = vmax.xlane.f32.xlu0 %v1939_v37  ;;  %v2048_v50 = vpop.permute.xlu0 %2047 }
 0xbb2   :  { %v1926_v58 = vpop.f32.mrf.mxu2 }
 0xbb3   :  { %v1936_v5 = vmul.f32 0.35355338, %v1926_v58  ;;  %v2046_v10 = vpop.permute.xlu1 %2045 }
 0xbb5   :  { %v1942_v6 = vsel %vm359_vm15, %v1936_v5, -inf }
 0xbb6   :  { %2807 = vmatmul.msk.f32.vlgmr.msrb.gmra.mxu0 %vm85_vm0, %v4172_v45  ;;  %1943 = vmax.xlane.f32.xlu2 %v1942_v6 }
 0xbbe   :  { %2808 = vmatmul.msk.f32.gmra.mxu0 %vm85_vm0, %v2044_v43 }
 0xbc2   :  { %v1929_v31 = vpop.f32.mrf.mxu2 }
 0xbc3   :  { %v4227_v54 = vmul.f32 0.35355338, %v1929_v31 }
 0xbc5   :  { %v1945_v34 = vsel %vm359_vm15, %v4227_v54, -inf }
 0xbc6   :  { %2809 = vmatmul.msk.f32.gmra.mxu0 %vm85_vm0, %v2046_v10  ;;  %1946 = vmax.xlane.f32.xlu0 %v1945_v34 }
 0xbce   :  { %2810 = vmatmul.msk.f32.gmra.mxu0 %vm85_vm0, %v2048_v50 }
 0xbd9   :  { %v1654_v52 = vpop.xlane.xlu0 %1653 }
 0xbda   :  { %v1664_v55 = vsub.f32 %v4189_v15, %v1654_v52 }
 0xbdc   :  { %v1668_v62 = vmul.f32 1.442695, %v1664_v55 }
 0xbde   :  { %3006 = vpow2.f32 %v1668_v62  ;;  %v1660_v61 = vpop.xlane.xlu1 %1659 }
 0xbdf   :  { %v1666_v36 = vsub.f32 %v4193_v7, %v1660_v61 }
 0xbe1   :  { %v1672_v39 = vmul.f32 1.442695, %v1666_v36  ;;  %v1663_v0 = vpop.xlane.xlu0 %1662 }
 0xbe2   :  { %v1667_v11 = vsub.f32 %v4195_v35, %v1663_v0 }
 0xbe3   :  { %3008 = vpow2.f32 %v1672_v39 }
 0xbe4   :  { %v3007_v56 = vpop.eup %3006  ;;  %v1674_v63 = vmul.f32 1.442695, %v1667_v11 }
 0xbe5   :  { %v1657_v41 = vpop.xlane.xlu2 %1656  ;;  %v1676_v13 = vsel %vm359_vm15, %v3007_v56, 0.0 }
 0xbe6   :  { %v1665_v19 = vsub.f32 %v4199_v48, %v1657_v41  ;;  %1677 = vadd.xlane.f32.xlu2 %v1676_v13 }
 0xbe8   :  { %v1670_v51 = vmul.f32 1.442695, %v1665_v19 }
 0xbe9   :  { %v4237_v2 = vpop.eup %3008 }
 0xbea   :  { %3010 = vpow2.f32 %v1670_v51  ;;  %v1682_v47 = vsel %vm359_vm15, %v4237_v2, 0.0 }
 0xbee   :  { %1683 = vadd.xlane.f32.xlu2 %v1682_v47 }
 0xbf0   :  { %v3011_v24 = vpop.eup %3010 }
 0xbf1   :  { %v1679_v12 = vsel %vm359_vm15, %v3011_v24, 0.0 }
 0xbf2   :  { %1680 = vadd.xlane.f32.xlu0 %v1679_v12 }
 0xc06   :  { %1989 = vrot.lane.b32.xlu2 %v4138_v26, %s3127_s13 }
 0xc12   :  { %v4244_v46 = vpop.f32.mrf.mxu0 }
 0xc1a   :  { %v4246_v22 = vpop.f32.mrf.mxu0 }
 0xc21   :  { %v1941_v25 = vpop.xlane.xlu0 %1940 }
 0xc22   :  { %v1951_v23 = vsub.f32 %v1935_v27, %v1941_v25  ;;  %v4248_v33 = vpop.f32.mrf.mxu0 }
 0xc24   :  { %v1955_v45 = vmul.f32 1.442695, %v1951_v23 }
 0xc26   :  { %3012 = vpow2.f32 %v1955_v45 }
 0xc29   :  { %v1944_v57 = vpop.xlane.xlu2 %1943 }
 0xc2a   :  { %v1952_v53 = vsub.f32 %v1936_v5, %v1944_v57 }
 0xc2b   :  { %v4251_v3 = vpop.f32.mrf.mxu0 }
 0xc2c   :  { %v4253_v15 = vpop.eup %3012  ;;  %v1957_v44 = vmul.f32 1.442695, %v1952_v53 }
 0xc2d   :  { %v1963_v7 = vsel %vm359_vm15, %v4253_v15, 0.0 }
 0xc2e   :  { %3014 = vpow2.f32 %v1957_v44  ;;  %1964 = vadd.xlane.f32.xlu0 %v1963_v7 }
 0xc2f   :  { %3016 = vpow2.f32 %v1674_v63 }
 0xc30   :  { %v1932_v28 = vpop.f32.mrf.mxu2 }
 0xc31   :  { %v4257_v48 = vmul.f32 0.35355338, %v1932_v28 }
 0xc33   :  { %v2074_v21 = vpop.f32.mrf.mxu0  ;;  %v1948_v35 = vsel %vm369_vm2, %v4257_v48, -inf }
 0xc34   :  { %v4261_v9 = vpop.eup %3014  ;;  %1949 = vmax.xlane.f32.xlu1 %v1948_v35  ;;  %v2086_v10 = vmul.f32 0.35355338, %v2074_v21 }
 0xc35   :  { %v1966_v42 = vsel %vm359_vm15, %v4261_v9, 0.0  ;;  %v3017_v29 = vpop.eup %3016 }
 0xc36   :  { %1967 = vadd.xlane.f32.xlu0 %v1966_v42  ;;  %v1685_v38 = vsel %vm369_vm2, %v3017_v29, 0.0  ;;  %v2090_v50 = vsel %vm359_vm15, %v2086_v10, -inf }
 0xc39   :  { %v1947_v18 = vpop.xlane.xlu0 %1946 }
 0xc3a   :  { %v1953_v58 = vsub.f32 %v4227_v54, %v1947_v18 }
 0xc3b   :  { %v2077_v1 = vpop.f32.mrf.mxu0 }
 0xc3c   :  { %v2087_v32 = vmul.f32 0.35355338, %v2077_v1  ;;  %1686 = vadd.xlane.f32.xlu1 %v1685_v38  ;;  %v1959_v6 = vmul.f32 1.442695, %v1953_v58 }
 0xc3e   :  { %v2093_v17 = vsel %vm359_vm15, %v2087_v32, -inf }
 0xc3f   :  { %2094 = vmax.xlane.f32.xlu2 %v2093_v17 }
 0xc43   :  { %v2080_v30 = vpop.f32.mrf.mxu0 }
 0xc4a   :  { %1983 = vrot.lane.b32.xlu0 %v4126_v59, %s3127_s13 }
 0xc4b   :  { %v2083_v52 = vpop.f32.mrf.mxu0 }
 0xc4c   :  { %v2089_v55 = vmul.f32 0.35355338, %v2083_v52 }
 0xc4e   :  { %v2099_v62 = vsel %vm369_vm2, %v2089_v55, -inf }
 0xc55   :  { %2875 = vrot.lane.b32.xlu1 %v4134_v8, %s3127_s13 }
 0xc57   :  { %2140 = vrot.lane.b32.xlu2 %v4138_v26, %s3128_s14  ;;  %v2088_v26 = vmul.f32 0.35355338, %v2080_v30 }
 0xc59   :  { %v1678_v20 = vpop.xlane.xlu2 %1677  ;;  %v2096_v43 = vsel %vm359_vm15, %v2088_v26, -inf }
 0xc5a   :  { %3018 = vrcp.f32 %v1678_v20 }
 0xc60   :  { %v3019_v60 = vpop.eup %3018 }
 0xc61   :  { %v1692_v4 = vmul.f32 %v3019_v60, %v3007_v56  ;;  %v1684_v16 = vpop.xlane.xlu2 %1683 }
 0xc63   :  { %2786 = vmatmul.msk.f32.vlgmr.msra.gmra.mxu1 %vm359_vm15, %v1692_v4 }
 0xc65   :  { %v1681_v49 = vpop.xlane.xlu0 %1680 }
 0xc66   :  { %3020 = vrcp.f32 %v1681_v49 }
 0xc67   :  { %3022 = vrcp.f32 %v1684_v16 }
 0xc68   :  { %3024 = vpow2.f32 %v1959_v6 }
 0xc69   :  { %v1990_v27 = vpop.permute.xlu2 %1989 }
 0xc6a   :  { %2798 = vmatpush.msk.msrb.mxu3 %vm525_vm3, %v1990_v27 }
 0xc6c   :  { %v3021_v40 = vpop.eup %3020 }
 0xc6d   :  { %v1693_v37 = vmul.f32 %v3021_v40, %v3011_v24  ;;  %v3023_v5 = vpop.eup %3022 }
 0xc6e   :  { %v1694_v31 = vmul.f32 %v3023_v5, %v4237_v2  ;;  %v3025_v34 = vpop.eup %3024 }
 0xc6f   :  { %2787 = vmatmul.msk.f32.gmra.mxu1 %vm359_vm15, %v1693_v37  ;;  %v1969_v54 = vsel %vm359_vm15, %v3025_v34, 0.0 }
 0xc74   :  { %2097 = vmax.xlane.f32.xlu0 %v2096_v43 }
 0xc77   :  { %2788 = vmatmul.msk.f32.gmra.mxu1 %vm359_vm15, %v1694_v31 }
 0xc7f   :  { %2091 = vmax.xlane.f32.xlu1 %v2090_v50 }
 0xc80   :  { %1970 = vadd.xlane.f32.xlu2 %v1969_v54 }
 0xc87   :  { %2100 = vmax.xlane.f32.xlu1 %v2099_v62 }
 0xca0   :  { %2880 = vrot.lane.b32.xlu1 %v4134_v8, %s3128_s14 }
 0xca1   :  { %v1965_v51 = vpop.xlane.xlu0 %1964 }
 0xca7   :  { %v4285_v61 = vpop.xlane.xlu1 %1949 }
 0xca8   :  { %v1954_v40 = vsub.f32 %v4257_v48, %v4285_v61 }
 0xca9   :  { %v1968_v47 = vpop.xlane.xlu0 %1967 }
 0xcaa   :  { %v1961_v30 = vmul.f32 1.442695, %v1954_v40 }
 0xcaf   :  { %v1687_v36 = vpop.xlane.xlu1 %1686 }
 0xcb0   :  { %3026 = vrcp.f32 %v1687_v36 }
 0xcb2   :  { %v2095_v39 = vpop.xlane.xlu2 %2094 }
 0xcb3   :  { %v2103_v13 = vsub.f32 %v2087_v32, %v2095_v39 }
 0xcb5   :  { %v2108_v2 = vmul.f32 1.442695, %v2103_v13 }
 0xcb6   :  { %v3027_v56 = vpop.eup %3026 }
 0xcb7   :  { %v1695_v41 = vmul.f32 %v3027_v56, %v3017_v29  ;;  %3028 = vpow2.f32 %v2108_v2 }
 0xcb8   :  { %3030 = vrcp.f32 %v1965_v51 }
 0xcb9   :  { %2789 = vmatmul.msk.f32.gmra.mxu1 %vm359_vm15, %v1695_v41  ;;  %3032 = vrcp.f32 %v1968_v47 }
 0xcba   :  { %v2141_v19 = vpop.permute.xlu2 %2140 }
 0xcbb   :  { %2811 = vmatpush.msk.msrb.mxu1 %vm525_vm3, %v2141_v19 }
 0xcbc   :  { %v1984_v57 = vpop.permute.xlu0 %1983 }
 0xcbd   :  { %v4289_v24 = vpop.eup %3028 }
 0xcbe   :  { %v2117_v0 = vsel %vm359_vm15, %v4289_v24, 0.0  ;;  %v3031_v25 = vpop.eup %3030 }
 0xcbf   :  { %v1979_v45 = vmul.f32 %v3031_v25, %v4253_v15  ;;  %v3033_v11 = vpop.eup %3032 }
 0xcc0   :  { %v1980_v53 = vmul.f32 %v3033_v11, %v4261_v9 }
 0xcc7   :  { %v2876_v8 = vpop.permute.xlu1 %2875 }
 0xcc8   :  { %v2877_v12 = vunpack.i.l.bf16 %v2876_v8  ;;  %v2878_v23 = vunpack.i.h.bf16 %v2876_v8  ;;  %v3082_v8 = vld [vmem:[%s4532_s8] ss:$0 sm:$0xff] }
 0xcca   :  { %2021 = vmatpush.msrb.mxu3 %v2877_v12  ;;  %2118 = vadd.xlane.f32.xlu1 %v2117_v0 }
 0xccc   :  { %2022 = vmatpush.msrb.mxu3 %v2878_v23 }
 0xcce   :  { %2023 = vmatpush.msrb.mxu3 %v1984_v57 }
 0xccf   :  { %2799 = vmatmul.msk.f32.vlgmr.msrb.gmra.mxu3 %vm359_vm15, %v1979_v45 }
 0xcd7   :  { %2800 = vmatmul.msk.f32.gmra.mxu3 %vm359_vm15, %v1980_v53 }
 0xce0   :  { %v1878_v39 = vpop.f32.mrf.mxu1 }
 0xce1   :  { %v1879_v51 = vadd.f32 %v1878_v39, %v4244_v46 }
 0xce7   :  { %v2098_v44 = vpop.xlane.xlu0 %2097 }
 0xce8   :  { %v2104_v7 = vsub.f32 %v2088_v26, %v2098_v44 }
 0xcea   :  { %v2110_v63 = vmul.f32 1.442695, %v2104_v7 }
 0xcec   :  { %3034 = vpow2.f32 %v2110_v63  ;;  %v1881_v56 = vpop.f32.mrf.mxu1 }
 0xced   :  { %v1882_v25 = vadd.f32 %v1881_v56, %v4246_v22 }
 0xcf2   :  { %v3035_v28 = vpop.eup %3034  ;;  %v2092_v21 = vpop.xlane.xlu1 %2091 }
 0xcf3   :  { %v2102_v35 = vsub.f32 %v2086_v10, %v2092_v21  ;;  %v1971_v42 = vpop.xlane.xlu2 %1970  ;;  %v2120_v29 = vsel %vm359_vm15, %v3035_v28, 0.0 }
 0xcf4   :  { %3036 = vrcp.f32 %v1971_v42  ;;  %2121 = vadd.xlane.f32.xlu2 %v2120_v29  ;;  %v1884_v41 = vpop.f32.mrf.mxu1 }
 0xcf5   :  { %v2106_v15 = vmul.f32 1.442695, %v2102_v35  ;;  %v1885_v44 = vadd.f32 %v1884_v41, %v4248_v33 }
 0xcf7   :  { %3038 = vpow2.f32 %v2106_v15 }
 0xcfa   :  { %v3037_v1 = vpop.eup %3036  ;;  %v2101_v38 = vpop.xlane.xlu1 %2100 }
 0xcfb   :  { %v2105_v32 = vsub.f32 %v2089_v55, %v2101_v38  ;;  %v1981_v9 = vmul.f32 %v3037_v1, %v3025_v34 }
 0xcfd   :  { %v3039_v17 = vpop.eup %3038  ;;  %v2112_v20 = vmul.f32 1.442695, %v2105_v32  ;;  %2801 = vmatmul.msk.f32.gmra.mxu3 %vm359_vm15, %v1981_v9 }
 0xcfe   :  { %v2114_v18 = vsel %vm359_vm15, %v3039_v17, 0.0 }
 0xcff   :  { %3040 = vpow2.f32 %v2112_v20  ;;  %2115 = vadd.xlane.f32.xlu0 %v2114_v18 }
 0xd00   :  { %3042 = vpow2.f32 %v1961_v30 }
 0xd05   :  { %v3041_v60 = vpop.eup %3040 }
 0xd06   :  { %v2123_v4 = vsel %vm369_vm2, %v3041_v60, 0.0  ;;  %v3043_v37 = vpop.eup %3042 }
 0xd07   :  { %2124 = vadd.xlane.f32.xlu1 %v2123_v4  ;;  %v1972_v58 = vsel %vm369_vm2, %v3043_v37, 0.0 }
 0xd12   :  { %v2881_v16 = vpop.permute.xlu1 %2880 }
 0xd13   :  { %v2882_v49 = vunpack.i.l.bf16 %v2881_v16  ;;  %2134 = vrot.lane.b32.xlu0 %v4126_v59, %s3128_s14  ;;  %v2883_v27 = vunpack.i.h.bf16 %v2881_v16 }
 0xd15   :  { %2172 = vmatpush.msrb.mxu1 %v2882_v49 }
 0xd17   :  { %2173 = vmatpush.msrb.mxu1 %v2883_v27 }
 0xd36   :  { %v1887_v13 = vpop.f32.mrf.mxu1 }
 0xd37   :  { %v1888_v42 = vadd.f32 %v1887_v13, %v4251_v3 }
 0xd3d   :  { %1973 = vadd.xlane.f32.xlu0 %v1972_v58  ;;  %v2119_v5 = vpop.xlane.xlu1 %2118 }
 0xd52   :  { %v2025_v19 = vpop.f32.mrf.mxu3 }
 0xd53   :  { %v2037_v2 = vadd.f32 %v2025_v19, %v1879_v51 }
 0xd5a   :  { %v2028_v0 = vpop.f32.mrf.mxu3 }
 0xd5b   :  { %v2038_v45 = vadd.f32 %v2028_v0, %v1882_v25 }
 0xd67   :  { %v2122_v59 = vpop.xlane.xlu2 %2121 }
 0xd72   :  { %v2116_v26 = vpop.xlane.xlu0 %2115 }
 0xd73   :  { %3044 = vrcp.f32 %v2116_v26 }
 0xd74   :  { %3046 = vrcp.f32 %v2119_v5 }
 0xd75   :  { %3048 = vrcp.f32 %v2122_v59 }
 0xd79   :  { %v3045_v6 = vpop.eup %3044 }
 0xd7a   :  { %v2130_v43 = vmul.f32 %v3045_v6, %v3039_v17  ;;  %v3047_v10 = vpop.eup %3046  ;;  %v2125_v34 = vpop.xlane.xlu1 %2124 }
 0xd7b   :  { %v2131_v48 = vmul.f32 %v3047_v10, %v4289_v24  ;;  %v3049_v50 = vpop.eup %3048  ;;  %3050 = vrcp.f32 %v2125_v34 }
 0xd7c   :  { %v2132_v52 = vmul.f32 %v3049_v50, %v3035_v28 }
 0xd80   :  { %v2031_v53 = vpop.f32.mrf.mxu3 }
 0xd81   :  { %v3051_v54 = vpop.eup %3050  ;;  %v2039_v63 = vadd.f32 %v2031_v53, %v1885_v44 }
 0xd82   :  { %v2133_v55 = vmul.f32 %v3051_v54, %v3041_v60 }
 0xd85   :  { %v2135_v31 = vpop.permute.xlu0 %2134 }
 0xd86   :  { %2174 = vmatpush.msrb.mxu1 %v2135_v31 }
 0xd87   :  { %2812 = vmatmul.msk.f32.vlgmr.msrb.gmra.mxu1 %vm359_vm15, %v2130_v43 }
 0xd8f   :  { %2813 = vmatmul.msk.f32.gmra.mxu1 %vm359_vm15, %v2131_v48 }
 0xd97   :  { %2814 = vmatmul.msk.f32.gmra.mxu1 %vm359_vm15, %v2132_v52 }
 0xd9f   :  { %2815 = vmatmul.msk.f32.gmra.mxu1 %vm359_vm15, %v2133_v55 }
 0xdb0   :  { %v1974_v62 = vpop.xlane.xlu0 %1973 }
 0xdb1   :  { %3052 = vrcp.f32 %v1974_v62 }
 0xdb7   :  { %v3053_v61 = vpop.eup %3052 }
 0xdb8   :  { %v1982_v36 = vmul.f32 %v3053_v61, %v3043_v37 }
 0xdba   :  { %2802 = vmatmul.msk.f32.gmra.mxu3 %vm359_vm15, %v1982_v36 }
 0xe04   :  { %v2176_v47 = vpop.f32.mrf.mxu1 }
 0xe05   :  { %v2188_v24 = vadd.f32 %v2176_v47, %v2037_v2 }
 0xe07   :  { %v4316_v12 = vadd.f32 %v3082_v8, %v2188_v24 }
 0xe09   :  { %v2196_v23 = vsel %vm85_vm0, %v4316_v12, 0.0 }
 0xe0a   :  { %2197 = vadd.xlane.f32.xlu2 %v2196_v23 }
 0xe0c   :  { %v2179_v57 = vpop.f32.mrf.mxu1 }
 0xe0d   :  { %v2189_v11 = vadd.f32 %v2179_v57, %v2038_v45 }
 0xe0f   :  { %v4321_v46 = vadd.f32 %v3082_v8, %v2189_v11 }
 0xe11   :  { %v2199_v7 = vsel %vm85_vm0, %v4321_v46, 0.0 }
 0xe12   :  { %2200 = vadd.xlane.f32.xlu1 %v2199_v7 }
 0xe14   :  { %v2182_v28 = vpop.f32.mrf.mxu1 }
 0xe15   :  { %v2190_v21 = vadd.f32 %v2182_v28, %v2039_v63 }
 0xe17   :  { %v4326_v22 = vadd.f32 %v3082_v8, %v2190_v21 }
 0xe19   :  { %v2202_v35 = vsel %vm85_vm0, %v4326_v22, 0.0 }
 0xe1a   :  { %2203 = vadd.xlane.f32.xlu2 %v2202_v35 }
 0xe1c   :  { %v2185_v1 = vpop.f32.mrf.mxu1 }
 0xe3d   :  { %v2034_v29 = vpop.f32.mrf.mxu3 }
 0xe3e   :  { %v2040_v15 = vadd.f32 %v2034_v29, %v1888_v42 }
 0xe40   :  { %v2191_v38 = vadd.f32 %v2185_v1, %v2040_v15 }
 0xe42   :  { %v4331_v33 = vadd.f32 %v3082_v8, %v2191_v38 }
 0xe44   :  { %v2205_v32 = vsel %vm95_vm1, %v4331_v33, 0.0 }
 0xe45   :  { %2206 = vadd.xlane.f32.xlu0 %v2205_v32 }
 0xe7d   :  { %v2198_v9 = vpop.xlane.xlu2 %2197 }
 0xe7e   :  { %v2208_v17 = vmul.f32 %v2198_v9, %v3207_v14 }
 0xe80   :  { %v2212_v20 = vsub.f32 %v4316_v12, %v2208_v17 }
 0xe82   :  { %v2216_v18 = vmul.f32 %v2212_v20, %v2212_v20 }
 0xe84   :  { %v2220_v60 = vsel %vm85_vm0, %v2216_v18, 0.0 }
 0xe85   :  { %2221 = vadd.xlane.f32.xlu1 %v2220_v60  ;;  %v2201_v3 = vpop.xlane.xlu1 %2200 }
 0xe86   :  { %v2209_v4 = vmul.f32 %v2201_v3, %v3207_v14 }
 0xe88   :  { %v2213_v16 = vsub.f32 %v4321_v46, %v2209_v4 }
 0xe8a   :  { %v2217_v49 = vmul.f32 %v2213_v16, %v2213_v16 }
 0xe8c   :  { %v2223_v27 = vsel %vm85_vm0, %v2217_v49, 0.0  ;;  %v3083_v49 = vld [vmem:[%s4533_s9] ss:$0 sm:$0xff] }
 0xe8d   :  { %2224 = vadd.xlane.f32.xlu2 %v2223_v27  ;;  %v2204_v40 = vpop.xlane.xlu2 %2203 }
 0xe8e   :  { %v2210_v30 = vmul.f32 %v2204_v40, %v3207_v14 }
 0xe90   :  { %v2214_v37 = vsub.f32 %v4326_v22, %v2210_v30 }
 0xe92   :  { %v2218_v58 = vmul.f32 %v2214_v37, %v2214_v37 }
 0xe94   :  { %v2226_v26 = vsel %vm85_vm0, %v2218_v58, 0.0  ;;  %v3084_v58 = vld [vmem:[%s4531_s7] sm:$0xff] }
 0xe95   :  { %2227 = vadd.xlane.f32.xlu0 %v2226_v26  ;;  %v3085_v26 = vld [vmem:[%s4531_s7 + $0x8] sm:$0xff] }
 0xeb8   :  { %v2207_v5 = vpop.xlane.xlu0 %2206 }
 0xeb9   :  { %v2211_v6 = vmul.f32 %v2207_v5, %v3207_v14  ;;  %v3086_v5 = vld [vmem:[%s4531_s7 + $0x10] sm:$0xff] }
 0xebb   :  { %v4346_v43 = vsub.f32 %v4331_v33, %v2211_v6  ;;  %v3087_v6 = vld [vmem:[%s4531_s7 + $0x18] sm:$0xff] }
 0xebd   :  { %v2219_v31 = vmul.f32 %v4346_v43, %v4346_v43 }
 0xebf   :  { %v2229_v59 = vsel %vm95_vm1, %v2219_v31, 0.0  ;;  %v3089_v31 = vld [vmem:[%s4531_s7 + $0x28] sm:$0xff] }
 0xec0   :  { %2230 = vadd.xlane.f32.xlu1 %v2229_v59  ;;  %v3090_v59 = vld [vmem:[%s4531_s7 + $0x30] sm:$0xff] }
 0xef8   :  { %v2222_v10 = vpop.xlane.xlu1 %2221 }
 0xef9   :  { %v2232_v48 = vmul.f32 %v2222_v10, %v3207_v14  ;;  %v3091_v10 = vld [vmem:[%s4531_s7 + $0x38] sm:$0xf] }
 0xefb   :  { %v2236_v34 = vadd.f32 1e-05, %v2232_v48 }
 0xefd   :  { %3054 = vrsqrt.f32 %v2236_v34  ;;  %vm2246_vm13 = vweird.f32 %v2236_v34 }
 0xf00   :  { %v2225_v50 = vpop.xlane.xlu2 %2224 }
 0xf01   :  { %v2233_v52 = vmul.f32 %v2225_v50, %v3207_v14 }
 0xf03   :  { %v3055_v54 = vpop.eup %3054  ;;  %v2237_v55 = vadd.f32 1e-05, %v2233_v52 }
 0xf04   :  { %v2241_v62 = vmul.f32 %v3055_v54, %v2236_v34  ;;  %vm2247_vm2 = vweird.f32 %v3055_v54 }
 0xf05   :  { %3056 = vrsqrt.f32 %v2237_v55  ;;  %vm2248_vm14 = vmor %vm2246_vm13, %vm2247_vm2  ;;  %vm2256_vm5 = vweird.f32 %v2237_v55 }
 0xf06   :  { %v2242_v61 = vmul.f32 %v3055_v54, %v2241_v62  ;;  %v3093_v62 = vld [vmem:[%s4533_s9 + $0x2] ss:$0 sm:$0xff] }
 0xf08   :  { %v2243_v36 = vmul.f32 0.5, %v2242_v61  ;;  %v2228_v39 = vpop.xlane.xlu0 %2227 }
 0xf09   :  { %v2234_v56 = vmul.f32 %v2228_v39, %v3207_v14 }
 0xf0a   :  { %v2244_v41 = vsub.f32 1.5, %v2243_v36 }
 0xf0b   :  { %v3057_v13 = vpop.eup %3056  ;;  %v2238_v19 = vadd.f32 1e-05, %v2234_v56  ;;  %v3094_v56 = vld [vmem:[%s4533_s9 + $0x3] ss:$0 sm:$0xff] }
 0xf0c   :  { %v2245_v51 = vmul.f32 %v3055_v54, %v2244_v41  ;;  %v2251_v2 = vmul.f32 %v3057_v13, %v2237_v55  ;;  %vm2257_vm4 = vweird.f32 %v3057_v13 }
 0xf0d   :  { %3058 = vrsqrt.f32 %v2238_v19  ;;  %vm2258_vm6 = vmor %vm2256_vm5, %vm2257_vm4  ;;  %vm2266_vm8 = vweird.f32 %v2238_v19 }
 0xf0e   :  { %v2249_v47 = vsel %vm2248_vm14, %v3055_v54, %v2245_v51  ;;  %v2252_v24 = vmul.f32 %v3057_v13, %v2251_v2  ;;  %v3092_v54 = vld [vmem:[%s4533_s9 + $0x1] ss:$0 sm:$0xff]  ;;  %v3095_v51 = vld [vmem:[%s4533_s9 + $0x4] ss:$0 sm:$0xff] }
 0xf0f   :  { %v2280_v8 = vmul.f32 %v2249_v47, %v2212_v20 }
 0xf10   :  { %v2253_v0 = vmul.f32 0.5, %v2252_v24 }
 0xf11   :  { %2816 = vmatmul.msk.f32.vlgmr.msra.gmra.mxu2 %vm85_vm0, %v2280_v8 }
 0xf12   :  { %v2254_v25 = vsub.f32 1.5, %v2253_v0 }
 0xf13   :  { %v3059_v23 = vpop.eup %3058 }
 0xf14   :  { %v2255_v45 = vmul.f32 %v3057_v13, %v2254_v25  ;;  %v2261_v57 = vmul.f32 %v3059_v23, %v2238_v19  ;;  %vm2267_vm7 = vweird.f32 %v3059_v23 }
 0xf15   :  { %vm2268_vm9 = vmor %vm2266_vm8, %vm2267_vm7 }
 0xf16   :  { %v2262_v11 = vmul.f32 %v3059_v23, %v2261_v57  ;;  %v2259_v53 = vsel %vm2258_vm6, %v3057_v13, %v2255_v45 }
 0xf17   :  { %v2281_v44 = vmul.f32 %v2259_v53, %v2213_v16 }
 0xf18   :  { %v2263_v7 = vmul.f32 0.5, %v2262_v11 }
 0xf19   :  { %2817 = vmatmul.msk.f32.gmra.mxu2 %vm85_vm0, %v2281_v44 }
 0xf1a   :  { %v2264_v63 = vsub.f32 1.5, %v2263_v7 }
 0xf1c   :  { %v2265_v28 = vmul.f32 %v3059_v23, %v2264_v63 }
 0xf1e   :  { %v2269_v21 = vsel %vm2268_vm9, %v3059_v23, %v2265_v28 }
 0xf1f   :  { %v2282_v35 = vmul.f32 %v2269_v21, %v2214_v37 }
 0xf21   :  { %2818 = vmatmul.msk.f32.gmra.mxu2 %vm85_vm0, %v2282_v35 }
 0xf33   :  { %v2231_v42 = vpop.xlane.xlu1 %2230 }
 0xf34   :  { %v2235_v29 = vmul.f32 %v2231_v42, %v3207_v14 }
 0xf36   :  { %v2239_v15 = vadd.f32 1e-05, %v2235_v29 }
 0xf38   :  { %3060 = vrsqrt.f32 %v2239_v15  ;;  %vm2276_vm12 = vweird.f32 %v2239_v15 }
 0xf3e   :  { %v3061_v1 = vpop.eup %3060 }
 0xf3f   :  { %v2271_v38 = vmul.f32 %v3061_v1, %v2239_v15  ;;  %vm2277_vm11 = vweird.f32 %v3061_v1 }
 0xf40   :  { %vm2278_vm2 = vmor %vm2276_vm12, %vm2277_vm11 }
 0xf41   :  { %v2272_v32 = vmul.f32 %v3061_v1, %v2271_v38 }
 0xf43   :  { %v2273_v9 = vmul.f32 0.5, %v2272_v32 }
 0xf45   :  { %v2274_v17 = vsub.f32 1.5, %v2273_v9 }
 0xf47   :  { %v2275_v20 = vmul.f32 %v3061_v1, %v2274_v17 }
 0xf49   :  { %v2279_v18 = vsel %vm2278_vm2, %v3061_v1, %v2275_v20 }
 0xf4a   :  { %v2283_v60 = vmul.f32 %v2279_v18, %v4346_v43  ;;  %v3088_v43 = vld [vmem:[%s4531_s7 + $0x20] sm:$0xff] }
 0xf4c   :  { %2819 = vmatmul.msk.f32.gmra.mxu2 %vm85_vm0, %v2283_v60 }
 0xf94   :  { %v2313_v3 = vpop.f32.mrf.mxu2 }
 0xf95   :  { %v2314_v37 = vadd.f32 %v3083_v49, %v2313_v3 }
 0xf97   :  { %v2373_v61 = vmul.f32 %v3093_v62, %v2314_v37 }
 0xf9c   :  { %v2316_v4 = vpop.f32.mrf.mxu2 }
 0xf9d   :  { %v2317_v30 = vadd.f32 %v3083_v49, %v2316_v4 }
 0xf9f   :  { %v2374_v47 = vmul.f32 %v3093_v62, %v2317_v30 }
 0xfa4   :  { %v2319_v16 = vpop.f32.mrf.mxu2 }
 0xfa5   :  { %v2320_v40 = vadd.f32 %v3083_v49, %v2319_v16 }
 0xfa7   :  { %v2375_v63 = vmul.f32 %v3093_v62, %v2320_v40 }
 0xfcf   :  { %v2322_v14 = vpop.f32.mrf.mxu2 }
 0xfd0   :  { %v4363_v27 = vadd.f32 %v3083_v49, %v2322_v14 }
 0xfd2   :  { %2820 = vmatpush.msk.msra.mxu3 %vm525_vm3, %v4363_v27 }
 0xfd4   :  { %2341 = vmatpush.msra.mxu3 %v2320_v40  ;;  %v2376_v40 = vmul.f32 %v3093_v62, %v4363_v27 }
 0xfd6   :  { %2342 = vmatpush.msra.mxu3 %v2317_v30 }
 0xfd8   :  { %2343 = vmatpush.msra.mxu3 %v2314_v37 }
 0xfd9   :  { %2821 = vmatmul.msk.f32.vlgmr.msra.gmra.mxu3 %vm359_vm15, %v3084_v58 }
 0xfe1   :  { %2822 = vmatmul.msk.f32.gmra.mxu3 %vm359_vm15, %v3085_v26 }
 0xfe9   :  { %2823 = vmatmul.msk.f32.gmra.mxu3 %vm359_vm15, %v3086_v5 }
 0xff1   :  { %2824 = vmatmul.msk.f32.gmra.mxu3 %vm359_vm15, %v3087_v6 }
 0xff9   :  { %2825 = vmatmul.msk.f32.gmra.mxu3 %vm359_vm15, %v3088_v43 }
0x1001   :  { %2826 = vmatmul.msk.f32.gmra.mxu3 %vm359_vm15, %v3089_v31 }
0x1009   :  { %2827 = vmatmul.msk.f32.gmra.mxu3 %vm359_vm15, %v3090_v59 }
0x1011   :  { %2828 = vmatmul.msk.f32.gmra.mxu3 %vm359_vm15, %v3091_v10 }
0x105c   :  { %v2345_v48 = vpop.f32.mrf.mxu3 }
0x105d   :  { %v2369_v55 = vmul.f32 %v3092_v54, %v2345_v48 }
0x105f   :  { %v2377_v39 = vadd.f32 %v2373_v61, %v2369_v55 }
0x1064   :  { %v2348_v34 = vpop.f32.mrf.mxu3 }
0x1065   :  { %v2370_v19 = vmul.f32 %v3092_v54, %v2348_v34 }
0x1067   :  { %v2378_v0 = vadd.f32 %v2374_v47, %v2370_v19 }
0x106c   :  { %v2351_v50 = vpop.f32.mrf.mxu3 }
0x106d   :  { %v2371_v11 = vmul.f32 %v3092_v54, %v2351_v50 }
0x106f   :  { %v2379_v29 = vadd.f32 %v2375_v63, %v2371_v11 }
0x1074   :  { %v2354_v52 = vpop.f32.mrf.mxu3 }
0x1075   :  { %v2372_v60 = vmul.f32 %v3092_v54, %v2354_v52 }
0x1077   :  { %v2380_v6 = vadd.f32 %v2376_v40, %v2372_v60 }
0x107c   :  { %v2357_v36 = vpop.f32.mrf.mxu3 }
0x107d   :  { %v2381_v41 = vmul.f32 %v3094_v56, %v2357_v36 }
0x107f   :  { %v2385_v13 = vadd.f32 %v2381_v41, %v2377_v39 }
0x1081   :  { %v4411_v2 = vadd.f32 %v3095_v51, %v2385_v13 }
0x1083   :  { %v4414_v24 = vmul.f32 0.70710677, %v4411_v2 }
0x1084   :  { %v2360_v8 = vpop.f32.mrf.mxu3 }
0x1085   :  { %v2401_v25 = vmul.f32 %v4414_v24, %v4414_v24  ;;  %v2382_v23 = vmul.f32 %v3094_v56, %v2360_v8 }
0x1087   :  { %v4418_v45 = vmin.f32 %v2401_v25, 16.0  ;;  %v2386_v57 = vadd.f32 %v2382_v23, %v2378_v0 }
0x1089   :  { %v2403_v53 = vmul.f32 2.1237322e-06, %v4418_v45  ;;  %v2414_v44 = vmul.f32 3.8918573e-05, %v4418_v45  ;;  %v4422_v7 = vadd.f32 %v3095_v51, %v2386_v57 }
0x108b   :  { %v2404_v28 = vadd.f32 0.00028619796, %v2403_v53  ;;  %v2415_v21 = vadd.f32 0.001143296, %v2414_v44  ;;  %v4425_v35 = vmul.f32 0.70710677, %v4422_v7 }
0x108c   :  { %v2363_v42 = vpop.f32.mrf.mxu3 }
0x108d   :  { %v2405_v15 = vmul.f32 %v2404_v28, %v4418_v45  ;;  %v2416_v1 = vmul.f32 %v2415_v21, %v4418_v45  ;;  %v2383_v38 = vmul.f32 %v3094_v56, %v2363_v42  ;;  %v2441_v32 = vmul.f32 %v4425_v35, %v4425_v35 }
0x108f   :  { %v2406_v9 = vadd.f32 0.0036580483, %v2405_v15  ;;  %v2417_v17 = vadd.f32 0.014752088, %v2416_v1  ;;  %v2387_v20 = vadd.f32 %v2383_v38, %v2379_v29  ;;  %v4431_v18 = vmin.f32 %v2441_v32, 16.0 }
0x1091   :  { %v2418_v3 = vmul.f32 %v2417_v17, %v4418_v45  ;;  %v4434_v4 = vadd.f32 %v3095_v51, %v2387_v20  ;;  %v2407_v16 = vmul.f32 %v2406_v9, %v4418_v45  ;;  %v2443_v14 = vmul.f32 2.1237322e-06, %v4431_v18 }
0x1092   :  { %v2454_v49 = vmul.f32 3.8918573e-05, %v4431_v18 }
0x1093   :  { %v2419_v30 = vadd.f32 0.112945676, %v2418_v3  ;;  %v2444_v37 = vadd.f32 0.00028619796, %v2443_v14  ;;  %v4441_v58 = vmul.f32 0.70710677, %v4434_v4 }
0x1094   :  { %v2366_v26 = vpop.f32.mrf.mxu3  ;;  %v2455_v5 = vadd.f32 0.001143296, %v2454_v49  ;;  %v2408_v59 = vadd.f32 0.05243302, %v2407_v16 }
0x1095   :  { %v2420_v43 = vmul.f32 %v2419_v30, %v4418_v45  ;;  %v2384_v31 = vmul.f32 %v3094_v56, %v2366_v26  ;;  %v2445_v10 = vmul.f32 %v2444_v37, %v4431_v18  ;;  %v2481_v48 = vmul.f32 %v4441_v58, %v4441_v58 }
0x1096   :  { %v2456_v34 = vmul.f32 %v2455_v5, %v4431_v18  ;;  %v2409_v36 = vmul.f32 %v2408_v59, %v4418_v45 }
0x1097   :  { %v2421_v27 = vadd.f32 0.4994258, %v2420_v43  ;;  %v2388_v50 = vadd.f32 %v2384_v31, %v2380_v6  ;;  %v2446_v52 = vadd.f32 0.0036580483, %v2445_v10  ;;  %v4448_v54 = vmin.f32 %v2481_v48, 16.0 }
0x1098   :  { %v2457_v55 = vadd.f32 0.014752088, %v2456_v34  ;;  %v2410_v25 = vadd.f32 0.18741608, %v2409_v36 }
0x1099   :  { %v2422_v62 = vmul.f32 %v2421_v27, %v4418_v45  ;;  %v4451_v61 = vadd.f32 %v3095_v51, %v2388_v50  ;;  %v2483_v39 = vmul.f32 2.1237322e-06, %v4448_v54  ;;  %v2447_v13 = vmul.f32 %v2446_v52, %v4431_v18 }
0x109a   :  { %v2458_v56 = vmul.f32 %v2457_v55, %v4431_v18  ;;  %v2494_v47 = vmul.f32 3.8918573e-05, %v4448_v54  ;;  %v2411_v21 = vmul.f32 %v2410_v25, %v4418_v45 }
0x109b   :  { %v2423_v41 = vadd.f32 1.0, %v2422_v62  ;;  %v4458_v19 = vmul.f32 0.70710677, %v4451_v61  ;;  %v2484_v8 = vadd.f32 0.00028619796, %v2483_v39 }
0x109c   :  { %v2459_v0 = vadd.f32 0.112945676, %v2458_v56  ;;  %v2448_v23 = vadd.f32 0.05243302, %v2447_v13  ;;  %v2495_v11 = vadd.f32 0.001143296, %v2494_v47 }
0x109d   :  { %3062 = vrcp.f32 %v2423_v41  ;;  %v2521_v51 = vmul.f32 %v4458_v19, %v4458_v19  ;;  %v2485_v53 = vmul.f32 %v2484_v8, %v4448_v54  ;;  %v2412_v14 = vadd.f32 1.1283791, %v2411_v21 }
0x109e   :  { %v2460_v57 = vmul.f32 %v2459_v0, %v4431_v18  ;;  %v2496_v28 = vmul.f32 %v2495_v11, %v4448_v54  ;;  %v2449_v1 = vmul.f32 %v2448_v23, %v4431_v18  ;;  %v2433_v45 = vand.u32 2147483647, %v2423_v41 }
0x109f   :  { %v4465_v44 = vmin.f32 %v2521_v51, 16.0  ;;  %v2486_v17 = vadd.f32 0.0036580483, %v2485_v53  ;;  %v2435_v40 = vand.u32 2147483648, %v2423_v41  ;;  %vm2429_vm13 = vweird.f32 %v2423_v41 }
0x10a0   :  { %v2461_v63 = vadd.f32 0.4994258, %v2460_v57  ;;  %v2497_v32 = vadd.f32 0.014752088, %v2496_v28  ;;  %v2450_v30 = vadd.f32 0.18741608, %v2449_v1  ;;  %v2413_v10 = vmul.f32 %v2412_v14, %v4414_v24 }
0x10a1   :  { %v2523_v42 = vmul.f32 2.1237322e-06, %v4465_v44  ;;  %v2534_v29 = vmul.f32 3.8918573e-05, %v4465_v44  ;;  %v2487_v26 = vmul.f32 %v2486_v17, %v4448_v54  ;;  %vm2434_vm4 = vcmp.eq.f32.partialorder %v2433_v45, 8.507059e+37 }
0x10a2   :  { %v2462_v38 = vmul.f32 %v2461_v63, %v4431_v18  ;;  %v2498_v3 = vmul.f32 %v2497_v32, %v4448_v54  ;;  %v2436_v48 = vor.u32 1.1754944e-38, %v2435_v40  ;;  %v2451_v50 = vmul.f32 %v2450_v30, %v4431_v18 }
0x10a3   :  { %v3063_v15 = vpop.eup %3062  ;;  %v2524_v20 = vadd.f32 0.00028619796, %v2523_v42  ;;  %v2535_v16 = vadd.f32 0.001143296, %v2534_v29  ;;  %v2488_v52 = vadd.f32 0.05243302, %v2487_v26 }
0x10a4   :  { %v2425_v9 = vmul.f32 %v3063_v15, %v2423_v41  ;;  %v2463_v60 = vadd.f32 1.0, %v2462_v38  ;;  %vm2430_vm0 = vweird.f32 %v3063_v15  ;;  %v2499_v5 = vadd.f32 0.112945676, %v2498_v3 }
0x10a5   :  { %v2525_v6 = vmul.f32 %v2524_v20, %v4465_v44  ;;  %v2536_v43 = vmul.f32 %v2535_v16, %v4465_v44  ;;  %vm2431_vm14 = vmor %vm2429_vm13, %vm2430_vm0  ;;  %v2393_v47 = vmul.f32 0.5, %v4411_v2  ;;  %v2452_v25 = vadd.f32 1.1283791, %v2451_v50 }
0x10a6   :  { %v2426_v49 = vsub.f32 1.0, %v2425_v9  ;;  %3064 = vrcp.f32 %v2463_v60  ;;  %v2500_v59 = vmul.f32 %v2499_v5, %v4448_v54  ;;  %v2489_v51 = vmul.f32 %v2488_v52, %v4448_v54 }
0x10a7   :  { %v2537_v34 = vadd.f32 0.014752088, %v2536_v43  ;;  %v2526_v39 = vadd.f32 0.0036580483, %v2525_v6  ;;  %v2475_v57 = vand.u32 2147483648, %v2463_v60  ;;  %vm2469_vm6 = vweird.f32 %v2463_v60 }
0x10a8   :  { %v2427_v37 = vmul.f32 %v3063_v15, %v2426_v49  ;;  %v2501_v55 = vadd.f32 0.4994258, %v2500_v59  ;;  %v2473_v21 = vand.u32 2147483647, %v2463_v60  ;;  %v2453_v32 = vmul.f32 %v2452_v25, %v4425_v35 }
0x10a9   :  { %v2538_v56 = vmul.f32 %v2537_v34, %v4465_v44  ;;  %v2527_v18 = vmul.f32 %v2526_v39, %v4465_v44  ;;  %v2476_v38 = vor.u32 1.1754944e-38, %v2475_v57  ;;  %v2394_v30 = vmul.f32 0.5, %v4422_v7 }
0x10aa   :  { %v2428_v31 = vadd.f32 %v3063_v15, %v2427_v37  ;;  %v2502_v24 = vmul.f32 %v2501_v55, %v4448_v54  ;;  %vm2474_vm8 = vcmp.eq.f32.partialorder %v2473_v21, 8.507059e+37  ;;  %v2396_v57 = vmul.f32 0.5, %v4451_v61 }
0x10ab   :  { %v2539_v8 = vadd.f32 0.112945676, %v2538_v56  ;;  %v2528_v1 = vadd.f32 0.05243302, %v2527_v18 }
0x10ac   :  { %v2432_v27 = vsel %vm2431_vm14, %v3063_v15, %v2428_v31  ;;  %v3065_v62 = vpop.eup %3064  ;;  %v2503_v11 = vadd.f32 1.0, %v2502_v24  ;;  %v2490_v15 = vadd.f32 0.18741608, %v2489_v51 }
0x10ad   :  { %v2437_v36 = vsel %vm2434_vm4, %v2436_v48, %v2432_v27  ;;  %v2465_v41 = vmul.f32 %v3065_v62, %v2463_v60  ;;  %v2540_v53 = vmul.f32 %v2539_v8, %v4465_v44  ;;  %vm2470_vm5 = vweird.f32 %v3065_v62 }
0x10ae   :  { %v2438_v13 = vmul.f32 %v2437_v36, %v2413_v10  ;;  %3066 = vrcp.f32 %v2503_v11  ;;  %vm2471_vm7 = vmor %vm2469_vm6, %vm2470_vm5  ;;  %v2491_v49 = vmul.f32 %v2490_v15, %v4448_v54  ;;  %v2529_v60 = vmul.f32 %v2528_v1, %v4465_v44 }
0x10af   :  { %v2466_v23 = vsub.f32 1.0, %v2465_v41  ;;  %v2541_v29 = vadd.f32 0.4994258, %v2540_v53  ;;  %v2515_v6 = vand.u32 2147483648, %v2503_v11  ;;  %v2513_v59 = vand.u32 2147483647, %v2503_v11 }
0x10b0   :  { %v2829_v0 = vclamps-f32 %v2438_v13, 1.0  ;;  %v2492_v26 = vadd.f32 1.1283791, %v2491_v49  ;;  %v2530_v5 = vadd.f32 0.18741608, %v2529_v60  ;;  %vm2509_vm11 = vweird.f32 %v2503_v11 }
0x10b1   :  { %v2467_v28 = vmul.f32 %v3065_v62, %v2466_v23  ;;  %v2542_v17 = vmul.f32 %v2541_v29, %v4465_v44  ;;  %v2516_v34 = vor.u32 1.1754944e-38, %v2515_v6  ;;  %vm2514_vm2 = vcmp.eq.f32.partialorder %v2513_v59, 8.507059e+37 }
0x10b2   :  { %v2561_v63 = vadd.f32 1.0, %v2829_v0  ;;  %v2531_v48 = vmul.f32 %v2530_v5, %v4465_v44  ;;  %v2493_v7 = vmul.f32 %v2492_v26, %v4441_v58  ;;  %v2395_v44 = vmul.f32 0.5, %v4434_v4 }
0x10b3   :  { %v2468_v42 = vadd.f32 %v3065_v62, %v2467_v28  ;;  %v2543_v16 = vadd.f32 1.0, %v2542_v17 }
0x10b4   :  { %v2565_v2 = vmul.f32 %v2561_v63, %v2393_v47  ;;  %v3067_v14 = vpop.eup %3066  ;;  %v2532_v39 = vadd.f32 1.1283791, %v2531_v48 }
0x10b5   :  { %v2472_v9 = vsel %vm2471_vm7, %v3065_v62, %v2468_v42  ;;  %v2505_v40 = vmul.f32 %v3067_v14, %v2503_v11  ;;  %3068 = vrcp.f32 %v2543_v16  ;;  %vm2510_vm9 = vweird.f32 %v3067_v14 }
0x10b6   :  { %2833 = vmatmul.msk.f32.vlgmr.msra.gmra.mxu0 %vm1310_vm10, %v2565_v2  ;;  %v2477_v20 = vsel %vm2474_vm8, %v2476_v38, %v2472_v9  ;;  %vm2511_vm12 = vmor %vm2509_vm11, %vm2510_vm9  ;;  %v2555_v36 = vand.u32 2147483648, %v2543_v16  ;;  %v2553_v13 = vand.u32 2147483647, %v2543_v16  ;;  %vm2549_vm13 = vweird.f32 %v2543_v16  ;;  %v3097_v9 = vld [vmem:[%s4534_s10] sm:$0xf]  ;;  %s3130_s10 = smov 4  }
0x10b7   :  { %v2478_v3 = vmul.f32 %v2477_v20, %v2453_v32  ;;  %v2506_v37 = vsub.f32 1.0, %v2505_v40  ;;  %v2533_v58 = vmul.f32 %v2532_v39, %v4458_v19  ;;  %v3096_v19 = vld [vmem:[%s4532_s8 + $0x1] ss:$0 sm:$0xff] }
0x10b8   :  { %v2556_v8 = vor.u32 1.1754944e-38, %v2555_v36  ;;  %vm2554_vm4 = vcmp.eq.f32.partialorder %v2553_v13, 8.507059e+37 }
0x10b9   :  { %v2830_v45 = vclamps-f32 %v2478_v3, 1.0  ;;  %v2507_v31 = vmul.f32 %v3067_v14, %v2506_v37 }
0x10bb   :  { %v2562_v35 = vadd.f32 1.0, %v2830_v45  ;;  %v3069_v10 = vpop.eup %3068  ;;  %v2508_v54 = vadd.f32 %v3067_v14, %v2507_v31 }
0x10bc   :  { %v2545_v27 = vmul.f32 %v3069_v10, %v2543_v16  ;;  %vm2550_vm0 = vweird.f32 %v3069_v10 }
0x10bd   :  { %v2566_v43 = vmul.f32 %v2562_v35, %v2394_v30  ;;  %v2512_v50 = vsel %vm2511_vm12, %v3067_v14, %v2508_v54  ;;  %vm2551_vm14 = vmor %vm2549_vm13, %vm2550_vm0 }
0x10be   :  { %v2517_v52 = vsel %vm2514_vm2, %v2516_v34, %v2512_v50  ;;  %v2546_v55 = vsub.f32 1.0, %v2545_v27 }
0x10bf   :  { %2834 = vmatmul.msk.f32.gmra.mxu0 %vm1310_vm10, %v2566_v43  ;;  %v2518_v62 = vmul.f32 %v2517_v52, %v2493_v7 }
0x10c0   :  { %v2547_v56 = vmul.f32 %v3069_v10, %v2546_v55 }
0x10c1   :  { %v2831_v41 = vclamps-f32 %v2518_v62, 1.0 }
0x10c2   :  { %v2548_v47 = vadd.f32 %v3069_v10, %v2547_v56 }
0x10c3   :  { %v2563_v24 = vadd.f32 1.0, %v2831_v41 }
0x10c4   :  { %v2552_v0 = vsel %vm2551_vm14, %v3069_v10, %v2548_v47 }
0x10c5   :  { %v2567_v25 = vmul.f32 %v2563_v24, %v2395_v44  ;;  %v2557_v51 = vsel %vm2554_vm4, %v2556_v8, %v2552_v0 }
0x10c6   :  { %v2558_v23 = vmul.f32 %v2557_v51, %v2533_v58 }
0x10c7   :  { %2835 = vmatmul.msk.f32.gmra.mxu0 %vm1310_vm10, %v2567_v25 }
0x10c8   :  { %v2832_v18 = vclamps-f32 %v2558_v23, 1.0 }
0x10ca   :  { %v2564_v11 = vadd.f32 1.0, %v2832_v18 }
0x10cc   :  { %v2568_v53 = vmul.f32 %v2564_v11, %v2396_v57 }
0x10cf   :  { %2836 = vmatmul.msk.f32.gmra.mxu0 %vm1310_vm10, %v2568_v53 }
0x1133   :  { %v2598_v4 = vpop.f32.mrf.mxu0 }
0x1134   :  { %v2599_v1 = vadd.f32 %v3096_v19, %v2598_v4 }
0x1136   :  { %v2610_v32 = vadd.f32 %v2599_v1, %v4316_v12  ;;  %v3098_v12 = vld [vmem:[%s4532_s8 + $0x2] ss:$0 sm:$0xff] }
0x113c   :  { %v2601_v63 = vpop.f32.mrf.mxu0 }
0x113d   :  { %v2602_v29 = vadd.f32 %v3096_v19, %v2601_v63 }
0x113f   :  { %v2611_v38 = vadd.f32 %v2602_v29, %v4321_v46 }
0x1144   :  { %v2604_v28 = vpop.f32.mrf.mxu0 }
0x1145   :  { %v2605_v2 = vadd.f32 %v3096_v19, %v2604_v28 }
0x1147   :  { %v2612_v61 = vadd.f32 %v2605_v2, %v4326_v22  ;;  %v2839_v22 = vld [vmem:[%s4524_s0 + $0x4] sm:$0xf] }
0x114c   :  { %v2607_v21 = vpop.f32.mrf.mxu0 }
0x114d   :  { %v2608_v42 = vadd.f32 %v3096_v19, %v2607_v21 }
0x114f   :  { %v2613_v15 = vadd.f32 %v2608_v42, %v4331_v33 }
0x1151   :  { %2837 = vmatpush.msk.msra.mxu1 %vm525_vm3, %v2613_v15 }
0x1153   :  { %2630 = vmatpush.msra.mxu1 %v2612_v61 }
0x1155   :  { %2631 = vmatpush.msra.mxu1 %v2611_v38 }
0x1157   :  { %2632 = vmatpush.msra.mxu1 %v2610_v32 }
0x1158   :  { %2838 = vmatmul.msk.f32.vlgmr.msra.gmra.mxu1 %vm359_vm15, %v3097_v9 }
0x11d5   :  { %v2634_v33 = vpop.f32.mrf.mxu1 }
0x11d6   :  { %v2639_v46 = vmul.f32 %v3098_v12, %v2634_v33 }
0x11d8   :  { %v2640_v17 = vadd.f32 %v2839_v22, %v2639_v46 }
0x11da   :  { %2642 = vst.msk [vmem:[#allocation2 + $0x4] sm:$0xf] %vm95_vm1, %v2640_v17 }
0x11db   :  { %2655 = dma.vmem_to_hbm [thread:$0]  %s2648_s12, 128, %s2650_s18, [#allocation3], %s3127_s13, %s3127_s13, %s3130_s10  }
0x11dc   :  { %3123 = dma.done.wait [#allocation3], 128  }
0x11dd   :  { %3124 = vsyncadd [#allocation3], 4294967168 }
0x11de   :  { %2660 = vsyncpa [#allocation3], 1 }

</bundles_post_ra>
